<compile_context>
chip_gen: v7x
topology: tpu7x:2x2x1
jax: 0.10.0
libtpu: 0.0.40
codegen_flags: <defaults>
</compile_context>

<pallas_src>
import functools
import math

import numpy as np
import jax
import jax.numpy as jnp
from jax.experimental import pallas as pl
from jax.experimental.pallas import tpu as pltpu  # noqa: F401  (TPU backend assumed)


# ----------------------------------------------------------------------------
# Fused kernel: all layers + decoder + argmax. No grid (single invocation);
# every ref is a whole-array VMEM block, intermediates stay in VMEM/vregs.
#
# Carried activation layout per layer: (N, C, E) with
#   axis 0 = this layer's BatchNorm reduction / attention batch axis,
#   axis 1 = this layer's BatchNorm channel / attention sequence axis.
# The reference module's swapaxes choreography makes these roles alternate each
# layer; the alternation is implemented by a row-permutation matmul (perm_ref).
# ----------------------------------------------------------------------------
def _generator_kernel(x_ref, perm_ref, bn_g_ref, bn_b_ref,
                      wq_ref, wk_ref, wv_ref, wo_ref,
                      bq_ref, bk_ref, bv_ref, bo_ref,
                      dec_wt_ref, dec_b_ref, o_ref,
                      *, num_heads, num_layers):
    cur = x_ref[...]                               # (N0, C0, E) = (B, S, E)
    n, c, e = cur.shape
    dh = e // num_heads
    scale = 1.0 / math.sqrt(dh)

    out2 = None
    for layer in range(num_layers):
        # ---- BatchNorm1d over channel axis 1 (training-mode batch statistics,
        #      biased variance, eps = 1e-5) ----------------------------------
        cnt = float(n * e)
        ssum = jnp.sum(cur, axis=2, keepdims=True)
        ssum = jnp.sum(ssum, axis=0, keepdims=True)            # (1, c, 1)
        mean = ssum * (1.0 / cnt)
        diff = cur - mean
        vsum = jnp.sum(diff * diff, axis=2, keepdims=True)
        vsum = jnp.sum(vsum, axis=0, keepdims=True)            # (1, c, 1)
        inv = jax.lax.rsqrt(vsum * (1.0 / cnt) + 1e-5)
        xn = diff * inv * bn_g_ref[layer] + bn_b_ref[layer]    # (n, c, e)

        # ---- multi-head self-attention: batch = axis 0, seq = axis 1 -------
        x2 = xn.reshape(n * c, e)                              # (n*c, e)
        q2 = jnp.dot(x2, wq_ref[layer],
                     preferred_element_type=jnp.float32) + bq_ref[layer]
        k2 = jnp.dot(x2, wk_ref[layer],
                     preferred_element_type=jnp.float32) + bk_ref[layer]
        v2 = jnp.dot(x2, wv_ref[layer],
                     preferred_element_type=jnp.float32) + bv_ref[layer]
        q3 = q2.reshape(n, c, e)
        k3 = k2.reshape(n, c, e)
        v3 = v2.reshape(n, c, e)

        # merge heads into the leading (batch-like) axis -> one batched einsum
        # per stage instead of a per-head Python loop of tiny matmuls.
        qm = jnp.concatenate(
            [q3[:, :, h * dh:(h + 1) * dh] for h in range(num_heads)], axis=0)
        km = jnp.concatenate(
            [k3[:, :, h * dh:(h + 1) * dh] for h in range(num_heads)], axis=0)
        vm = jnp.concatenate(
            [v3[:, :, h * dh:(h + 1) * dh] for h in range(num_heads)], axis=0)

        sc = jnp.einsum('bqd,bkd->bqk', qm, km,
                        preferred_element_type=jnp.float32) * scale   # (H*n, c, c)
        sc = sc - jnp.max(sc, axis=-1, keepdims=True)
        p = jnp.exp(sc)
        p = p * pl.reciprocal(jnp.sum(p, axis=-1, keepdims=True), approx=True)
        ctx = jnp.einsum('bqk,bkd->bqd', p, vm,
                         preferred_element_type=jnp.float32)          # (H*n, c, dh)

        # un-merge heads (concat along lanes) + single output projection
        ctx_cat = jnp.concatenate(
            [ctx[h * n:(h + 1) * n] for h in range(num_heads)], axis=-1)   # (n, c, e)
        out2 = jnp.dot(ctx_cat.reshape(n * c, e), wo_ref[layer],
                       preferred_element_type=jnp.float32) + bo_ref[layer]  # (n*c, e)

        if layer + 1 < num_layers:
            # literal inter-layer swapaxes(0,1): reorder rows from n-major to
            # c-major with a constant permutation matmul (stays on the MXU,
            # avoids an in-kernel major-axis transpose/relayout).
            out2 = jnp.dot(perm_ref[...], out2,
                           preferred_element_type=jnp.float32)
            cur = out2.reshape(c, n, e)
            n, c = c, n

    # ---- decoder Linear + first-argmax over tokens, lane-dense output ------
    # logits laid out (T, n*c): token axis on sublanes, rows on lanes.
    logits = jax.lax.dot_general(dec_wt_ref[...], out2,
                                 (((1,), (1,)), ((), ())),
                                 preferred_element_type=jnp.float32)   # (T, n*c)
    logits = logits + dec_b_ref[...]
    num_tokens = logits.shape[0]
    maxv = jnp.max(logits, axis=0, keepdims=True)                      # (1, n*c)
    tok = jax.lax.broadcasted_iota(jnp.int32, logits.shape, 0).astype(jnp.float32)
    first = jnp.min(jnp.where(logits == maxv, tok, float(num_tokens)),
                    axis=0, keepdims=True)                             # (1, n*c)
    o_ref[...] = first


# ----------------------------------------------------------------------------
# Wrapper: embedding gather + positional concat stay in XLA glue (tiny gather),
# everything else is the single fused Pallas kernel.
# ----------------------------------------------------------------------------
def generator_forward(ids, params, *, num_inputs, num_heads, num_layers):
    # embedding lookup + sqrt scale + positional concat (XLA glue)
    x = params["embedding"][ids] * math.sqrt(num_inputs)        # (S, B, E-3)
    x = jnp.concatenate([x, params["pos_embeds"]], axis=2)      # (S, B, E)
    s_len, b_sz, e = x.shape
    if num_layers > 1:
        # The reference module's swapaxes choreography is only shape-consistent
        # when batch_size == sequence_length.
        assert s_len == b_sz, "module requires batch_size == sequence_length"

    x_bf = jnp.swapaxes(x, 0, 1)                                # (B, S, E) one-time

    nrows = b_sz * s_len
    idx = np.arange(nrows)
    perm_np = np.zeros((nrows, nrows), dtype=np.float32)
    perm_np[idx, (idx % b_sz) * s_len + idx // b_sz] = 1.0      # row reorder = swapaxes

    kernel = functools.partial(_generator_kernel,
                               num_heads=num_heads, num_layers=num_layers)

    out = pl.pallas_call(
        kernel,
        out_shape=jax.ShapeDtypeStruct((1, nrows), jnp.float32),
    )(x_bf,
      jnp.asarray(perm_np),
      params["bn_gamma"].reshape(num_layers, 1, s_len, 1),
      params["bn_beta"].reshape(num_layers, 1, s_len, 1),
      params["wq"], params["wk"], params["wv"], params["wo"],
      params["bq"].reshape(num_layers, 1, e),
      params["bk"].reshape(num_layers, 1, e),
      params["bv"].reshape(num_layers, 1, e),
      params["bo"].reshape(num_layers, 1, e),
      jnp.swapaxes(params["dec_w"], 0, 1),                      # (T, E)
      params["dec_b"].reshape(-1, 1))                           # (T, 1)

    # Row ordering of the fused output follows the literal module layout:
    # even num_layers -> notes indexed [seq][batch], odd -> [batch][seq].
    if num_layers % 2 == 0:
        return out.reshape(s_len, b_sz)
    return out.reshape(b_sz, s_len)


if __name__ == "__main__":
    # Small, self-consistent shapes. batch_size == sequence_length so the literal
    # swapaxes/BatchNorm1d(sequence_length) sequencing is shape-consistent.
    seq_len = 8
    batch_size = 8
    num_tokens = 32
    num_inputs = 16          # embedding dim 13 + 3 positional channels
    num_heads = 4
    num_layers = 2

    key = jax.random.PRNGKey(0)
    ks = jax.random.split(key, 16)

    def nrm(k, shape, scale=0.1):
        return (scale * jax.random.normal(k, shape)).astype(jnp.float32)

    params = {
        "embedding": nrm(ks[0], (num_tokens, num_inputs - 3)),
        # positional_embedding (S,1,3) repeated over batch
        "pos_embeds": jnp.tile(nrm(ks[1], (seq_len, 1, 3)), (1, batch_size, 1)),
        "bn_gamma": jnp.ones((num_layers, seq_len), jnp.float32),
        "bn_beta": jnp.zeros((num_layers, seq_len), jnp.float32),
        # attention weights stored (in, out); kernel does x @ W + b
        "wq": nrm(ks[2], (num_layers, num_inputs, num_inputs)),
        "wk": nrm(ks[3], (num_layers, num_inputs, num_inputs)),
        "wv": nrm(ks[4], (num_layers, num_inputs, num_inputs)),
        "wo": nrm(ks[5], (num_layers, num_inputs, num_inputs)),
        "bq": nrm(ks[6], (num_layers, num_inputs), 0.01),
        "bk": nrm(ks[7], (num_layers, num_inputs), 0.01),
        "bv": nrm(ks[8], (num_layers, num_inputs), 0.01),
        "bo": nrm(ks[9], (num_layers, num_inputs), 0.01),
        "dec_w": nrm(ks[10], (num_inputs, num_tokens)),
        "dec_b": nrm(ks[11], (num_tokens,), 0.01),
    }

    # token ids, seq-first (S, B) like the torch module's pos_embeds layout
    ids = jax.random.randint(ks[12], (seq_len, batch_size), 0, num_tokens)

    notes = generator_forward(ids, params,
                              num_inputs=num_inputs,
                              num_heads=num_heads,
                              num_layers=num_layers)
    notes = jax.block_until_ready(notes)
    assert notes.shape == (batch_size, seq_len)
    assert notes.dtype == jnp.float32
    print("KERNEL_OK")
</pallas_src>

<mosaic_0001>
module attributes {stable_mosaic.version = 11 : i64} {
  func.func @_generator_kernel(%arg0: memref<8x8x16xf32, #tpu.memory_space<vmem>>, %arg1: memref<64x64xf32, #tpu.memory_space<vmem>>, %arg2: memref<2x1x8x1xf32, #tpu.memory_space<vmem>>, %arg3: memref<2x1x8x1xf32, #tpu.memory_space<vmem>>, %arg4: memref<2x16x16xf32, #tpu.memory_space<vmem>>, %arg5: memref<2x16x16xf32, #tpu.memory_space<vmem>>, %arg6: memref<2x16x16xf32, #tpu.memory_space<vmem>>, %arg7: memref<2x16x16xf32, #tpu.memory_space<vmem>>, %arg8: memref<2x1x16xf32, #tpu.memory_space<vmem>>, %arg9: memref<2x1x16xf32, #tpu.memory_space<vmem>>, %arg10: memref<2x1x16xf32, #tpu.memory_space<vmem>>, %arg11: memref<2x1x16xf32, #tpu.memory_space<vmem>>, %arg12: memref<32x16xf32, #tpu.memory_space<vmem>>, %arg13: memref<32x1xf32, #tpu.memory_space<vmem>>, %arg14: memref<1x64xf32, #tpu.memory_space<vmem>>) attributes {dimension_semantics = [], scalar_prefetch = 0 : i64, scratch_operands = 0 : i64, tpu.core_type = #tpu.core_type<tc>} {
    %c0 = arith.constant 0 : index
    %c0_0 = arith.constant 0 : index
    %c0_1 = arith.constant 0 : index
    %0 = vector.load %arg0[%c0, %c0_0, %c0_1] : memref<8x8x16xf32, #tpu.memory_space<vmem>>, vector<8x8x16xf32>
    %cst = arith.constant dense<0.000000e+00> : vector<8x8xf32>
    %1 = vector.multi_reduction <add>, %0, %cst [2] : vector<8x8x16xf32> to vector<8x8xf32>
    %2 = vector.shape_cast %1 : vector<8x8xf32> to vector<8x8x1xf32>
    %cst_2 = arith.constant dense<0.000000e+00> : vector<8x1xf32>
    %3 = vector.multi_reduction <add>, %2, %cst_2 [0] : vector<8x8x1xf32> to vector<8x1xf32>
    %4 = vector.shape_cast %3 : vector<8x1xf32> to vector<1x8x1xf32>
    %cst_3 = arith.constant 7.812500e-03 : f32
    %5 = vector.broadcast %cst_3 : f32 to vector<1x8x1xf32>
    %6 = arith.mulf %4, %5 : vector<1x8x1xf32>
    %7 = vector.broadcast %6 : vector<1x8x1xf32> to vector<8x8x16xf32>
    %8 = arith.subf %0, %7 : vector<8x8x16xf32>
    %9 = arith.mulf %8, %8 : vector<8x8x16xf32>
    %cst_4 = arith.constant dense<0.000000e+00> : vector<8x8xf32>
    %10 = vector.multi_reduction <add>, %9, %cst_4 [2] : vector<8x8x16xf32> to vector<8x8xf32>
    %11 = vector.shape_cast %10 : vector<8x8xf32> to vector<8x8x1xf32>
    %cst_5 = arith.constant dense<0.000000e+00> : vector<8x1xf32>
    %12 = vector.multi_reduction <add>, %11, %cst_5 [0] : vector<8x8x1xf32> to vector<8x1xf32>
    %13 = vector.shape_cast %12 : vector<8x1xf32> to vector<1x8x1xf32>
    %cst_6 = arith.constant 7.812500e-03 : f32
    %14 = vector.broadcast %cst_6 : f32 to vector<1x8x1xf32>
    %15 = arith.mulf %13, %14 : vector<1x8x1xf32>
    %cst_7 = arith.constant 9.99999974E-6 : f32
    %16 = vector.broadcast %cst_7 : f32 to vector<1x8x1xf32>
    %17 = arith.addf %15, %16 : vector<1x8x1xf32>
    %18 = math.rsqrt %17 : vector<1x8x1xf32>
    %19 = vector.broadcast %18 : vector<1x8x1xf32> to vector<8x8x16xf32>
    %20 = arith.mulf %8, %19 : vector<8x8x16xf32>
    %c0_8 = arith.constant 0 : index
    %c0_9 = arith.constant 0 : index
    %c0_10 = arith.constant 0 : index
    %c0_11 = arith.constant 0 : index
    %21 = vector.load %arg2[%c0_8, %c0_9, %c0_10, %c0_11] : memref<2x1x8x1xf32, #tpu.memory_space<vmem>>, vector<1x1x8x1xf32>
    %22 = vector.shape_cast %21 : vector<1x1x8x1xf32> to vector<1x8x1xf32>
    %23 = vector.broadcast %22 : vector<1x8x1xf32> to vector<8x8x16xf32>
    %24 = arith.mulf %20, %23 : vector<8x8x16xf32>
    %c0_12 = arith.constant 0 : index
    %c0_13 = arith.constant 0 : index
    %c0_14 = arith.constant 0 : index
    %c0_15 = arith.constant 0 : index
    %25 = vector.load %arg3[%c0_12, %c0_13, %c0_14, %c0_15] : memref<2x1x8x1xf32, #tpu.memory_space<vmem>>, vector<1x1x8x1xf32>
    %26 = vector.shape_cast %25 : vector<1x1x8x1xf32> to vector<1x8x1xf32>
    %27 = vector.broadcast %26 : vector<1x8x1xf32> to vector<8x8x16xf32>
    %28 = arith.addf %24, %27 : vector<8x8x16xf32>
    %29 = vector.shape_cast %28 : vector<8x8x16xf32> to vector<64x16xf32>
    %c0_16 = arith.constant 0 : index
    %c0_17 = arith.constant 0 : index
    %c0_18 = arith.constant 0 : index
    %30 = vector.load %arg4[%c0_16, %c0_17, %c0_18] : memref<2x16x16xf32, #tpu.memory_space<vmem>>, vector<1x16x16xf32>
    %31 = vector.shape_cast %30 : vector<1x16x16xf32> to vector<16x16xf32>
    %cst_19 = arith.constant dense<0.000000e+00> : vector<64x16xf32>
    %32 = tpu.matmul %29, %31, %cst_19 {dimension_numbers = #tpu.dot_dimension_numbers<[1], [0], [0], [1], [0, 0, 1, 1], [], []>} : vector<64x16xf32>, vector<16x16xf32>, vector<64x16xf32> -> vector<64x16xf32>
    %c0_20 = arith.constant 0 : index
    %c0_21 = arith.constant 0 : index
    %c0_22 = arith.constant 0 : index
    %33 = vector.load %arg8[%c0_20, %c0_21, %c0_22] : memref<2x1x16xf32, #tpu.memory_space<vmem>>, vector<1x1x16xf32>
    %34 = vector.shape_cast %33 : vector<1x1x16xf32> to vector<1x16xf32>
    %35 = vector.broadcast %34 : vector<1x16xf32> to vector<64x16xf32>
    %36 = arith.addf %32, %35 : vector<64x16xf32>
    %c0_23 = arith.constant 0 : index
    %c0_24 = arith.constant 0 : index
    %c0_25 = arith.constant 0 : index
    %37 = vector.load %arg5[%c0_23, %c0_24, %c0_25] : memref<2x16x16xf32, #tpu.memory_space<vmem>>, vector<1x16x16xf32>
    %38 = vector.shape_cast %37 : vector<1x16x16xf32> to vector<16x16xf32>
    %cst_26 = arith.constant dense<0.000000e+00> : vector<64x16xf32>
    %39 = tpu.matmul %29, %38, %cst_26 {dimension_numbers = #tpu.dot_dimension_numbers<[1], [0], [0], [1], [0, 0, 1, 1], [], []>} : vector<64x16xf32>, vector<16x16xf32>, vector<64x16xf32> -> vector<64x16xf32>
    %c0_27 = arith.constant 0 : index
    %c0_28 = arith.constant 0 : index
    %c0_29 = arith.constant 0 : index
    %40 = vector.load %arg9[%c0_27, %c0_28, %c0_29] : memref<2x1x16xf32, #tpu.memory_space<vmem>>, vector<1x1x16xf32>
    %41 = vector.shape_cast %40 : vector<1x1x16xf32> to vector<1x16xf32>
    %42 = vector.broadcast %41 : vector<1x16xf32> to vector<64x16xf32>
    %43 = arith.addf %39, %42 : vector<64x16xf32>
    %c0_30 = arith.constant 0 : index
    %c0_31 = arith.constant 0 : index
    %c0_32 = arith.constant 0 : index
    %44 = vector.load %arg6[%c0_30, %c0_31, %c0_32] : memref<2x16x16xf32, #tpu.memory_space<vmem>>, vector<1x16x16xf32>
    %45 = vector.shape_cast %44 : vector<1x16x16xf32> to vector<16x16xf32>
    %cst_33 = arith.constant dense<0.000000e+00> : vector<64x16xf32>
    %46 = tpu.matmul %29, %45, %cst_33 {dimension_numbers = #tpu.dot_dimension_numbers<[1], [0], [0], [1], [0, 0, 1, 1], [], []>} : vector<64x16xf32>, vector<16x16xf32>, vector<64x16xf32> -> vector<64x16xf32>
    %c0_34 = arith.constant 0 : index
    %c0_35 = arith.constant 0 : index
    %c0_36 = arith.constant 0 : index
    %47 = vector.load %arg10[%c0_34, %c0_35, %c0_36] : memref<2x1x16xf32, #tpu.memory_space<vmem>>, vector<1x1x16xf32>
    %48 = vector.shape_cast %47 : vector<1x1x16xf32> to vector<1x16xf32>
    %49 = vector.broadcast %48 : vector<1x16xf32> to vector<64x16xf32>
    %50 = arith.addf %46, %49 : vector<64x16xf32>
    %51 = vector.shape_cast %36 : vector<64x16xf32> to vector<8x8x16xf32>
    %52 = vector.shape_cast %43 : vector<64x16xf32> to vector<8x8x16xf32>
    %53 = vector.shape_cast %50 : vector<64x16xf32> to vector<8x8x16xf32>
    %54 = vector.extract_strided_slice %51 {offsets = [0, 0, 0], sizes = [8, 8, 4], strides = [1, 1, 1]} : vector<8x8x16xf32> to vector<8x8x4xf32>
    %55 = vector.extract_strided_slice %51 {offsets = [0, 0, 4], sizes = [8, 8, 4], strides = [1, 1, 1]} : vector<8x8x16xf32> to vector<8x8x4xf32>
    %56 = vector.extract_strided_slice %51 {offsets = [0, 0, 8], sizes = [8, 8, 4], strides = [1, 1, 1]} : vector<8x8x16xf32> to vector<8x8x4xf32>
    %57 = vector.extract_strided_slice %51 {offsets = [0, 0, 12], sizes = [8, 8, 4], strides = [1, 1, 1]} : vector<8x8x16xf32> to vector<8x8x4xf32>
    %58 = tpu.concatenate %54, %55, %56, %57 in 0 : vector<8x8x4xf32>, vector<8x8x4xf32>, vector<8x8x4xf32>, vector<8x8x4xf32> -> vector<32x8x4xf32>
    %59 = vector.extract_strided_slice %52 {offsets = [0, 0, 0], sizes = [8, 8, 4], strides = [1, 1, 1]} : vector<8x8x16xf32> to vector<8x8x4xf32>
    %60 = vector.extract_strided_slice %52 {offsets = [0, 0, 4], sizes = [8, 8, 4], strides = [1, 1, 1]} : vector<8x8x16xf32> to vector<8x8x4xf32>
    %61 = vector.extract_strided_slice %52 {offsets = [0, 0, 8], sizes = [8, 8, 4], strides = [1, 1, 1]} : vector<8x8x16xf32> to vector<8x8x4xf32>
    %62 = vector.extract_strided_slice %52 {offsets = [0, 0, 12], sizes = [8, 8, 4], strides = [1, 1, 1]} : vector<8x8x16xf32> to vector<8x8x4xf32>
    %63 = tpu.concatenate %59, %60, %61, %62 in 0 : vector<8x8x4xf32>, vector<8x8x4xf32>, vector<8x8x4xf32>, vector<8x8x4xf32> -> vector<32x8x4xf32>
    %64 = vector.extract_strided_slice %53 {offsets = [0, 0, 0], sizes = [8, 8, 4], strides = [1, 1, 1]} : vector<8x8x16xf32> to vector<8x8x4xf32>
    %65 = vector.extract_strided_slice %53 {offsets = [0, 0, 4], sizes = [8, 8, 4], strides = [1, 1, 1]} : vector<8x8x16xf32> to vector<8x8x4xf32>
    %66 = vector.extract_strided_slice %53 {offsets = [0, 0, 8], sizes = [8, 8, 4], strides = [1, 1, 1]} : vector<8x8x16xf32> to vector<8x8x4xf32>
    %67 = vector.extract_strided_slice %53 {offsets = [0, 0, 12], sizes = [8, 8, 4], strides = [1, 1, 1]} : vector<8x8x16xf32> to vector<8x8x4xf32>
    %68 = tpu.concatenate %64, %65, %66, %67 in 0 : vector<8x8x4xf32>, vector<8x8x4xf32>, vector<8x8x4xf32>, vector<8x8x4xf32> -> vector<32x8x4xf32>
    "tpu.trace_start"() <{level = 10 : i32, message = "bqd,bkd->bqk"}> : () -> ()
    %cst_37 = arith.constant dense<0.000000e+00> : vector<32x8x8xf32>
    %69 = tpu.matmul %58, %63, %cst_37 {dimension_numbers = #tpu.dot_dimension_numbers<[2], [2], [1], [1], [0, 0, 0, 1, 1, 1], [0], [0]>} : vector<32x8x4xf32>, vector<32x8x4xf32>, vector<32x8x8xf32> -> vector<32x8x8xf32>
    "tpu.trace_stop"() : () -> ()
    %cst_38 = arith.constant 5.000000e-01 : f32
    %70 = vector.broadcast %cst_38 : f32 to vector<32x8x8xf32>
    %71 = arith.mulf %69, %70 : vector<32x8x8xf32>
    %cst_39 = arith.constant dense<0xFF800000> : vector<32x8xf32>
    %72 = vector.multi_reduction <maximumf>, %71, %cst_39 [2] : vector<32x8x8xf32> to vector<32x8xf32>
    %73 = vector.shape_cast %72 : vector<32x8xf32> to vector<32x8x1xf32>
    %74 = vector.broadcast %73 : vector<32x8x1xf32> to vector<32x8x8xf32>
    %75 = arith.subf %71, %74 : vector<32x8x8xf32>
    %76 = math.exp %75 : vector<32x8x8xf32>
    %cst_40 = arith.constant dense<0.000000e+00> : vector<32x8xf32>
    %77 = vector.multi_reduction <add>, %76, %cst_40 [2] : vector<32x8x8xf32> to vector<32x8xf32>
    %78 = vector.shape_cast %77 : vector<32x8xf32> to vector<32x8x1xf32>
    %79 = tpu.reciprocal %78 {approx = true} : vector<32x8x1xf32> -> vector<32x8x1xf32>
    %80 = vector.broadcast %79 : vector<32x8x1xf32> to vector<32x8x8xf32>
    %81 = arith.mulf %76, %80 : vector<32x8x8xf32>
    "tpu.trace_start"() <{level = 10 : i32, message = "bqk,bkd->bqd"}> : () -> ()
    %cst_41 = arith.constant dense<0.000000e+00> : vector<32x8x4xf32>
    %82 = tpu.matmul %81, %68, %cst_41 {dimension_numbers = #tpu.dot_dimension_numbers<[2], [1], [1], [2], [0, 0, 0, 1, 1, 2], [0], [0]>} : vector<32x8x8xf32>, vector<32x8x4xf32>, vector<32x8x4xf32> -> vector<32x8x4xf32>
    "tpu.trace_stop"() : () -> ()
    %83 = vector.extract_strided_slice %82 {offsets = [0, 0, 0], sizes = [8, 8, 4], strides = [1, 1, 1]} : vector<32x8x4xf32> to vector<8x8x4xf32>
    %84 = vector.extract_strided_slice %82 {offsets = [8, 0, 0], sizes = [8, 8, 4], strides = [1, 1, 1]} : vector<32x8x4xf32> to vector<8x8x4xf32>
    %85 = vector.extract_strided_slice %82 {offsets = [16, 0, 0], sizes = [8, 8, 4], strides = [1, 1, 1]} : vector<32x8x4xf32> to vector<8x8x4xf32>
    %86 = vector.extract_strided_slice %82 {offsets = [24, 0, 0], sizes = [8, 8, 4], strides = [1, 1, 1]} : vector<32x8x4xf32> to vector<8x8x4xf32>
    %87 = tpu.concatenate %83, %84, %85, %86 in 2 : vector<8x8x4xf32>, vector<8x8x4xf32>, vector<8x8x4xf32>, vector<8x8x4xf32> -> vector<8x8x16xf32>
    %88 = vector.shape_cast %87 : vector<8x8x16xf32> to vector<64x16xf32>
    %c0_42 = arith.constant 0 : index
    %c0_43 = arith.constant 0 : index
    %c0_44 = arith.constant 0 : index
    %89 = vector.load %arg7[%c0_42, %c0_43, %c0_44] : memref<2x16x16xf32, #tpu.memory_space<vmem>>, vector<1x16x16xf32>
    %90 = vector.shape_cast %89 : vector<1x16x16xf32> to vector<16x16xf32>
    %cst_45 = arith.constant dense<0.000000e+00> : vector<64x16xf32>
    %91 = tpu.matmul %88, %90, %cst_45 {dimension_numbers = #tpu.dot_dimension_numbers<[1], [0], [0], [1], [0, 0, 1, 1], [], []>} : vector<64x16xf32>, vector<16x16xf32>, vector<64x16xf32> -> vector<64x16xf32>
    %c0_46 = arith.constant 0 : index
    %c0_47 = arith.constant 0 : index
    %c0_48 = arith.constant 0 : index
    %92 = vector.load %arg11[%c0_46, %c0_47, %c0_48] : memref<2x1x16xf32, #tpu.memory_space<vmem>>, vector<1x1x16xf32>
    %93 = vector.shape_cast %92 : vector<1x1x16xf32> to vector<1x16xf32>
    %94 = vector.broadcast %93 : vector<1x16xf32> to vector<64x16xf32>
    %95 = arith.addf %91, %94 : vector<64x16xf32>
    %c0_49 = arith.constant 0 : index
    %c0_50 = arith.constant 0 : index
    %96 = vector.load %arg1[%c0_49, %c0_50] : memref<64x64xf32, #tpu.memory_space<vmem>>, vector<64x64xf32>
    %cst_51 = arith.constant dense<0.000000e+00> : vector<64x16xf32>
    %97 = tpu.matmul %96, %95, %cst_51 {dimension_numbers = #tpu.dot_dimension_numbers<[1], [0], [0], [1], [0, 0, 1, 1], [], []>} : vector<64x64xf32>, vector<64x16xf32>, vector<64x16xf32> -> vector<64x16xf32>
    %98 = vector.shape_cast %97 : vector<64x16xf32> to vector<8x8x16xf32>
    %cst_52 = arith.constant dense<0.000000e+00> : vector<8x8xf32>
    %99 = vector.multi_reduction <add>, %98, %cst_52 [2] : vector<8x8x16xf32> to vector<8x8xf32>
    %100 = vector.shape_cast %99 : vector<8x8xf32> to vector<8x8x1xf32>
    %cst_53 = arith.constant dense<0.000000e+00> : vector<8x1xf32>
    %101 = vector.multi_reduction <add>, %100, %cst_53 [0] : vector<8x8x1xf32> to vector<8x1xf32>
    %102 = vector.shape_cast %101 : vector<8x1xf32> to vector<1x8x1xf32>
    %cst_54 = arith.constant 7.812500e-03 : f32
    %103 = vector.broadcast %cst_54 : f32 to vector<1x8x1xf32>
    %104 = arith.mulf %102, %103 : vector<1x8x1xf32>
    %105 = vector.broadcast %104 : vector<1x8x1xf32> to vector<8x8x16xf32>
    %106 = arith.subf %98, %105 : vector<8x8x16xf32>
    %107 = arith.mulf %106, %106 : vector<8x8x16xf32>
    %cst_55 = arith.constant dense<0.000000e+00> : vector<8x8xf32>
    %108 = vector.multi_reduction <add>, %107, %cst_55 [2] : vector<8x8x16xf32> to vector<8x8xf32>
    %109 = vector.shape_cast %108 : vector<8x8xf32> to vector<8x8x1xf32>
    %cst_56 = arith.constant dense<0.000000e+00> : vector<8x1xf32>
    %110 = vector.multi_reduction <add>, %109, %cst_56 [0] : vector<8x8x1xf32> to vector<8x1xf32>
    %111 = vector.shape_cast %110 : vector<8x1xf32> to vector<1x8x1xf32>
    %cst_57 = arith.constant 7.812500e-03 : f32
    %112 = vector.broadcast %cst_57 : f32 to vector<1x8x1xf32>
    %113 = arith.mulf %111, %112 : vector<1x8x1xf32>
    %cst_58 = arith.constant 9.99999974E-6 : f32
    %114 = vector.broadcast %cst_58 : f32 to vector<1x8x1xf32>
    %115 = arith.addf %113, %114 : vector<1x8x1xf32>
    %116 = math.rsqrt %115 : vector<1x8x1xf32>
    %117 = vector.broadcast %116 : vector<1x8x1xf32> to vector<8x8x16xf32>
    %118 = arith.mulf %106, %117 : vector<8x8x16xf32>
    %c1 = arith.constant 1 : index
    %c0_59 = arith.constant 0 : index
    %c0_60 = arith.constant 0 : index
    %c0_61 = arith.constant 0 : index
    %119 = vector.load %arg2[%c1, %c0_59, %c0_60, %c0_61] : memref<2x1x8x1xf32, #tpu.memory_space<vmem>>, vector<1x1x8x1xf32>
    %120 = vector.shape_cast %119 : vector<1x1x8x1xf32> to vector<1x8x1xf32>
    %121 = vector.broadcast %120 : vector<1x8x1xf32> to vector<8x8x16xf32>
    %122 = arith.mulf %118, %121 : vector<8x8x16xf32>
    %c1_62 = arith.constant 1 : index
    %c0_63 = arith.constant 0 : index
    %c0_64 = arith.constant 0 : index
    %c0_65 = arith.constant 0 : index
    %123 = vector.load %arg3[%c1_62, %c0_63, %c0_64, %c0_65] : memref<2x1x8x1xf32, #tpu.memory_space<vmem>>, vector<1x1x8x1xf32>
    %124 = vector.shape_cast %123 : vector<1x1x8x1xf32> to vector<1x8x1xf32>
    %125 = vector.broadcast %124 : vector<1x8x1xf32> to vector<8x8x16xf32>
    %126 = arith.addf %122, %125 : vector<8x8x16xf32>
    %127 = vector.shape_cast %126 : vector<8x8x16xf32> to vector<64x16xf32>
    %c1_66 = arith.constant 1 : index
    %c0_67 = arith.constant 0 : index
    %c0_68 = arith.constant 0 : index
    %128 = vector.load %arg4[%c1_66, %c0_67, %c0_68] : memref<2x16x16xf32, #tpu.memory_space<vmem>>, vector<1x16x16xf32>
    %129 = vector.shape_cast %128 : vector<1x16x16xf32> to vector<16x16xf32>
    %cst_69 = arith.constant dense<0.000000e+00> : vector<64x16xf32>
    %130 = tpu.matmul %127, %129, %cst_69 {dimension_numbers = #tpu.dot_dimension_numbers<[1], [0], [0], [1], [0, 0, 1, 1], [], []>} : vector<64x16xf32>, vector<16x16xf32>, vector<64x16xf32> -> vector<64x16xf32>
    %c1_70 = arith.constant 1 : index
    %c0_71 = arith.constant 0 : index
    %c0_72 = arith.constant 0 : index
    %131 = vector.load %arg8[%c1_70, %c0_71, %c0_72] : memref<2x1x16xf32, #tpu.memory_space<vmem>>, vector<1x1x16xf32>
    %132 = vector.shape_cast %131 : vector<1x1x16xf32> to vector<1x16xf32>
    %133 = vector.broadcast %132 : vector<1x16xf32> to vector<64x16xf32>
    %134 = arith.addf %130, %133 : vector<64x16xf32>
    %c1_73 = arith.constant 1 : index
    %c0_74 = arith.constant 0 : index
    %c0_75 = arith.constant 0 : index
    %135 = vector.load %arg5[%c1_73, %c0_74, %c0_75] : memref<2x16x16xf32, #tpu.memory_space<vmem>>, vector<1x16x16xf32>
    %136 = vector.shape_cast %135 : vector<1x16x16xf32> to vector<16x16xf32>
    %cst_76 = arith.constant dense<0.000000e+00> : vector<64x16xf32>
    %137 = tpu.matmul %127, %136, %cst_76 {dimension_numbers = #tpu.dot_dimension_numbers<[1], [0], [0], [1], [0, 0, 1, 1], [], []>} : vector<64x16xf32>, vector<16x16xf32>, vector<64x16xf32> -> vector<64x16xf32>
    %c1_77 = arith.constant 1 : index
    %c0_78 = arith.constant 0 : index
    %c0_79 = arith.constant 0 : index
    %138 = vector.load %arg9[%c1_77, %c0_78, %c0_79] : memref<2x1x16xf32, #tpu.memory_space<vmem>>, vector<1x1x16xf32>
    %139 = vector.shape_cast %138 : vector<1x1x16xf32> to vector<1x16xf32>
    %140 = vector.broadcast %139 : vector<1x16xf32> to vector<64x16xf32>
    %141 = arith.addf %137, %140 : vector<64x16xf32>
    %c1_80 = arith.constant 1 : index
    %c0_81 = arith.constant 0 : index
    %c0_82 = arith.constant 0 : index
    %142 = vector.load %arg6[%c1_80, %c0_81, %c0_82] : memref<2x16x16xf32, #tpu.memory_space<vmem>>, vector<1x16x16xf32>
    %143 = vector.shape_cast %142 : vector<1x16x16xf32> to vector<16x16xf32>
    %cst_83 = arith.constant dense<0.000000e+00> : vector<64x16xf32>
    %144 = tpu.matmul %127, %143, %cst_83 {dimension_numbers = #tpu.dot_dimension_numbers<[1], [0], [0], [1], [0, 0, 1, 1], [], []>} : vector<64x16xf32>, vector<16x16xf32>, vector<64x16xf32> -> vector<64x16xf32>
    %c1_84 = arith.constant 1 : index
    %c0_85 = arith.constant 0 : index
    %c0_86 = arith.constant 0 : index
    %145 = vector.load %arg10[%c1_84, %c0_85, %c0_86] : memref<2x1x16xf32, #tpu.memory_space<vmem>>, vector<1x1x16xf32>
    %146 = vector.shape_cast %145 : vector<1x1x16xf32> to vector<1x16xf32>
    %147 = vector.broadcast %146 : vector<1x16xf32> to vector<64x16xf32>
    %148 = arith.addf %144, %147 : vector<64x16xf32>
    %149 = vector.shape_cast %134 : vector<64x16xf32> to vector<8x8x16xf32>
    %150 = vector.shape_cast %141 : vector<64x16xf32> to vector<8x8x16xf32>
    %151 = vector.shape_cast %148 : vector<64x16xf32> to vector<8x8x16xf32>
    %152 = vector.extract_strided_slice %149 {offsets = [0, 0, 0], sizes = [8, 8, 4], strides = [1, 1, 1]} : vector<8x8x16xf32> to vector<8x8x4xf32>
    %153 = vector.extract_strided_slice %149 {offsets = [0, 0, 4], sizes = [8, 8, 4], strides = [1, 1, 1]} : vector<8x8x16xf32> to vector<8x8x4xf32>
    %154 = vector.extract_strided_slice %149 {offsets = [0, 0, 8], sizes = [8, 8, 4], strides = [1, 1, 1]} : vector<8x8x16xf32> to vector<8x8x4xf32>
    %155 = vector.extract_strided_slice %149 {offsets = [0, 0, 12], sizes = [8, 8, 4], strides = [1, 1, 1]} : vector<8x8x16xf32> to vector<8x8x4xf32>
    %156 = tpu.concatenate %152, %153, %154, %155 in 0 : vector<8x8x4xf32>, vector<8x8x4xf32>, vector<8x8x4xf32>, vector<8x8x4xf32> -> vector<32x8x4xf32>
    %157 = vector.extract_strided_slice %150 {offsets = [0, 0, 0], sizes = [8, 8, 4], strides = [1, 1, 1]} : vector<8x8x16xf32> to vector<8x8x4xf32>
    %158 = vector.extract_strided_slice %150 {offsets = [0, 0, 4], sizes = [8, 8, 4], strides = [1, 1, 1]} : vector<8x8x16xf32> to vector<8x8x4xf32>
    %159 = vector.extract_strided_slice %150 {offsets = [0, 0, 8], sizes = [8, 8, 4], strides = [1, 1, 1]} : vector<8x8x16xf32> to vector<8x8x4xf32>
    %160 = vector.extract_strided_slice %150 {offsets = [0, 0, 12], sizes = [8, 8, 4], strides = [1, 1, 1]} : vector<8x8x16xf32> to vector<8x8x4xf32>
    %161 = tpu.concatenate %157, %158, %159, %160 in 0 : vector<8x8x4xf32>, vector<8x8x4xf32>, vector<8x8x4xf32>, vector<8x8x4xf32> -> vector<32x8x4xf32>
    %162 = vector.extract_strided_slice %151 {offsets = [0, 0, 0], sizes = [8, 8, 4], strides = [1, 1, 1]} : vector<8x8x16xf32> to vector<8x8x4xf32>
    %163 = vector.extract_strided_slice %151 {offsets = [0, 0, 4], sizes = [8, 8, 4], strides = [1, 1, 1]} : vector<8x8x16xf32> to vector<8x8x4xf32>
    %164 = vector.extract_strided_slice %151 {offsets = [0, 0, 8], sizes = [8, 8, 4], strides = [1, 1, 1]} : vector<8x8x16xf32> to vector<8x8x4xf32>
    %165 = vector.extract_strided_slice %151 {offsets = [0, 0, 12], sizes = [8, 8, 4], strides = [1, 1, 1]} : vector<8x8x16xf32> to vector<8x8x4xf32>
    %166 = tpu.concatenate %162, %163, %164, %165 in 0 : vector<8x8x4xf32>, vector<8x8x4xf32>, vector<8x8x4xf32>, vector<8x8x4xf32> -> vector<32x8x4xf32>
    "tpu.trace_start"() <{level = 10 : i32, message = "bqd,bkd->bqk"}> : () -> ()
    %cst_87 = arith.constant dense<0.000000e+00> : vector<32x8x8xf32>
    %167 = tpu.matmul %156, %161, %cst_87 {dimension_numbers = #tpu.dot_dimension_numbers<[2], [2], [1], [1], [0, 0, 0, 1, 1, 1], [0], [0]>} : vector<32x8x4xf32>, vector<32x8x4xf32>, vector<32x8x8xf32> -> vector<32x8x8xf32>
    "tpu.trace_stop"() : () -> ()
    %cst_88 = arith.constant 5.000000e-01 : f32
    %168 = vector.broadcast %cst_88 : f32 to vector<32x8x8xf32>
    %169 = arith.mulf %167, %168 : vector<32x8x8xf32>
    %cst_89 = arith.constant dense<0xFF800000> : vector<32x8xf32>
    %170 = vector.multi_reduction <maximumf>, %169, %cst_89 [2] : vector<32x8x8xf32> to vector<32x8xf32>
    %171 = vector.shape_cast %170 : vector<32x8xf32> to vector<32x8x1xf32>
    %172 = vector.broadcast %171 : vector<32x8x1xf32> to vector<32x8x8xf32>
    %173 = arith.subf %169, %172 : vector<32x8x8xf32>
    %174 = math.exp %173 : vector<32x8x8xf32>
    %cst_90 = arith.constant dense<0.000000e+00> : vector<32x8xf32>
    %175 = vector.multi_reduction <add>, %174, %cst_90 [2] : vector<32x8x8xf32> to vector<32x8xf32>
    %176 = vector.shape_cast %175 : vector<32x8xf32> to vector<32x8x1xf32>
    %177 = tpu.reciprocal %176 {approx = true} : vector<32x8x1xf32> -> vector<32x8x1xf32>
    %178 = vector.broadcast %177 : vector<32x8x1xf32> to vector<32x8x8xf32>
    %179 = arith.mulf %174, %178 : vector<32x8x8xf32>
    "tpu.trace_start"() <{level = 10 : i32, message = "bqk,bkd->bqd"}> : () -> ()
    %cst_91 = arith.constant dense<0.000000e+00> : vector<32x8x4xf32>
    %180 = tpu.matmul %179, %166, %cst_91 {dimension_numbers = #tpu.dot_dimension_numbers<[2], [1], [1], [2], [0, 0, 0, 1, 1, 2], [0], [0]>} : vector<32x8x8xf32>, vector<32x8x4xf32>, vector<32x8x4xf32> -> vector<32x8x4xf32>
    "tpu.trace_stop"() : () -> ()
    %181 = vector.extract_strided_slice %180 {offsets = [0, 0, 0], sizes = [8, 8, 4], strides = [1, 1, 1]} : vector<32x8x4xf32> to vector<8x8x4xf32>
    %182 = vector.extract_strided_slice %180 {offsets = [8, 0, 0], sizes = [8, 8, 4], strides = [1, 1, 1]} : vector<32x8x4xf32> to vector<8x8x4xf32>
    %183 = vector.extract_strided_slice %180 {offsets = [16, 0, 0], sizes = [8, 8, 4], strides = [1, 1, 1]} : vector<32x8x4xf32> to vector<8x8x4xf32>
    %184 = vector.extract_strided_slice %180 {offsets = [24, 0, 0], sizes = [8, 8, 4], strides = [1, 1, 1]} : vector<32x8x4xf32> to vector<8x8x4xf32>
    %185 = tpu.concatenate %181, %182, %183, %184 in 2 : vector<8x8x4xf32>, vector<8x8x4xf32>, vector<8x8x4xf32>, vector<8x8x4xf32> -> vector<8x8x16xf32>
    %186 = vector.shape_cast %185 : vector<8x8x16xf32> to vector<64x16xf32>
    %c1_92 = arith.constant 1 : index
    %c0_93 = arith.constant 0 : index
    %c0_94 = arith.constant 0 : index
    %187 = vector.load %arg7[%c1_92, %c0_93, %c0_94] : memref<2x16x16xf32, #tpu.memory_space<vmem>>, vector<1x16x16xf32>
    %188 = vector.shape_cast %187 : vector<1x16x16xf32> to vector<16x16xf32>
    %cst_95 = arith.constant dense<0.000000e+00> : vector<64x16xf32>
    %189 = tpu.matmul %186, %188, %cst_95 {dimension_numbers = #tpu.dot_dimension_numbers<[1], [0], [0], [1], [0, 0, 1, 1], [], []>} : vector<64x16xf32>, vector<16x16xf32>, vector<64x16xf32> -> vector<64x16xf32>
    %c1_96 = arith.constant 1 : index
    %c0_97 = arith.constant 0 : index
    %c0_98 = arith.constant 0 : index
    %190 = vector.load %arg11[%c1_96, %c0_97, %c0_98] : memref<2x1x16xf32, #tpu.memory_space<vmem>>, vector<1x1x16xf32>
    %191 = vector.shape_cast %190 : vector<1x1x16xf32> to vector<1x16xf32>
    %192 = vector.broadcast %191 : vector<1x16xf32> to vector<64x16xf32>
    %193 = arith.addf %189, %192 : vector<64x16xf32>
    %c0_99 = arith.constant 0 : index
    %c0_100 = arith.constant 0 : index
    %194 = vector.load %arg12[%c0_99, %c0_100] : memref<32x16xf32, #tpu.memory_space<vmem>>, vector<32x16xf32>
    %cst_101 = arith.constant dense<0.000000e+00> : vector<32x64xf32>
    %195 = tpu.matmul %194, %193, %cst_101 {dimension_numbers = #tpu.dot_dimension_numbers<[1], [1], [0], [0], [0, 0, 1, 0], [], []>} : vector<32x16xf32>, vector<64x16xf32>, vector<32x64xf32> -> vector<32x64xf32>
    %c0_102 = arith.constant 0 : index
    %c0_103 = arith.constant 0 : index
    %196 = vector.load %arg13[%c0_102, %c0_103] : memref<32x1xf32, #tpu.memory_space<vmem>>, vector<32x1xf32>
    %197 = vector.broadcast %196 : vector<32x1xf32> to vector<32x64xf32>
    %198 = arith.addf %195, %197 : vector<32x64xf32>
    %cst_104 = arith.constant dense<0xFF800000> : vector<64xf32>
    %199 = vector.multi_reduction <maximumf>, %198, %cst_104 [0] : vector<32x64xf32> to vector<64xf32>
    %200 = vector.shape_cast %199 : vector<64xf32> to vector<1x64xf32>
    %201 = tpu.iota {dimensions = array<i32: 0>} : vector<32x64xi32>
    %202 = arith.sitofp %201 : vector<32x64xi32> to vector<32x64xf32>
    %203 = vector.broadcast %200 : vector<1x64xf32> to vector<32x64xf32>
    %204 = arith.cmpf oeq, %198, %203 : vector<32x64xf32>
    %cst_105 = arith.constant 3.200000e+01 : f32
    %205 = vector.broadcast %cst_105 : f32 to vector<32x64xf32>
    %206 = arith.select %204, %202, %205 : vector<32x64xi1>, vector<32x64xf32>
    %cst_106 = arith.constant dense<0x7F800000> : vector<64xf32>
    %207 = vector.multi_reduction <minimumf>, %206, %cst_106 [0] : vector<32x64xf32> to vector<64xf32>
    %208 = vector.shape_cast %207 : vector<64xf32> to vector<1x64xf32>
    %c0_107 = arith.constant 0 : index
    %c0_108 = arith.constant 0 : index
    %209 = vector.load %arg14[%c0_107, %c0_108] : memref<1x64xf32, #tpu.memory_space<vmem>>, vector<1x64xf32>
    tpu.vector_store %arg14[%c0_107, %c0_108], %208 {strides = array<i32>} : memref<1x64xf32, #tpu.memory_space<vmem>>, vector<1x64xf32>,
    return
  }
}

</mosaic_0001>

<bundles_post_ra>
// kernel: tpu_custom_call.1
= control target key start
LH: loop header
LB: loop body
LE: loop exit
PB: predicated region body
PF: predicated region fallthrough
CT: control target
= control target key end

     0   :  { %19 = vsyncpa [#allocation3], 0  ;;  %s16848_s0 = inlined_call_operand.vmem [shape: f32[8,8,16], index: 0, kind: input, shape index: {}]   ;;  %s16849_s1 = inlined_call_operand.hbm [shape: f32[64,64], index: 1, kind: input, shape index: {}]   ;;  %s16850_s2 = inlined_call_operand.vmem [shape: f32[2,1,8,1], index: 2, kind: input, shape index: {}]   ;;  %s16851_s3 = inlined_call_operand.vmem [shape: f32[2,1,8,1], index: 3, kind: input, shape index: {}]   ;;  %s16852_s4 = inlined_call_operand.vmem [shape: f32[2,16,16], index: 4, kind: input, shape index: {}]   ;;  %s16853_s5 = inlined_call_operand.vmem [shape: f32[2,16,16], index: 5, kind: input, shape index: {}]   ;;  %s16854_s6 = inlined_call_operand.hbm [shape: f32[2,16,16], index: 6, kind: input, shape index: {}]   ;;  %s16855_s7 = inlined_call_operand.hbm [shape: f32[2,16,16], index: 7, kind: input, shape index: {}]   ;;  %s16856_s8 = inlined_call_operand.vmem [shape: f32[2,1,16], index: 8, kind: input, shape index: {}]   ;;  %s16857_s9 = inlined_call_operand.vmem [shape: f32[2,1,16], index: 9, kind: input, shape index: {}]   ;;  %s16858_s10 = inlined_call_operand.vmem [shape: f32[2,1,16], index: 10, kind: input, shape index: {}]   ;;  %s16859_s11 = inlined_call_operand.vmem [shape: f32[2,1,16], index: 11, kind: input, shape index: {}]   ;;  %s16860_s12 = inlined_call_operand.vmem [shape: f32[32,16], index: 12, kind: input, shape index: {}]   ;;  %s16861_s13 = inlined_call_operand.vmem [shape: f32[32,1], index: 13, kind: input, shape index: {}]   ;;  %s16862_s14 = inlined_call_operand.hbm [shape: f32[1,64], index: 14, kind: output, shape index: {}]  }
   0x1   :  { %20 = vsyncpa [#allocation6], 0 }
   0x2   :  { %21 = vsyncpa [#allocation4], 0  ;;  %s14421_s29 = smov [#allocation5]   ;;  %s14422_s15 = smov [#allocation2]  }
   0x3   :  { %s49_s30 = sshll.u32 %s14421_s29, 4  ;;  %s29_s16 = sshll.u32 %s14422_s15, 4  ;;  %s50_s30 = int_to_ptr.vmem [resolvable:$true] %s49_s30  ;;  %s14510_s16 = int_to_ptr.vmem [resolvable:$true] %s29_s16 }
   0x4   :  { %s14327_s19 = scalar_lea.hbm %s16854_s6, 512 }
   0x5   :  { %p14328_p0 = scmp.ne.s32.totalorder %s16854_s6, %s14327_s19  ;;  %p14331_p1 = scmp.lt.u32.totalorder %s14327_s19, %s16854_s6 }
   0x7   :  { %p14333_p2 = pnand %p14331_p1, %p14328_p0 }
   0x9   :  { %14336 = shalt.err (!%p14333_p2)
}
   0xa   :  { %s14337_s24 = scalar_lea.vmem %s50_s30, 512  ;;  %p14342_p4 = scmp.lt.s32.totalorder %s50_s30, %s50_s30 }
   0xb   :  { %p14338_p3 = scmp.ne.s32.totalorder %s50_s30, %s14337_s24  ;;  %p14343_p5 = scmp.lt.s32.totalorder %s14337_s24, %s14337_s24 }
   0xd   :  { %p14344_p6 = por %p14343_p5, %p14342_p4 }
   0xf   :  { %p14345_p7 = pnand %p14344_p6, %p14338_p3 }
  0x11   :  { %14348 = shalt.err (!%p14345_p7)
}
  0x12   :  { %s14423_s25 = smov 128   ;;  %s14424_s26 = smov 8  }
  0x13   :  { %55 = dma.hbm_to_vmem [thread:$0]  %s16854_s6, 512, %s50_s30, [#allocation6], %s14423_s25, %s14423_s25, %s14424_s26  }
  0x14   :  { %s14349_s17 = scalar_lea.hbm %s16849_s1, 1024 }
  0x15   :  { %p14350_p8 = scmp.ne.s32.totalorder %s16849_s1, %s14349_s17  ;;  %p14353_p9 = scmp.lt.u32.totalorder %s14349_s17, %s16849_s1 }
  0x17   :  { %p14355_p10 = pnand %p14353_p9, %p14350_p8 }
  0x19   :  { %14358 = shalt.err (!%p14355_p10)
}
  0x1a   :  { %s14359_s22 = scalar_lea.vmem %s14510_s16, 1024  ;;  %p14364_p12 = scmp.lt.s32.totalorder %s14510_s16, %s14510_s16 }
  0x1b   :  { %p14360_p11 = scmp.ne.s32.totalorder %s14510_s16, %s14359_s22  ;;  %p14365_p13 = scmp.lt.s32.totalorder %s14359_s22, %s14359_s22 }
  0x1d   :  { %p14366_p0 = por %p14365_p13, %p14364_p12 }
  0x1f   :  { %p14367_p1 = pnand %p14366_p0, %p14360_p11 }
  0x21   :  { %14370 = shalt.err (!%p14367_p1)
}
  0x22   :  { %35 = dma.hbm_to_vmem [thread:$0]  %s16849_s1, 1024, %s14510_s16, [#allocation3], %s14423_s25, %s14423_s25, %s14424_s26  }
  0x23   :  { %s14425_s23 = smov [#allocation7]   ;;  %s14371_s29 = scalar_lea.hbm %s16855_s7, 512 }
  0x24   :  { %s61_s24 = sshll.u32 %s14425_s23, 4  ;;  %p14372_p2 = scmp.ne.s32.totalorder %s16855_s7, %s14371_s29  ;;  %s62_s24 = int_to_ptr.vmem [resolvable:$true] %s61_s24 }
  0x25   :  { %p14375_p3 = scmp.lt.u32.totalorder %s14371_s29, %s16855_s7 }
  0x27   :  { %p14377_p4 = pnand %p14375_p3, %p14372_p2 }
  0x29   :  { %14380 = shalt.err (!%p14377_p4)
}
  0x2a   :  { %s14381_s20 = scalar_lea.vmem %s62_s24, 512  ;;  %p14386_p6 = scmp.lt.s32.totalorder %s62_s24, %s62_s24 }
  0x2b   :  { %p14382_p5 = scmp.ne.s32.totalorder %s62_s24, %s14381_s20  ;;  %p14387_p7 = scmp.lt.s32.totalorder %s14381_s20, %s14381_s20 }
  0x2d   :  { %p14388_p8 = por %p14387_p7, %p14386_p6 }
  0x2f   :  { %p14389_p9 = pnand %p14388_p8, %p14382_p5 }
  0x31   :  { %14392 = shalt.err (!%p14389_p9)
}
  0x32   :  { %67 = dma.hbm_to_vmem [thread:$0]  %s16855_s7, 512, %s62_s24, [#allocation6], %s14423_s25, %s14423_s25, %s14424_s26  }
  0x33   :  { %14415 = dma.done.wait [#allocation3], 1024  }
  0x34   :  { %14416 = vsyncadd [#allocation3], 4294966272 }
  0x35   :  { %14417 = dma.done.wait [#allocation6], 1024  }
  0x36   :  { %14418 = vsyncadd [#allocation6], 4294966272  ;;  %vm97_vm0 = vcmask 130048   ;;  %v89_v0 = vld [vmem:[%s16848_s0] sm:$0xff]  ;;  %v91_v1 = vld [vmem:[%s16848_s0 + $0x10] sm:$0xff]  ;;  %v14426_v16 = vmov 0  }
  0x37   :  { %v90_v2 = vld [vmem:[%s16848_s0 + $0x8] sm:$0xff]  ;;  %v98_v3 = vsel %vm97_vm0, %v89_v0, 0.0  ;;  %v104_v4 = vsel %vm97_vm0, %v91_v1, 0.0  ;;  %v92_v5 = vld [vmem:[%s16848_s0 + $0x18] sm:$0xff]  ;;  %v93_v8 = vld [vmem:[%s16848_s0 + $0x20] sm:$0xff]  ;;  %14065 = vset.pattern.permute.xlu0 %v14426_v16  ;;  %14066 = vset.pattern.permute.xlu1 %v14426_v16  ;;  %vm14428_vm1 = vmmov 0  }
  0x38   :  { %99 = vadd.xlane.f32.xlu0 %v98_v3  ;;  %105 = vadd.xlane.f32.xlu1 %v104_v4  ;;  %v101_v6 = vsel %vm97_vm0, %v90_v2, 0.0  ;;  %v107_v7 = vsel %vm97_vm0, %v92_v5, 0.0  ;;  %v94_v9 = vld [vmem:[%s16848_s0 + $0x28] sm:$0xff]  ;;  %v110_v10 = vsel %vm97_vm0, %v93_v8, 0.0  ;;  %v95_v12 = vld [vmem:[%s16848_s0 + $0x30] sm:$0xff]  ;;  %v96_v13 = vld [vmem:[%s16848_s0 + $0x38] sm:$0xff] }
  0x39   :  { %v113_v11 = vsel %vm97_vm0, %v94_v9, 0.0  ;;  %v116_v14 = vsel %vm97_vm0, %v95_v12, 0.0  ;;  %v119_v15 = vsel %vm97_vm0, %v96_v13, 0.0  ;;  %v202_v57 = vld [vmem:[%s16851_s3] sm:$0xff]  ;;  %v217_v60 = vld [vmem:[%s16852_s4 + $0x8] sm:$0xff]  ;;  %vm774_vm2 = vcmask 31744   ;;  %vm16796_vm6 = vmpackc.low %vm97_vm0, %vm97_vm0 }
  0x3a   :  { %v188_v58 = vld [vmem:[%s16850_s2] sm:$0xff]  ;;  %v355_v63 = vld [vmem:[%s16853_s5 + $0x8] sm:$0xff]  ;;  %s14429_s18 = smov 120   ;;  %s14430_s19 = smov 124   ;;  %vm3175_vm3 = vcmask 64512   ;;  %vm5976_vm4 = vcmask 97280  }
  0x3b   :  { %v216_v59 = vld [vmem:[%s16852_s4] sm:$0xff]  ;;  %s14431_s20 = smov 116   ;;  %s14432_s16 = smov 4   ;;  %vm6131_vm5 = vcmask 523264   ;;  %vm12485_vm11 = vcmask 516096  }
  0x3c   :  { %102 = vadd.xlane.f32.xlu0 %v101_v6  ;;  %108 = vadd.xlane.f32.xlu1 %v107_v7  ;;  %v354_v61 = vld [vmem:[%s16853_s5] sm:$0xff]  ;;  %v13979_v62 = vpack.c.bf16 %v217_v60, %v216_v59  ;;  %s14433_s21 = smov 12  }
  0x3e   :  { %13980 = vmatprep.subr.bf16.mxu0 %v13979_v62 }
  0x3f   :  { %13982 = vmatpush3.bf16.msra.mxu0 %v13979_v62 }
  0x40   :  { %111 = vadd.xlane.f32.xlu0 %v110_v10  ;;  %114 = vadd.xlane.f32.xlu1 %v113_v11 }
  0x44   :  { %117 = vadd.xlane.f32.xlu0 %v116_v14  ;;  %120 = vadd.xlane.f32.xlu1 %v119_v15 }
  0xc5   :  { %v100_v17 = vpop.xlane.xlu0 %99  ;;  %v106_v18 = vpop.xlane.xlu1 %105 }
  0xc9   :  { %v103_v19 = vpop.xlane.xlu0 %102  ;;  %v109_v20 = vpop.xlane.xlu1 %108 }
  0xca   :  { %v122_v21 = vadd.f32 %v103_v19, %v100_v17 }
  0xcc   :  { %v123_v22 = vadd.f32 %v122_v21, %v106_v18 }
  0xcd   :  { %v112_v23 = vpop.xlane.xlu0 %111  ;;  %v115_v24 = vpop.xlane.xlu1 %114 }
  0xce   :  { %v124_v25 = vadd.f32 %v123_v22, %v109_v20 }
  0xd0   :  { %v125_v26 = vadd.f32 %v124_v25, %v112_v23 }
  0xd1   :  { %v118_v27 = vpop.xlane.xlu0 %117  ;;  %v121_v29 = vpop.xlane.xlu1 %120 }
  0xd2   :  { %v126_v28 = vadd.f32 %v125_v26, %v115_v24 }
  0xd4   :  { %v127_v30 = vadd.f32 %v126_v28, %v118_v27 }
  0xd6   :  { %v128_v31 = vadd.f32 %v127_v30, %v121_v29 }
  0xd8   :  { %v129_v32 = vmul.f32 0.0078125, %v128_v31 }
  0xda   :  { %v14594_v33 = vsub.f32 %v90_v2, %v129_v32  ;;  %v14596_v34 = vsub.f32 %v89_v0, %v129_v32  ;;  %v14598_v35 = vsub.f32 %v92_v5, %v129_v32  ;;  %v14600_v36 = vsub.f32 %v91_v1, %v129_v32  ;;  %v468_v1 = vld [vmem:[#allocation5] sm:$0xff]  ;;  %v469_v2 = vld [vmem:[#allocation5 + $0x8] sm:$0xff] }
  0xdb   :  { %v14606_v39 = vsub.f32 %v94_v9, %v129_v32  ;;  %v14608_v40 = vsub.f32 %v93_v8, %v129_v32  ;;  %v14616_v45 = vsub.f32 %v96_v13, %v129_v32  ;;  %v14618_v46 = vsub.f32 %v95_v12, %v129_v32 }
  0xdc   :  { %v139_v37 = vmul.f32 %v14594_v33, %v14594_v33  ;;  %v138_v38 = vmul.f32 %v14596_v34, %v14596_v34  ;;  %v141_v43 = vmul.f32 %v14598_v35, %v14598_v35  ;;  %v140_v44 = vmul.f32 %v14600_v36, %v14600_v36 }
  0xdd   :  { %v143_v49 = vmul.f32 %v14606_v39, %v14606_v39  ;;  %v142_v50 = vmul.f32 %v14608_v40, %v14608_v40  ;;  %v145_v53 = vmul.f32 %v14616_v45, %v14616_v45  ;;  %v144_v54 = vmul.f32 %v14618_v46, %v14618_v46 }
  0xde   :  { %v149_v41 = vsel %vm97_vm0, %v139_v37, 0.0  ;;  %v146_v42 = vsel %vm97_vm0, %v138_v38, 0.0  ;;  %v155_v47 = vsel %vm97_vm0, %v141_v43, 0.0  ;;  %v152_v48 = vsel %vm97_vm0, %v140_v44, 0.0 }
  0xdf   :  { %150 = vadd.xlane.f32.xlu1 %v149_v41  ;;  %147 = vadd.xlane.f32.xlu0 %v146_v42  ;;  %v161_v51 = vsel %vm97_vm0, %v143_v49, 0.0  ;;  %v158_v52 = vsel %vm97_vm0, %v142_v50, 0.0  ;;  %v167_v55 = vsel %vm97_vm0, %v145_v53, 0.0  ;;  %v164_v56 = vsel %vm97_vm0, %v144_v54, 0.0  ;;  %v14693_v49 = vld [vmem:[%s16857_s9] ss:$0 sm:$0xff] }
  0xe0   :  { %v13983_v0 = vpack.c.bf16 %v355_v63, %v354_v61  ;;  %v13987_v3 = vpack.c.bf16 %v469_v2, %v468_v1 }
  0xe2   :  { %13984 = vmatprep.subr.bf16.mxu1 %v13983_v0  ;;  %13988 = vmatprep.subr.bf16.mxu0 %v13987_v3 }
  0xe3   :  { %156 = vadd.xlane.f32.xlu1 %v155_v47  ;;  %153 = vadd.xlane.f32.xlu0 %v152_v48  ;;  %v16863_v48 = vmov 0.0  }
  0xe4   :  { %13986 = vmatpush3.bf16.msra.mxu1 %v13983_v0 }
  0xe5   :  { %13209 = vmatprep.subr.mxu1 %v16863_v48 }
  0xe7   :  { %162 = vadd.xlane.f32.xlu1 %v161_v51  ;;  %159 = vadd.xlane.f32.xlu0 %v158_v52 }
  0xeb   :  { %168 = vadd.xlane.f32.xlu1 %v167_v55  ;;  %165 = vadd.xlane.f32.xlu0 %v164_v56  ;;  %v14699_v55 = vld [vmem:[%s16856_s8] ss:$0 sm:$0xff] }
  0xfc   :  { %205 = vperm.xlu1 %14066, %v202_v57  }
 0x101   :  { %191 = vperm.xlu0 %14065, %v188_v58  }
 0x16c   :  { %v151_v4 = vpop.xlane.xlu1 %150  ;;  %v148_v5 = vpop.xlane.xlu0 %147 }
 0x16d   :  { %v170_v6 = vadd.f32 %v151_v4, %v148_v5 }
 0x170   :  { %v157_v7 = vpop.xlane.xlu1 %156  ;;  %v154_v8 = vpop.xlane.xlu0 %153 }
 0x171   :  { %v171_v9 = vadd.f32 %v170_v6, %v154_v8 }
 0x173   :  { %v172_v10 = vadd.f32 %v171_v9, %v157_v7 }
 0x174   :  { %v163_v11 = vpop.xlane.xlu1 %162  ;;  %v160_v12 = vpop.xlane.xlu0 %159 }
 0x175   :  { %v173_v13 = vadd.f32 %v172_v10, %v160_v12 }
 0x177   :  { %v174_v14 = vadd.f32 %v173_v13, %v163_v11 }
 0x178   :  { %v166_v15 = vpop.xlane.xlu0 %165  ;;  %v169_v17 = vpop.xlane.xlu1 %168 }
 0x179   :  { %v175_v16 = vadd.f32 %v174_v14, %v166_v15 }
 0x17b   :  { %v176_v18 = vadd.f32 %v175_v16, %v169_v17 }
 0x17c   :  { %v206_v26 = vpop.permute.xlu1 %205 }
 0x17d   :  { %v177_v19 = vmul.f32 0.0078125, %v176_v18 }
 0x17f   :  { %v178_v20 = vadd.f32 1e-05, %v177_v19 }
 0x180   :  { %v192_v22 = vpop.permute.xlu0 %191 }
 0x181   :  { %14067 = vrsqrt.f32 %v178_v20 }
 0x18b   :  { %v14068_v21 = vpop.eup %14067 }
 0x18c   :  { %v180_v23 = vmul.f32 %v14068_v21, %v14596_v34  ;;  %v181_v24 = vmul.f32 %v14068_v21, %v14594_v33  ;;  %v182_v25 = vmul.f32 %v14068_v21, %v14600_v36  ;;  %v183_v27 = vmul.f32 %v14068_v21, %v14598_v35 }
 0x18d   :  { %v184_v31 = vmul.f32 %v14068_v21, %v14608_v40  ;;  %v185_v41 = vmul.f32 %v14068_v21, %v14606_v39  ;;  %v186_v36 = vmul.f32 %v14068_v21, %v14618_v46  ;;  %v187_v39 = vmul.f32 %v14068_v21, %v14616_v45 }
 0x18e   :  { %v194_v28 = vmul.f32 %v192_v22, %v180_v23  ;;  %v195_v29 = vmul.f32 %v192_v22, %v181_v24  ;;  %v196_v30 = vmul.f32 %v192_v22, %v182_v25  ;;  %v197_v38 = vmul.f32 %v192_v22, %v183_v27  ;;  %v12521_v27 = vld [vmem:[%s16858_s10] ss:$0 sm:$0xff] }
 0x18f   :  { %v198_v34 = vmul.f32 %v192_v22, %v184_v31  ;;  %v199_v40 = vmul.f32 %v192_v22, %v185_v41  ;;  %v200_v43 = vmul.f32 %v192_v22, %v186_v36  ;;  %v201_v46 = vmul.f32 %v192_v22, %v187_v39 }
 0x190   :  { %v208_v32 = vadd.f32 %v206_v26, %v194_v28  ;;  %v209_v37 = vadd.f32 %v206_v26, %v195_v29  ;;  %v210_v33 = vadd.f32 %v206_v26, %v196_v30  ;;  %v211_v35 = vadd.f32 %v206_v26, %v197_v38 }
 0x191   :  { %v212_v42 = vadd.f32 %v206_v26, %v198_v34  ;;  %v213_v44 = vadd.f32 %v206_v26, %v199_v40  ;;  %v214_v47 = vadd.f32 %v206_v26, %v200_v43  ;;  %v215_v45 = vadd.f32 %v206_v26, %v201_v46 }
 0x192   :  { %13165 = vmatprep.mubr.msk.f32.mxu0 %vm97_vm0, %v208_v32  ;;  %13181 = vmatprep.mubr.msk.f32.mxu1 %vm97_vm0, %v208_v32 }
 0x193   :  { %13166 = vmatmul.mubr.msk.f32.vlgmr.msra.gmra.mrb[0].mxu0 %vm97_vm0, %v209_v37  ;;  %13182 = vmatmul.mubr.msk.f32.vlgmr.msra.gmra.mrb[0].mxu1 %vm97_vm0, %v209_v37 }
 0x194   :  { %13168 = vmatprep.mubr.msk.f32.mxu0 %vm97_vm0, %v210_v33  ;;  %13184 = vmatprep.mubr.msk.f32.mxu1 %vm97_vm0, %v210_v33 }
 0x195   :  { %13990 = vmatpush3.bf16.msra.mxu0 %v13987_v3 }
 0x196   :  { %13229 = vmatprep.subr.mxu0 %v16863_v48 }
 0x197   :  { %13169 = vmatmul.mubr.msk.f32.gmra.mrb[2].mxu0 %vm97_vm0, %v211_v35  ;;  %13185 = vmatmul.mubr.msk.f32.gmra.mrb[2].mxu1 %vm97_vm0, %v211_v35 }
 0x198   :  { %13171 = vmatprep.mubr.msk.f32.mxu0 %vm97_vm0, %v212_v42  ;;  %13187 = vmatprep.mubr.msk.f32.mxu1 %vm97_vm0, %v212_v42 }
 0x19b   :  { %13172 = vmatmul.mubr.msk.f32.gmra.mrb[4].mxu0 %vm97_vm0, %v213_v44  ;;  %13188 = vmatmul.mubr.msk.f32.gmra.mrb[4].mxu1 %vm97_vm0, %v213_v44 }
 0x19c   :  { %13174 = vmatprep.mubr.msk.f32.mxu0 %vm97_vm0, %v214_v47  ;;  %13190 = vmatprep.mubr.msk.f32.mxu1 %vm97_vm0, %v214_v47 }
 0x19f   :  { %13175 = vmatmul.mubr.msk.f32.gmra.mrb[6].mxu0 %vm97_vm0, %v215_v45  ;;  %13191 = vmatmul.mubr.msk.f32.gmra.mrb[6].mxu1 %vm97_vm0, %v215_v45 }
 0x1a0   :  { %13197 = vmatprep.mubr.msk.f32.mxu0 %vm97_vm0, %v208_v32  ;;  %13211 = vmatprep.mubr.msk.f32.mxu1 %vm14428_vm1, %v16863_v48 }
 0x1a3   :  { %13198 = vmatmul.mubr.msk.f32.vlgmr.msra.gmra.mrb[8].mxu0 %vm97_vm0, %v209_v37 }
 0x1a4   :  { %13200 = vmatprep.mubr.msk.f32.mxu0 %vm97_vm0, %v210_v33 }
 0x1a7   :  { %13201 = vmatmul.mubr.msk.f32.gmra.mrb[10].mxu0 %vm97_vm0, %v211_v35 }
 0x1a8   :  { %13203 = vmatprep.mubr.msk.f32.mxu0 %vm97_vm0, %v212_v42 }
 0x1ab   :  { %13204 = vmatmul.mubr.msk.f32.gmra.mrb[12].mxu0 %vm97_vm0, %v213_v44 }
 0x1ac   :  { %13206 = vmatprep.mubr.msk.f32.mxu0 %vm97_vm0, %v214_v47 }
 0x1af   :  { %13207 = vmatmul.mubr.msk.f32.gmra.mrb[14].mxu0 %vm97_vm0, %v215_v45 }
 0x1b0   :  { %13231 = vmatprep.mubr.msk.f32.mxu0 %vm14428_vm1, %v16863_v48 }
 0x266   :  { %v13167_v50 = vpop.f32.mrb[0].mxu0  ;;  %v13183_v51 = vpop.f32.mrb[0].mxu1 }
 0x267   :  { %v435_v52 = vadd.f32 %v13183_v51, %v14693_v49  ;;  %v315_v53 = vpop.f32.mrb[1].mxu0  ;;  %v429_v54 = vpop.f32.mrb[1].mxu1  ;;  %v321_v59 = vadd.f32 %v13167_v50, %v14699_v55 }
 0x268   :  { %v14702_v56 = vadd.f32 %v14693_v49, %v429_v54  ;;  %v14711_v62 = vadd.f32 %v14699_v55, %v315_v53 }
 0x269   :  { %664 = vrot.lane.b32.xlu0 %v435_v52, %s14429_s18  ;;  %648 = vrot.lane.b32.xlu1 %v435_v52, %s14430_s19 }
 0x26a   :  { %v13170_v57 = vpop.f32.mrb[2].mxu0  ;;  %v13186_v58 = vpop.f32.mrb[2].mxu1  ;;  %13210 = vmatpush3.xpose.msk.msra.mxu1 %vm774_vm2, %v14702_v56 }
 0x26b   :  { %v325_v60 = vpop.f32.mrb[3].mxu0  ;;  %v439_v61 = vpop.f32.mrb[3].mxu1  ;;  %13214 = vmatprep.subr.mxu1 %v16863_v48  ;;  %v445_v12 = vadd.f32 %v13186_v58, %v14693_v49  ;;  %v331_v14 = vadd.f32 %v13170_v57, %v14699_v55 }
 0x26c   :  { %v14725_v4 = vadd.f32 %v14693_v49, %v439_v61  ;;  %v14741_v10 = vadd.f32 %v14699_v55, %v325_v60 }
 0x26d   :  { %608 = vrot.lane.b32.xlu0 %v321_v59, %s14429_s18  ;;  %592 = vrot.lane.b32.xlu1 %v321_v59, %s14430_s19 }
 0x26e   :  { %13212 = vmatmul.mubr.msk.f32.vlgmr.msra.gmra.mrb[8].mxu1 %vm774_vm2, %v14711_v62  ;;  %v13173_v63 = vpop.f32.mrb[4].mxu0  ;;  %v13189_v0 = vpop.f32.mrb[4].mxu1 }
 0x26f   :  { %13215 = vmatpush3.xpose.msk.msra.mxu1 %vm774_vm2, %v435_v52  ;;  %v335_v1 = vpop.f32.mrb[5].mxu0  ;;  %v449_v2 = vpop.f32.mrb[5].mxu1  ;;  %13216 = vmatprep.mubr.msk.f32.mxu1 %vm14428_vm1, %v16863_v48  ;;  %v455_v17 = vadd.f32 %v13189_v0, %v14693_v49  ;;  %v341_v20 = vadd.f32 %v13173_v63, %v14699_v55 }
 0x270   :  { %v14721_v3 = vadd.f32 %v14693_v49, %v449_v2  ;;  %13219 = vmatprep.subr.mxu1 %v16863_v48  ;;  %v14734_v7 = vadd.f32 %v14699_v55, %v335_v1 }
 0x271   :  { %680 = vrot.lane.b32.xlu0 %v435_v52, %s14431_s20  ;;  %646 = vrot.lane.b32.xlu1 %v14702_v56, %s14430_s19 }
 0x272   :  { %13217 = vmatmul.mubr.msk.f32.vlgmr.msra.gmra.mrb[10].mxu1 %vm774_vm2, %v321_v59  ;;  %v13176_v5 = vpop.f32.mrb[6].mxu0  ;;  %v13192_v6 = vpop.f32.mrb[6].mxu1  ;;  %13230 = vmatpush3.xpose.msk.msra.mxu0 %vm774_vm2, %v14721_v3 }
 0x273   :  { %13220 = vmatpush3.xpose.msk.msra.mxu1 %vm774_vm2, %v14725_v4  ;;  %v345_v8 = vpop.f32.mrb[7].mxu0  ;;  %v459_v9 = vpop.f32.mrb[7].mxu1  ;;  %13221 = vmatprep.mubr.msk.f32.mxu1 %vm14428_vm1, %v16863_v48  ;;  %v465_v21 = vadd.f32 %v13192_v6, %v14693_v49  ;;  %v351_v24 = vadd.f32 %v13176_v5, %v14699_v55 }
 0x274   :  { %v14744_v11 = vadd.f32 %v14693_v49, %v459_v9  ;;  %13239 = vmatprep.subr.mxu0 %v16863_v48  ;;  %13224 = vmatprep.subr.mxu1 %v16863_v48  ;;  %v14765_v16 = vadd.f32 %v14699_v55, %v345_v8 }
 0x275   :  { %624 = vrot.lane.b32.xlu0 %v321_v59, %s14431_s20  ;;  %13232 = vmatmul.mubr.msk.f32.vlgmr.msra.gmra.mrb[16].mxu0 %vm774_vm2, %v14734_v7 }
 0x276   :  { %590 = vrot.lane.b32.xlu1 %v14711_v62, %s14430_s19  ;;  %13222 = vmatmul.mubr.msk.f32.vlgmr.msra.gmra.mrb[12].mxu1 %vm774_vm2, %v14741_v10  ;;  %v14756_v13 = vpop.f32.mrb[8].mxu0 }
 0x277   :  { %13225 = vmatpush3.xpose.msk.msra.mxu1 %vm774_vm2, %v445_v12  ;;  %13240 = vmatpush3.xpose.msk.msra.mxu0 %vm774_vm2, %v14744_v11  ;;  %v14762_v15 = vpop.f32.mrb[9].mxu0  ;;  %v14850_v28 = vadd.f32 %v14756_v13, %v12521_v27 }
 0x278   :  { %13226 = vmatprep.mubr.msk.f32.mxu1 %vm14428_vm1, %v16863_v48  ;;  %13241 = vmatprep.mubr.msk.f32.mxu0 %vm14428_vm1, %v16863_v48  ;;  %v14857_v29 = vadd.f32 %v12521_v27, %v14762_v15 }
 0x279   :  { %596 = vrot.lane.b32.xlu0 %v331_v14, %s14430_s19  ;;  %13234 = vmatprep.subr.mxu1 %v16863_v48 }
 0x27a   :  { %13242 = vmatmul.mubr.msk.f32.vlgmr.msra.gmra.mrb[18].mxu0 %vm774_vm2, %v14765_v16  ;;  %662 = vrot.lane.b32.xlu1 %v14702_v56, %s14429_s18  ;;  %v13202_v18 = vpop.f32.mrb[10].mxu0 }
 0x27b   :  { %13227 = vmatmul.mubr.msk.f32.vlgmr.msra.gmra.mrb[14].mxu1 %vm774_vm2, %v331_v14  ;;  %v14779_v19 = vpop.f32.mrb[11].mxu0  ;;  %13249 = vmatprep.subr.mxu0 %v16863_v48  ;;  %v14867_v30 = vadd.f32 %v13202_v18, %v12521_v27 }
 0x27c   :  { %13235 = vmatpush3.xpose.msk.msra.mxu1 %vm774_vm2, %v455_v17  ;;  %13236 = vmatprep.mubr.msk.f32.mxu1 %vm14428_vm1, %v16863_v48  ;;  %v14874_v31 = vadd.f32 %v12521_v27, %v14779_v19 }
 0x27d   :  { %668 = vrot.lane.b32.xlu0 %v445_v12, %s14429_s18  ;;  %13244 = vmatprep.subr.mxu1 %v16863_v48 }
 0x27e   :  { %606 = vrot.lane.b32.xlu1 %v14711_v62, %s14429_s18  ;;  %v13205_v22 = vpop.f32.mrb[12].mxu0  ;;  %13251 = vmatprep.mubr.msk.f32.mxu0 %vm14428_vm1, %v16863_v48 }
 0x27f   :  { %13237 = vmatmul.mubr.msk.f32.vlgmr.msra.gmra.mrb[16].mxu1 %vm774_vm2, %v341_v20  ;;  %v563_v23 = vpop.f32.mrb[13].mxu0  ;;  %v14884_v32 = vadd.f32 %v13205_v22, %v12521_v27 }
 0x280   :  { %13245 = vmatpush3.xpose.msk.msra.mxu1 %vm774_vm2, %v465_v21  ;;  %13246 = vmatprep.mubr.msk.f32.mxu1 %vm14428_vm1, %v16863_v48  ;;  %v14890_v37 = vadd.f32 %v12521_v27, %v563_v23 }
 0x281   :  { %612 = vrot.lane.b32.xlu0 %v331_v14, %s14429_s18  ;;  %13254 = vmatprep.subr.mxu1 %v16863_v48 }
 0x282   :  { %678 = vrot.lane.b32.xlu1 %v14702_v56, %s14431_s20  ;;  %v13208_v25 = vpop.f32.mrb[14].mxu0 }
 0x283   :  { %13247 = vmatmul.mubr.msk.f32.vlgmr.msra.gmra.mrb[18].mxu1 %vm774_vm2, %v351_v24  ;;  %v573_v26 = vpop.f32.mrb[15].mxu0  ;;  %v14896_v38 = vadd.f32 %v13208_v25, %v12521_v27 }
 0x284   :  { %13256 = vmatprep.mubr.msk.f32.mxu1 %vm14428_vm1, %v16863_v48  ;;  %v14904_v34 = vadd.f32 %v12521_v27, %v573_v26 }
 0x285   :  { %656 = vrot.lane.b32.xlu0 %v455_v17, %s14430_s19 }
 0x286   :  { %622 = vrot.lane.b32.xlu1 %v14711_v62, %s14431_s20 }
 0x289   :  { %600 = vrot.lane.b32.xlu0 %v341_v20, %s14430_s19 }
 0x28a   :  { %652 = vrot.lane.b32.xlu1 %v445_v12, %s14430_s19 }
 0x28d   :  { %672 = vrot.lane.b32.xlu0 %v455_v17, %s14429_s18 }
 0x28e   :  { %650 = vrot.lane.b32.xlu1 %v14725_v4, %s14430_s19 }
 0x291   :  { %616 = vrot.lane.b32.xlu0 %v341_v20, %s14429_s18 }
 0x292   :  { %594 = vrot.lane.b32.xlu1 %v14741_v10, %s14430_s19 }
 0x295   :  { %660 = vrot.lane.b32.xlu0 %v465_v21, %s14430_s19 }
 0x296   :  { %666 = vrot.lane.b32.xlu1 %v14725_v4, %s14429_s18 }
 0x299   :  { %604 = vrot.lane.b32.xlu0 %v351_v24, %s14430_s19 }
 0x29a   :  { %610 = vrot.lane.b32.xlu1 %v14741_v10, %s14429_s18 }
 0x29d   :  { %676 = vrot.lane.b32.xlu0 %v465_v21, %s14429_s18 }
 0x29e   :  { %654 = vrot.lane.b32.xlu1 %v14721_v3, %s14430_s19 }
 0x2a1   :  { %620 = vrot.lane.b32.xlu0 %v351_v24, %s14429_s18 }
 0x2a2   :  { %598 = vrot.lane.b32.xlu1 %v14734_v7, %s14430_s19 }
 0x2a5   :  { %684 = vrot.lane.b32.xlu0 %v445_v12, %s14431_s20 }
 0x2a6   :  { %670 = vrot.lane.b32.xlu1 %v14721_v3, %s14429_s18 }
 0x2a9   :  { %628 = vrot.lane.b32.xlu0 %v331_v14, %s14431_s20 }
 0x2aa   :  { %614 = vrot.lane.b32.xlu1 %v14734_v7, %s14429_s18 }
 0x2ad   :  { %688 = vrot.lane.b32.xlu0 %v455_v17, %s14431_s20 }
 0x2ae   :  { %658 = vrot.lane.b32.xlu1 %v14744_v11, %s14430_s19 }
 0x2b1   :  { %632 = vrot.lane.b32.xlu0 %v341_v20, %s14431_s20 }
 0x2b2   :  { %602 = vrot.lane.b32.xlu1 %v14765_v16, %s14430_s19 }
 0x2b5   :  { %692 = vrot.lane.b32.xlu0 %v465_v21, %s14431_s20 }
 0x2b6   :  { %682 = vrot.lane.b32.xlu1 %v14725_v4, %s14431_s20 }
 0x2b9   :  { %636 = vrot.lane.b32.xlu0 %v351_v24, %s14431_s20 }
 0x2ba   :  { %626 = vrot.lane.b32.xlu1 %v14741_v10, %s14431_s20 }
 0x2bd   :  { %752 = vrot.lane.b32.xlu0 %v14850_v28, %s14431_s20 }
 0x2be   :  { %674 = vrot.lane.b32.xlu1 %v14744_v11, %s14429_s18 }
 0x2c1   :  { %702 = vrot.lane.b32.xlu0 %v14857_v29, %s14430_s19 }
 0x2c2   :  { %618 = vrot.lane.b32.xlu1 %v14765_v16, %s14429_s18 }
 0x2c5   :  { %726 = vrot.lane.b32.xlu0 %v14857_v29, %s14429_s18 }
 0x2c6   :  { %686 = vrot.lane.b32.xlu1 %v14721_v3, %s14431_s20 }
 0x2c9   :  { %756 = vrot.lane.b32.xlu0 %v14867_v30, %s14431_s20 }
 0x2ca   :  { %630 = vrot.lane.b32.xlu1 %v14734_v7, %s14431_s20 }
 0x2cd   :  { %706 = vrot.lane.b32.xlu0 %v14874_v31, %s14430_s19 }
 0x2ce   :  { %690 = vrot.lane.b32.xlu1 %v14744_v11, %s14431_s20 }
 0x2d1   :  { %730 = vrot.lane.b32.xlu0 %v14874_v31, %s14429_s18 }
 0x2d2   :  { %634 = vrot.lane.b32.xlu1 %v14765_v16, %s14431_s20 }
 0x2d5   :  { %736 = vrot.lane.b32.xlu0 %v14884_v32, %s14429_s18 }
 0x2d6   :  { %704 = vrot.lane.b32.xlu1 %v14850_v28, %s14430_s19 }
 0x2d9   :  { %710 = vrot.lane.b32.xlu0 %v14890_v37, %s14430_s19 }
 0x2da   :  { %728 = vrot.lane.b32.xlu1 %v14850_v28, %s14429_s18 }
 0x2db   :  { %v665_v41 = vpop.permute.xlu0 %664  ;;  %v649_v33 = vpop.permute.xlu1 %648 }
 0x2dc   :  { %13255 = vmatpush3.xpose.msk.msra.mxu1 %vm774_vm2, %v649_v33 }
 0x2dd   :  { %740 = vrot.lane.b32.xlu0 %v14896_v38, %s14429_s18  ;;  %13264 = vmatprep.subr.mxu1 %v16863_v48 }
 0x2de   :  { %750 = vrot.lane.b32.xlu1 %v14857_v29, %s14431_s20 }
 0x2df   :  { %v609_v36 = vpop.permute.xlu0 %608  ;;  %v593_v35 = vpop.permute.xlu1 %592 }
 0x2e0   :  { %13257 = vmatmul.mubr.msk.f32.vlgmr.msra.gmra.mrb[20].mxu1 %vm774_vm2, %v593_v35 }
 0x2e1   :  { %714 = vrot.lane.b32.xlu0 %v14904_v34, %s14430_s19  ;;  %13266 = vmatprep.mubr.msk.f32.mxu1 %vm14428_vm1, %v16863_v48 }
 0x2e2   :  { %708 = vrot.lane.b32.xlu1 %v14867_v30, %s14430_s19 }
 0x2e3   :  { %v14913_v40 = vpop.permute.xlu0 %680  ;;  %v647_v39 = vpop.permute.xlu1 %646 }
 0x2e4   :  { %13250 = vmatpush3.xpose.msk.msra.mxu0 %vm774_vm2, %v647_v39 }
 0x2e5   :  { %13259 = vmatprep.subr.mxu0 %v16863_v48 }
 0x2e6   :  { %732 = vrot.lane.b32.xlu1 %v14867_v30, %s14429_s18 }
 0x2e7   :  { %v14919_v42 = vpop.permute.xlu0 %624 }
 0x2e8   :  { %v591_v43 = vpop.permute.xlu1 %590 }
 0x2e9   :  { %13252 = vmatmul.mubr.msk.f32.vlgmr.msra.gmra.mrb[20].mxu0 %vm774_vm2, %v591_v43 }
 0x2ea   :  { %754 = vrot.lane.b32.xlu1 %v14874_v31, %s14431_s20  ;;  %13261 = vmatprep.mubr.msk.f32.mxu0 %vm14428_vm1, %v16863_v48 }
 0x2eb   :  { %v597_v44 = vpop.permute.xlu0 %596 }
 0x2ec   :  { %v14926_v46 = vpop.permute.xlu1 %662 }
 0x2ee   :  { %712 = vrot.lane.b32.xlu1 %v14884_v32, %s14430_s19 }
 0x2ef   :  { %v669_v47 = vpop.permute.xlu0 %668 }
 0x2f0   :  { %v14930_v45 = vpop.permute.xlu1 %606 }
 0x2f2   :  { %734 = vrot.lane.b32.xlu1 %v14890_v37, %s14429_s18 }
 0x2f3   :  { %v613_v49 = vpop.permute.xlu0 %612 }
 0x2f4   :  { %v14934_v50 = vpop.permute.xlu1 %678 }
 0x2f6   :  { %716 = vrot.lane.b32.xlu1 %v14896_v38, %s14430_s19 }
 0x2f7   :  { %v657_v51 = vpop.permute.xlu0 %656 }
 0x2f8   :  { %v14938_v52 = vpop.permute.xlu1 %622 }
 0x2fa   :  { %738 = vrot.lane.b32.xlu1 %v14904_v34, %s14429_s18 }
 0x2fb   :  { %v601_v53 = vpop.permute.xlu0 %600 }
 0x2fc   :  { %v653_v54 = vpop.permute.xlu1 %652 }
 0x2fd   :  { %13265 = vmatpush3.xpose.msk.msra.mxu1 %vm774_vm2, %v653_v54 }
 0x2fe   :  { %13274 = vmatprep.subr.mxu1 %v16863_v48 }
 0x2ff   :  { %v673_v55 = vpop.permute.xlu0 %672 }
 0x300   :  { %v651_v56 = vpop.permute.xlu1 %650  ;;  %13267 = vmatmul.mubr.msk.f32.vlgmr.msra.gmra.mrb[22].mxu1 %vm774_vm2, %v597_v44 }
 0x301   :  { %13260 = vmatpush3.xpose.msk.msra.mxu0 %vm774_vm2, %v651_v56  ;;  %13275 = vmatpush3.xpose.msk.msra.mxu1 %vm774_vm2, %v657_v51 }
 0x302   :  { %13276 = vmatprep.mubr.msk.f32.mxu1 %vm14428_vm1, %v16863_v48  ;;  %13284 = vmatprep.subr.mxu1 %v16863_v48 }
 0x303   :  { %v617_v57 = vpop.permute.xlu0 %616  ;;  %13269 = vmatprep.subr.mxu0 %v16863_v48 }
 0x304   :  { %v595_v58 = vpop.permute.xlu1 %594  ;;  %13277 = vmatmul.mubr.msk.f32.vlgmr.msra.gmra.mrb[24].mxu1 %vm774_vm2, %v601_v53 }
 0x305   :  { %13262 = vmatmul.mubr.msk.f32.vlgmr.msra.gmra.mrb[22].mxu0 %vm774_vm2, %v595_v58  ;;  %13286 = vmatprep.mubr.msk.f32.mxu1 %vm14428_vm1, %v16863_v48 }
 0x306   :  { %13271 = vmatprep.mubr.msk.f32.mxu0 %vm14428_vm1, %v16863_v48 }
 0x307   :  { %v661_v59 = vpop.permute.xlu0 %660 }
 0x308   :  { %v667_v60 = vpop.permute.xlu1 %666  ;;  %13285 = vmatpush3.xpose.msk.msra.mxu1 %vm774_vm2, %v661_v59 }
 0x309   :  { %13294 = vmatprep.subr.mxu1 %v16863_v48 }
 0x30b   :  { %v605_v61 = vpop.permute.xlu0 %604 }
 0x30c   :  { %v14959_v62 = vpop.permute.xlu1 %610  ;;  %13287 = vmatmul.mubr.msk.f32.vlgmr.msra.gmra.mrb[26].mxu1 %vm774_vm2, %v605_v61 }
 0x30d   :  { %13295 = vmatpush3.xpose.msk.msra.mxu1 %vm774_vm2, %v665_v41  ;;  %13296 = vmatprep.mubr.msk.f32.mxu1 %vm14428_vm1, %v16863_v48 }
 0x30e   :  { %13304 = vmatprep.subr.mxu1 %v16863_v48 }
 0x30f   :  { %v677_v63 = vpop.permute.xlu0 %676 }
 0x310   :  { %v655_v0 = vpop.permute.xlu1 %654  ;;  %13297 = vmatmul.mubr.msk.f32.vlgmr.msra.gmra.mrb[28].mxu1 %vm774_vm2, %v609_v36 }
 0x311   :  { %13270 = vmatpush3.xpose.msk.msra.mxu0 %vm774_vm2, %v655_v0  ;;  %13305 = vmatpush3.xpose.msk.msra.mxu1 %vm774_vm2, %v669_v47 }
 0x312   :  { %13306 = vmatprep.mubr.msk.f32.mxu1 %vm14428_vm1, %v16863_v48  ;;  %13314 = vmatprep.subr.mxu1 %v16863_v48 }
 0x313   :  { %v621_v1 = vpop.permute.xlu0 %620  ;;  %13279 = vmatprep.subr.mxu0 %v16863_v48 }
 0x314   :  { %v599_v2 = vpop.permute.xlu1 %598  ;;  %13307 = vmatmul.mubr.msk.f32.vlgmr.msra.gmra.mrb[30].mxu1 %vm774_vm2, %v613_v49 }
 0x315   :  { %13272 = vmatmul.mubr.msk.f32.vlgmr.msra.gmra.mrb[24].mxu0 %vm774_vm2, %v599_v2  ;;  %13315 = vmatpush3.xpose.msk.msra.mxu1 %vm774_vm2, %v673_v55 }
 0x316   :  { %13316 = vmatprep.mubr.msk.f32.mxu1 %vm14428_vm1, %v16863_v48  ;;  %13324 = vmatprep.subr.mxu1 %v16863_v48 }
 0x317   :  { %v685_v3 = vpop.permute.xlu0 %684  ;;  %13281 = vmatprep.mubr.msk.f32.mxu0 %vm14428_vm1, %v16863_v48 }
 0x318   :  { %v671_v4 = vpop.permute.xlu1 %670  ;;  %13317 = vmatmul.mubr.msk.f32.vlgmr.msra.gmra.mrb[32].mxu1 %vm774_vm2, %v617_v57 }
 0x319   :  { %13325 = vmatpush3.xpose.msk.msra.mxu1 %vm774_vm2, %v677_v63  ;;  %13326 = vmatprep.mubr.msk.f32.mxu1 %vm14428_vm1, %v16863_v48 }
 0x31a   :  { %13334 = vmatprep.subr.mxu1 %v16863_v48 }
 0x31b   :  { %v629_v5 = vpop.permute.xlu0 %628 }
 0x31c   :  { %v615_v6 = vpop.permute.xlu1 %614  ;;  %13327 = vmatmul.mubr.msk.f32.vlgmr.msra.gmra.mrb[34].mxu1 %vm774_vm2, %v621_v1 }
 0x31d   :  { %13335 = vmatpush3.xpose.msk.msra.mxu1 %vm774_vm2, %v14913_v40  ;;  %13336 = vmatprep.mubr.msk.f32.mxu1 %vm14428_vm1, %v16863_v48 }
 0x31e   :  { %13344 = vmatprep.subr.mxu1 %v16863_v48 }
 0x31f   :  { %v689_v7 = vpop.permute.xlu0 %688 }
 0x320   :  { %v659_v8 = vpop.permute.xlu1 %658  ;;  %13337 = vmatmul.mubr.msk.f32.vlgmr.msra.gmra.mrb[36].mxu1 %vm774_vm2, %v14919_v42 }
 0x321   :  { %13280 = vmatpush3.xpose.msk.msra.mxu0 %vm774_vm2, %v659_v8  ;;  %13345 = vmatpush3.xpose.msk.msra.mxu1 %vm774_vm2, %v685_v3 }
 0x322   :  { %13289 = vmatprep.subr.mxu0 %v16863_v48  ;;  %13346 = vmatprep.mubr.msk.f32.mxu1 %vm14428_vm1, %v16863_v48 }
 0x323   :  { %v633_v9 = vpop.permute.xlu0 %632  ;;  %13354 = vmatprep.subr.mxu1 %v16863_v48 }
 0x324   :  { %v603_v10 = vpop.permute.xlu1 %602  ;;  %13347 = vmatmul.mubr.msk.f32.vlgmr.msra.gmra.mrb[38].mxu1 %vm774_vm2, %v629_v5 }
 0x325   :  { %13282 = vmatmul.mubr.msk.f32.vlgmr.msra.gmra.mrb[26].mxu0 %vm774_vm2, %v603_v10  ;;  %13355 = vmatpush3.xpose.msk.msra.mxu1 %vm774_vm2, %v689_v7 }
 0x326   :  { %13290 = vmatpush3.xpose.msk.msra.mxu0 %vm774_vm2, %v14926_v46  ;;  %13291 = vmatprep.mubr.msk.f32.mxu0 %vm14428_vm1, %v16863_v48 }
 0x327   :  { %v693_v11 = vpop.permute.xlu0 %692  ;;  %13299 = vmatprep.subr.mxu0 %v16863_v48  ;;  %13356 = vmatprep.mubr.msk.f32.mxu1 %vm14428_vm1, %v16863_v48 }
 0x328   :  { %v683_v12 = vpop.permute.xlu1 %682  ;;  %13364 = vmatprep.subr.mxu1 %v16863_v48  ;;  %13357 = vmatmul.mubr.msk.f32.vlgmr.msra.gmra.mrb[40].mxu1 %vm774_vm2, %v633_v9 }
 0x329   :  { %13292 = vmatmul.mubr.msk.f32.vlgmr.msra.gmra.mrb[28].mxu0 %vm774_vm2, %v14930_v45  ;;  %13365 = vmatpush3.xpose.msk.msra.mxu1 %vm774_vm2, %v693_v11 }
 0x32a   :  { %13300 = vmatpush3.xpose.msk.msra.mxu0 %vm774_vm2, %v667_v60  ;;  %13301 = vmatprep.mubr.msk.f32.mxu0 %vm14428_vm1, %v16863_v48 }
 0x32b   :  { %v637_v13 = vpop.permute.xlu0 %636  ;;  %13309 = vmatprep.subr.mxu0 %v16863_v48  ;;  %13366 = vmatprep.mubr.msk.f32.mxu1 %vm14428_vm1, %v16863_v48 }
 0x32c   :  { %v627_v14 = vpop.permute.xlu1 %626  ;;  %13374 = vmatprep.subr.mxu1 %v16863_v48  ;;  %13367 = vmatmul.mubr.msk.f32.vlgmr.msra.gmra.mrb[42].mxu1 %vm774_vm2, %v637_v13 }
 0x32d   :  { %13302 = vmatmul.mubr.msk.f32.vlgmr.msra.gmra.mrb[30].mxu0 %vm774_vm2, %v14959_v62  ;;  %13375 = vmatpush3.msra.mxu1 %v14850_v28 }
 0x32e   :  { %13310 = vmatpush3.xpose.msk.msra.mxu0 %vm774_vm2, %v671_v4  ;;  %13311 = vmatprep.mubr.msk.f32.mxu0 %vm14428_vm1, %v16863_v48 }
 0x32f   :  { %13319 = vmatprep.subr.mxu0 %v16863_v48  ;;  %13376 = vmatprep.mubr.msk.f32.mxu1 %vm14428_vm1, %v16863_v48 }
 0x330   :  { %v675_v15 = vpop.permute.xlu1 %674  ;;  %13384 = vmatprep.subr.mxu1 %v16863_v48 }
 0x331   :  { %13312 = vmatmul.mubr.msk.f32.vlgmr.msra.gmra.mrb[32].mxu0 %vm774_vm2, %v615_v6 }
 0x332   :  { %13320 = vmatpush3.xpose.msk.msra.mxu0 %vm774_vm2, %v675_v15  ;;  %13321 = vmatprep.mubr.msk.f32.mxu0 %vm14428_vm1, %v16863_v48 }
 0x333   :  { %13329 = vmatprep.subr.mxu0 %v16863_v48 }
 0x334   :  { %v619_v16 = vpop.permute.xlu1 %618 }
 0x335   :  { %13322 = vmatmul.mubr.msk.f32.vlgmr.msra.gmra.mrb[34].mxu0 %vm774_vm2, %v619_v16 }
 0x336   :  { %13330 = vmatpush3.xpose.msk.msra.mxu0 %vm774_vm2, %v14934_v50  ;;  %13331 = vmatprep.mubr.msk.f32.mxu0 %vm14428_vm1, %v16863_v48 }
 0x337   :  { %13339 = vmatprep.subr.mxu0 %v16863_v48 }
 0x338   :  { %v687_v17 = vpop.permute.xlu1 %686 }
 0x339   :  { %13332 = vmatmul.mubr.msk.f32.vlgmr.msra.gmra.mrb[36].mxu0 %vm774_vm2, %v14938_v52 }
 0x33a   :  { %13340 = vmatpush3.xpose.msk.msra.mxu0 %vm774_vm2, %v683_v12  ;;  %13341 = vmatprep.mubr.msk.f32.mxu0 %vm14428_vm1, %v16863_v48 }
 0x33b   :  { %13349 = vmatprep.subr.mxu0 %v16863_v48 }
 0x33c   :  { %v631_v18 = vpop.permute.xlu1 %630 }
 0x33d   :  { %13342 = vmatmul.mubr.msk.f32.vlgmr.msra.gmra.mrb[38].mxu0 %vm774_vm2, %v627_v14 }
 0x33e   :  { %13350 = vmatpush3.xpose.msk.msra.mxu0 %vm774_vm2, %v687_v17  ;;  %13351 = vmatprep.mubr.msk.f32.mxu0 %vm14428_vm1, %v16863_v48 }
 0x33f   :  { %13359 = vmatprep.subr.mxu0 %v16863_v48 }
 0x340   :  { %v691_v19 = vpop.permute.xlu1 %690 }
 0x341   :  { %v845_v20 = vpop.f32.mrb[8].mxu1  ;;  %13352 = vmatmul.mubr.msk.f32.vlgmr.msra.gmra.mrb[40].mxu0 %vm774_vm2, %v631_v18 }
 0x342   :  { %v15056_v21 = vmul.f32 0.5, %v845_v20  ;;  %13360 = vmatpush3.xpose.msk.msra.mxu0 %vm774_vm2, %v691_v19  ;;  %v13213_v22 = vpop.f32.mrb[9].mxu1  ;;  %13361 = vmatprep.mubr.msk.f32.mxu0 %vm14428_vm1, %v16863_v48 }
 0x343   :  { %13369 = vmatprep.subr.mxu0 %v16863_v48 }
 0x344   :  { %v635_v23 = vpop.permute.xlu1 %634  ;;  %v3176_v24 = vsel %vm3175_vm3, %v15056_v21, -inf }
 0x345   :  { %13362 = vmatmul.mubr.msk.f32.vlgmr.msra.gmra.mrb[42].mxu0 %vm774_vm2, %v635_v23  ;;  %3177 = vmax.xlane.f32.xlu1 %v3176_v24  ;;  %v919_v25 = vpop.f32.mrb[10].mxu1 }
 0x346   :  { %13370 = vmatpush3.msra.mxu0 %v14857_v29  ;;  %v15066_v26 = vmul.f32 0.5, %v919_v25  ;;  %v13218_v27 = vpop.f32.mrb[11].mxu1  ;;  %13371 = vmatprep.mubr.msk.f32.mxu0 %vm14428_vm1, %v16863_v48 }
 0x347   :  { %13379 = vmatprep.subr.mxu0 %v16863_v48 }
 0x348   :  { %v1141_v28 = vpop.f32.mrb[16].mxu0  ;;  %v3179_v41 = vsel %vm3175_vm3, %v15066_v26, -inf  ;;  %v15105_v4 = vpop.permute.xlu1 %704 }
 0x349   :  { %3180 = vmax.xlane.f32.xlu0 %v3179_v41  ;;  %v993_v33 = vpop.f32.mrb[12].mxu1  ;;  %v13233_v36 = vpop.f32.mrb[17].mxu0  ;;  %v15075_v39 = vmul.f32 0.5, %v1141_v28 }
 0x34a   :  { %v15073_v35 = vmul.f32 0.5, %v993_v33  ;;  %v13223_v40 = vpop.f32.mrb[13].mxu1  ;;  %v15133_v33 = vpop.permute.xlu0 %752 }
 0x34b   :  { %v3188_v49 = vsel %vm3175_vm3, %v15075_v39, -inf  ;;  %16867 = vst [vmem:[#allocation13_spill] sm:$0xff] %v15133_v33 }
 0x34c   :  { %v3182_v29 = vsel %vm3175_vm3, %v15073_v35, -inf  ;;  %v15107_v5 = vpop.permute.xlu1 %728 }
 0x34d   :  { %v1289_v42 = vpop.f32.mrb[18].mxu0  ;;  %3183 = vmax.xlane.f32.xlu0 %v3182_v29 }
 0x34e   :  { %v1067_v43 = vpop.f32.mrb[14].mxu1  ;;  %v13243_v44 = vpop.f32.mrb[19].mxu0  ;;  %v15081_v45 = vmul.f32 0.5, %v1289_v42 }
 0x34f   :  { %v15079_v46 = vmul.f32 0.5, %v1067_v43  ;;  %v13228_v47 = vpop.f32.mrb[15].mxu1 }
 0x350   :  { %v3194_v54 = vsel %vm3175_vm3, %v15081_v45, -inf  ;;  %v15111_v9 = vpop.permute.xlu1 %750 }
 0x351   :  { %3189 = vmax.xlane.f32.xlu0 %v3188_v49  ;;  %v3185_v50 = vsel %vm3175_vm3, %v15079_v46, -inf  ;;  %16866 = vst [vmem:[#allocation12_spill] sm:$0xff] %v15111_v9 }
 0x352   :  { %3186 = vmax.xlane.f32.xlu1 %v3185_v50  ;;  %v1215_v51 = vpop.f32.mrb[16].mxu1 }
 0x353   :  { %v15087_v52 = vmul.f32 0.5, %v1215_v51  ;;  %v13238_v53 = vpop.f32.mrb[17].mxu1  ;;  %v15145_v51 = vpop.permute.xlu0 %702 }
 0x354   :  { %v15121_v18 = vpop.permute.xlu1 %708 }
 0x355   :  { %3195 = vmax.xlane.f32.xlu0 %v3194_v54  ;;  %v3191_v55 = vsel %vm3175_vm3, %v15087_v52, -inf }
 0x356   :  { %3192 = vmax.xlane.f32.xlu1 %v3191_v55  ;;  %v1363_v56 = vpop.f32.mrb[18].mxu1 }
 0x357   :  { %v15093_v57 = vmul.f32 0.5, %v1363_v56  ;;  %v13248_v58 = vpop.f32.mrb[19].mxu1 }
 0x358   :  { %v15127_v24 = vpop.permute.xlu1 %732 }
 0x359   :  { %v3197_v59 = vsel %vm3175_vm3, %v15093_v57, -inf }
 0x35a   :  { %3198 = vmax.xlane.f32.xlu1 %v3197_v59 }
 0x35c   :  { %v15137_v40 = vpop.permute.xlu1 %754 }
 0x35d   :  { %16868 = vst [vmem:[#allocation14_spill] sm:$0xff] %v15137_v40 }
 0x360   :  { %v15151_v58 = vpop.permute.xlu1 %712 }
 0x3b3   :  { %v1511_v60 = vpop.f32.mrb[20].mxu1 }
 0x3b4   :  { %v15097_v61 = vmul.f32 0.5, %v1511_v60  ;;  %v13258_v62 = vpop.f32.mrb[21].mxu1 }
 0x3b6   :  { %v3203_v63 = vsel %vm3175_vm3, %v15097_v61, -inf }
 0x3b7   :  { %3204 = vmax.xlane.f32.xlu1 %v3203_v63 }
 0x3bc   :  { %v1437_v0 = vpop.f32.mrb[20].mxu0 }
 0x3bd   :  { %v15101_v1 = vmul.f32 0.5, %v1437_v0  ;;  %v13253_v2 = vpop.f32.mrb[21].mxu0  ;;  %v15157_v0 = vpop.permute.xlu0 %726 }
 0x3be   :  { %16869 = vst [vmem:[#allocation15_spill] sm:$0xff] %v15157_v0 }
 0x3bf   :  { %v3200_v3 = vsel %vm3175_vm3, %v15101_v1, -inf }
 0x3c0   :  { %3201 = vmax.xlane.f32.xlu0 %v3200_v3  ;;  %v15161_v3 = vpop.permute.xlu1 %734 }
 0x3c1   :  { %16870 = vst [vmem:[#allocation16_spill] sm:$0xff] %v15161_v3 }
 0x3d3   :  { %v1659_v6 = vpop.f32.mrb[22].mxu1 }
 0x3d4   :  { %v15109_v7 = vmul.f32 0.5, %v1659_v6  ;;  %v13268_v8 = vpop.f32.mrb[23].mxu1 }
 0x3d6   :  { %v3209_v10 = vsel %vm3175_vm3, %v15109_v7, -inf }
 0x3d7   :  { %3210 = vmax.xlane.f32.xlu1 %v3209_v10  ;;  %v1807_v11 = vpop.f32.mrb[24].mxu1 }
 0x3d8   :  { %v15115_v12 = vmul.f32 0.5, %v1807_v11  ;;  %v1585_v13 = vpop.f32.mrb[22].mxu0  ;;  %v13278_v14 = vpop.f32.mrb[25].mxu1 }
 0x3d9   :  { %v15117_v15 = vmul.f32 0.5, %v1585_v13  ;;  %v13263_v16 = vpop.f32.mrb[23].mxu0  ;;  %v15167_v13 = vpop.permute.xlu0 %756 }
 0x3da   :  { %v3215_v17 = vsel %vm3175_vm3, %v15115_v12, -inf  ;;  %16871 = vst [vmem:[#allocation17_spill] sm:$0xff] %v15167_v13 }
 0x3db   :  { %3216 = vmax.xlane.f32.xlu1 %v3215_v17  ;;  %v3206_v19 = vsel %vm3175_vm3, %v15117_v15, -inf }
 0x3dc   :  { %3207 = vmax.xlane.f32.xlu0 %v3206_v19 }
 0x3df   :  { %v1955_v20 = vpop.f32.mrb[26].mxu1 }
 0x3e0   :  { %v15125_v22 = vmul.f32 0.5, %v1955_v20  ;;  %v13288_v23 = vpop.f32.mrb[27].mxu1  ;;  %v15171_v20 = vpop.permute.xlu1 %716 }
 0x3e2   :  { %v3221_v25 = vsel %vm3175_vm3, %v15125_v22, -inf }
 0x3e3   :  { %3222 = vmax.xlane.f32.xlu1 %v3221_v25  ;;  %v2103_v27 = vpop.f32.mrb[28].mxu1 }
 0x3e4   :  { %v15131_v28 = vmul.f32 0.5, %v2103_v27  ;;  %v13298_v41 = vpop.f32.mrb[29].mxu1 }
 0x3e6   :  { %v3227_v36 = vsel %vm3175_vm3, %v15131_v28, -inf }
 0x3e7   :  { %3228 = vmax.xlane.f32.xlu1 %v3227_v36  ;;  %v2251_v29 = vpop.f32.mrb[30].mxu1 }
 0x3e8   :  { %v1733_v42 = vpop.f32.mrb[24].mxu0  ;;  %v15139_v43 = vmul.f32 0.5, %v2251_v29  ;;  %v13308_v44 = vpop.f32.mrb[31].mxu1 }
 0x3e9   :  { %v15141_v47 = vmul.f32 0.5, %v1733_v42  ;;  %v13273_v49 = vpop.f32.mrb[25].mxu0 }
 0x3ea   :  { %v3233_v50 = vsel %vm3175_vm3, %v15139_v43, -inf  ;;  %v15181_v49 = vpop.permute.xlu0 %706 }
 0x3eb   :  { %v3212_v53 = vsel %vm3175_vm3, %v15141_v47, -inf  ;;  %3234 = vmax.xlane.f32.xlu1 %v3233_v50  ;;  %v2399_v54 = vpop.f32.mrb[32].mxu1 }
 0x3ec   :  { %3213 = vmax.xlane.f32.xlu0 %v3212_v53  ;;  %v15149_v55 = vmul.f32 0.5, %v2399_v54  ;;  %v13318_v56 = vpop.f32.mrb[33].mxu1 }
 0x3ed   :  { %v15187_v56 = vpop.permute.xlu1 %738 }
 0x3ee   :  { %v3239_v59 = vsel %vm3175_vm3, %v15149_v55, -inf  ;;  %16872 = vst [vmem:[#allocation18_spill] sm:$0xff] %v15187_v56 }
 0x3ef   :  { %3240 = vmax.xlane.f32.xlu1 %v3239_v59  ;;  %v2547_v60 = vpop.f32.mrb[34].mxu1 }
 0x3f0   :  { %v15155_v62 = vmul.f32 0.5, %v2547_v60  ;;  %v13328_v63 = vpop.f32.mrb[35].mxu1 }
 0x3f2   :  { %v3245_v2 = vsel %vm3175_vm3, %v15155_v62, -inf }
 0x3f3   :  { %3246 = vmax.xlane.f32.xlu1 %v3245_v2  ;;  %v2695_v6 = vpop.f32.mrb[36].mxu1 }
 0x3f4   :  { %v15163_v8 = vmul.f32 0.5, %v2695_v6  ;;  %v13338_v10 = vpop.f32.mrb[37].mxu1 }
 0x3f6   :  { %v3251_v11 = vsel %vm3175_vm3, %v15163_v8, -inf }
 0x3f7   :  { %3252 = vmax.xlane.f32.xlu1 %v3251_v11  ;;  %v2843_v14 = vpop.f32.mrb[38].mxu1 }
 0x3f8   :  { %v1881_v16 = vpop.f32.mrb[26].mxu0  ;;  %v15169_v17 = vmul.f32 0.5, %v2843_v14  ;;  %v13348_v19 = vpop.f32.mrb[39].mxu1 }
 0x3f9   :  { %v15173_v23 = vmul.f32 0.5, %v1881_v16  ;;  %v13283_v25 = vpop.f32.mrb[27].mxu0  ;;  %v15197_v16 = vpop.permute.xlu0 %730 }
 0x3fa   :  { %v3257_v27 = vsel %vm3175_vm3, %v15169_v17, -inf  ;;  %16873 = vst [vmem:[#allocation19_spill] sm:$0xff] %v15197_v16  ;;  %v3178_v19 = vpop.xlane.xlu1 %3177 }
 0x3fb   :  { %v3218_v41 = vsel %vm3175_vm3, %v15173_v23, -inf  ;;  %3258 = vmax.xlane.f32.xlu1 %v3257_v27  ;;  %v2991_v36 = vpop.f32.mrb[40].mxu1 }
 0x3fc   :  { %v2029_v29 = vpop.f32.mrb[28].mxu0  ;;  %3219 = vmax.xlane.f32.xlu0 %v3218_v41  ;;  %v15179_v42 = vmul.f32 0.5, %v2991_v36  ;;  %v13358_v44 = vpop.f32.mrb[41].mxu1 }
 0x3fd   :  { %v15183_v50 = vmul.f32 0.5, %v2029_v29  ;;  %v13293_v53 = vpop.f32.mrb[29].mxu0  ;;  %v3272_v29 = vsub.f32 %v15056_v21, %v3178_v19 }
 0x3fe   :  { %v3263_v54 = vsel %vm3175_vm3, %v15179_v42, -inf }
 0x3ff   :  { %v3224_v59 = vsel %vm3175_vm3, %v15183_v50, -inf  ;;  %3264 = vmax.xlane.f32.xlu1 %v3263_v54  ;;  %v3139_v60 = vpop.f32.mrb[42].mxu1  ;;  %v15206_v54 = vpop.permute.xlu0 %736 }
 0x400   :  { %v2177_v63 = vpop.f32.mrb[30].mxu0  ;;  %3225 = vmax.xlane.f32.xlu0 %v3224_v59  ;;  %v15191_v2 = vmul.f32 0.5, %v3139_v60  ;;  %v13368_v6 = vpop.f32.mrb[43].mxu1 }
 0x401   :  { %v15193_v10 = vmul.f32 0.5, %v2177_v63  ;;  %v13303_v11 = vpop.f32.mrb[31].mxu0  ;;  %v3304_v63 = vmul.f32 1.442695, %v3272_v29 }
 0x402   :  { %v3269_v14 = vsel %vm3175_vm3, %v15191_v2, -inf }
 0x403   :  { %v3230_v25 = vsel %vm3175_vm3, %v15193_v10, -inf  ;;  %3270 = vmax.xlane.f32.xlu1 %v3269_v14  ;;  %14069 = vpow2.f32 %v3304_v63  ;;  %v15214_v21 = vpop.permute.xlu0 %710 }
 0x404   :  { %v2325_v27 = vpop.f32.mrb[32].mxu0  ;;  %3231 = vmax.xlane.f32.xlu0 %v3230_v25 }
 0x405   :  { %v15201_v41 = vmul.f32 0.5, %v2325_v27  ;;  %v13313_v36 = vpop.f32.mrb[33].mxu0 }
 0x407   :  { %v3236_v44 = vsel %vm3175_vm3, %v15201_v41, -inf }
 0x408   :  { %v2473_v53 = vpop.f32.mrb[34].mxu0  ;;  %3237 = vmax.xlane.f32.xlu0 %v3236_v44 }
 0x409   :  { %v15208_v59 = vmul.f32 0.5, %v2473_v53  ;;  %v13323_v60 = vpop.f32.mrb[35].mxu0 }
 0x40a   :  { %v15224_v60 = vpop.permute.xlu0 %740 }
 0x40b   :  { %v3242_v6 = vsel %vm3175_vm3, %v15208_v59, -inf }
 0x40c   :  { %v2621_v11 = vpop.f32.mrb[36].mxu0  ;;  %3243 = vmax.xlane.f32.xlu0 %v3242_v6 }
 0x40d   :  { %v15212_v14 = vmul.f32 0.5, %v2621_v11  ;;  %v13333_v25 = vpop.f32.mrb[37].mxu0 }
 0x40e   :  { %v15230_v25 = vpop.eup %14069 }
 0x40f   :  { %v3248_v19 = vsel %vm3175_vm3, %v15212_v14, -inf }
 0x410   :  { %v2769_v27 = vpop.f32.mrb[38].mxu0  ;;  %3249 = vmax.xlane.f32.xlu0 %v3248_v19 }
 0x411   :  { %v15218_v36 = vmul.f32 0.5, %v2769_v27  ;;  %v13343_v44 = vpop.f32.mrb[39].mxu0 }
 0x412   :  { %v15232_v44 = vpop.permute.xlu0 %714 }
 0x413   :  { %v3254_v29 = vsel %vm3175_vm3, %v15218_v36, -inf }
 0x414   :  { %v2917_v53 = vpop.f32.mrb[40].mxu0  ;;  %3255 = vmax.xlane.f32.xlu0 %v3254_v29  ;;  %758 = vrot.lane.b32.xlu1 %v14890_v37, %s14431_s20  ;;  %v3368_v29 = vsel %vm3175_vm3, %v15230_v25, 0.0 }
 0x415   :  { %v15226_v63 = vmul.f32 0.5, %v2917_v53  ;;  %v13353_v6 = vpop.f32.mrb[41].mxu0  ;;  %v3187_v53 = vpop.xlane.xlu1 %3186 }
 0x416   :  { %v3181_v40 = vpop.xlane.xlu0 %3180 }
 0x417   :  { %v3260_v11 = vsel %vm3175_vm3, %v15226_v63, -inf  ;;  %v3273_v13 = vsub.f32 %v15066_v26, %v3181_v40 }
 0x418   :  { %v3065_v19 = vpop.f32.mrb[42].mxu0  ;;  %3261 = vmax.xlane.f32.xlu0 %v3260_v11  ;;  %v3275_v11 = vsub.f32 %v15079_v46, %v3187_v53 }
 0x419   :  { %v13363_v27 = vpop.f32.mrb[43].mxu0  ;;  %v15234_v48 = vmul.f32 0.5, %v3065_v19  ;;  %v3193_v9 = vpop.xlane.xlu1 %3192  ;;  %v3306_v33 = vmul.f32 1.442695, %v3273_v13 }
 0x41a   :  { %v3310_v27 = vmul.f32 1.442695, %v3275_v11  ;;  %v3277_v19 = vsub.f32 %v15087_v52, %v3193_v9 }
 0x41b   :  { %v3266_v6 = vsel %vm3175_vm3, %v15234_v48, -inf  ;;  %14071 = vpow2.f32 %v3306_v33  ;;  %v3184_v33 = vpop.xlane.xlu0 %3183 }
 0x41c   :  { %3369 = vadd.xlane.f32.xlu0 %v3368_v29  ;;  %14073 = vpow2.f32 %v3310_v27  ;;  %v3314_v3 = vmul.f32 1.442695, %v3277_v19  ;;  %v3274_v40 = vsub.f32 %v15073_v35, %v3184_v33 }
 0x41d   :  { %v3199_v56 = vpop.xlane.xlu1 %3198 }
 0x41e   :  { %v3279_v29 = vsub.f32 %v15093_v57, %v3199_v56  ;;  %14075 = vpow2.f32 %v3314_v3  ;;  %v3308_v56 = vmul.f32 1.442695, %v3274_v40 }
 0x41f   :  { %v3190_v57 = vpop.xlane.xlu0 %3189 }
 0x420   :  { %3267 = vmax.xlane.f32.xlu0 %v3266_v6  ;;  %v3318_v16 = vmul.f32 1.442695, %v3279_v29 }
 0x422   :  { %14077 = vpow2.f32 %v3318_v16  ;;  %v3276_v16 = vsub.f32 %v15075_v39, %v3190_v57 }
 0x423   :  { %v3196_v6 = vpop.xlane.xlu0 %3195  ;;  %14079 = vpow2.f32 %v3308_v56 }
 0x424   :  { %v3312_v19 = vmul.f32 1.442695, %v3276_v16  ;;  %v3278_v35 = vsub.f32 %v15081_v45, %v3196_v6 }
 0x425   :  { %v15244_v0 = vpop.eup %14071 }
 0x426   :  { %v3371_v26 = vsel %vm3175_vm3, %v15244_v0, 0.0  ;;  %v15250_v46 = vpop.eup %14073 }
 0x427   :  { %v3377_v52 = vsel %vm3175_vm3, %v15250_v46, 0.0 }
 0x428   :  { %v15254_v9 = vpop.eup %14075 }
 0x429   :  { %v3383_v3 = vsel %vm3175_vm3, %v15254_v9, 0.0 }
 0x42c   :  { %v15259_v13 = vpop.eup %14077 }
 0x42d   :  { %v3389_v53 = vsel %vm3175_vm3, %v15259_v13, 0.0  ;;  %v15267_v57 = vpop.eup %14079 }
 0x436   :  { %760 = vrot.lane.b32.xlu0 %v14884_v32, %s14431_s20 }
 0x438   :  { %3372 = vadd.xlane.f32.xlu1 %v3371_v26  ;;  %v3316_v26 = vmul.f32 1.442695, %v3278_v35 }
 0x43c   :  { %3378 = vadd.xlane.f32.xlu1 %v3377_v52 }
 0x440   :  { %3384 = vadd.xlane.f32.xlu1 %v3383_v3 }
 0x444   :  { %v3205_v11 = vpop.xlane.xlu1 %3204  ;;  %3390 = vadd.xlane.f32.xlu1 %v3389_v53 }
 0x445   :  { %v3281_v27 = vsub.f32 %v15097_v61, %v3205_v11  ;;  %v3374_v61 = vsel %vm3175_vm3, %v15267_v57, 0.0 }
 0x447   :  { %v3322_v29 = vmul.f32 1.442695, %v3281_v27 }
 0x449   :  { %14081 = vpow2.f32 %v3322_v29 }
 0x44a   :  { %14083 = vpow2.f32 %v3312_v19 }
 0x44b   :  { %14085 = vpow2.f32 %v3316_v26 }
 0x44d   :  { %v3202_v33 = vpop.xlane.xlu0 %3201 }
 0x44e   :  { %v3280_v52 = vsub.f32 %v15101_v1, %v3202_v33 }
 0x450   :  { %v3320_v39 = vmul.f32 1.442695, %v3280_v52 }
 0x452   :  { %14087 = vpow2.f32 %v3320_v39 }
 0x453   :  { %v15269_v40 = vpop.eup %14081 }
 0x454   :  { %v3395_v45 = vsel %vm3175_vm3, %v15269_v40, 0.0  ;;  %v15275_v3 = vpop.eup %14083 }
 0x455   :  { %3375 = vadd.xlane.f32.xlu0 %v3374_v61  ;;  %3396 = vadd.xlane.f32.xlu1 %v3395_v45  ;;  %v3380_v1 = vsel %vm3175_vm3, %v15275_v3, 0.0  ;;  %v15279_v56 = vpop.eup %14085 }
 0x456   :  { %v3386_v16 = vsel %vm3175_vm3, %v15279_v56, 0.0 }
 0x459   :  { %3381 = vadd.xlane.f32.xlu0 %v3380_v1 }
 0x45c   :  { %v15283_v53 = vpop.eup %14087 }
 0x45d   :  { %3387 = vadd.xlane.f32.xlu0 %v3386_v16  ;;  %v3392_v6 = vsel %vm3175_vm3, %v15283_v53, 0.0 }
 0x461   :  { %3393 = vadd.xlane.f32.xlu0 %v3392_v6 }
 0x464   :  { %v3211_v11 = vpop.xlane.xlu1 %3210 }
 0x465   :  { %v3283_v27 = vsub.f32 %v15109_v7, %v3211_v11 }
 0x467   :  { %v3326_v19 = vmul.f32 1.442695, %v3283_v27 }
 0x468   :  { %v3217_v35 = vpop.xlane.xlu1 %3216 }
 0x469   :  { %14089 = vpow2.f32 %v3326_v19  ;;  %v3285_v29 = vsub.f32 %v15115_v12, %v3217_v35  ;;  %v3208_v26 = vpop.xlane.xlu0 %3207 }
 0x46a   :  { %v3282_v33 = vsub.f32 %v15117_v15, %v3208_v26 }
 0x46b   :  { %v3330_v52 = vmul.f32 1.442695, %v3285_v29 }
 0x46c   :  { %v3324_v39 = vmul.f32 1.442695, %v3282_v33 }
 0x46d   :  { %14091 = vpow2.f32 %v3330_v52 }
 0x46e   :  { %14093 = vpow2.f32 %v3324_v39 }
 0x470   :  { %v3223_v61 = vpop.xlane.xlu1 %3222 }
 0x471   :  { %v3287_v45 = vsub.f32 %v15125_v22, %v3223_v61 }
 0x473   :  { %v15291_v1 = vpop.eup %14089  ;;  %v3334_v16 = vmul.f32 1.442695, %v3287_v45 }
 0x474   :  { %v3229_v6 = vpop.xlane.xlu1 %3228  ;;  %v3401_v7 = vsel %vm3175_vm3, %v15291_v1, 0.0 }
 0x475   :  { %14095 = vpow2.f32 %v3334_v16  ;;  %v3289_v12 = vsub.f32 %v15131_v28, %v3229_v6  ;;  %3402 = vadd.xlane.f32.xlu1 %v3401_v7 }
 0x477   :  { %v15296_v11 = vpop.eup %14091  ;;  %v3338_v15 = vmul.f32 1.442695, %v3289_v12 }
 0x478   :  { %v15298_v27 = vpop.eup %14093  ;;  %v3235_v19 = vpop.xlane.xlu1 %3234  ;;  %v3407_v22 = vsel %vm3175_vm3, %v15296_v11, 0.0 }
 0x479   :  { %14097 = vpow2.f32 %v3338_v15  ;;  %v3214_v35 = vpop.xlane.xlu0 %3213  ;;  %v3291_v29 = vsub.f32 %v15139_v43, %v3235_v19  ;;  %3408 = vadd.xlane.f32.xlu1 %v3407_v22  ;;  %v3398_v26 = vsel %vm3175_vm3, %v15298_v27, 0.0 }
 0x47a   :  { %v3284_v28 = vsub.f32 %v15141_v47, %v3214_v35  ;;  %3399 = vadd.xlane.f32.xlu0 %v3398_v26 }
 0x47b   :  { %v3342_v33 = vmul.f32 1.442695, %v3291_v29 }
 0x47c   :  { %v3328_v52 = vmul.f32 1.442695, %v3284_v28  ;;  %v3241_v39 = vpop.xlane.xlu1 %3240 }
 0x47d   :  { %14099 = vpow2.f32 %v3342_v33  ;;  %v3293_v61 = vsub.f32 %v15149_v55, %v3241_v39 }
 0x47e   :  { %14101 = vpow2.f32 %v3328_v52 }
 0x47f   :  { %v15307_v45 = vpop.eup %14095  ;;  %v3346_v16 = vmul.f32 1.442695, %v3293_v61 }
 0x480   :  { %v3413_v43 = vsel %vm3175_vm3, %v15307_v45, 0.0  ;;  %v3247_v15 = vpop.xlane.xlu1 %3246 }
 0x481   :  { %14103 = vpow2.f32 %v3346_v16  ;;  %3414 = vadd.xlane.f32.xlu1 %v3413_v43 }
 0x483   :  { %v15311_v6 = vpop.eup %14097 }
 0x484   :  { %v3419_v47 = vsel %vm3175_vm3, %v15311_v6, 0.0  ;;  %v3253_v39 = vpop.xlane.xlu1 %3252 }
 0x485   :  { %3420 = vadd.xlane.f32.xlu1 %v3419_v47 }
 0x487   :  { %v15315_v7 = vpop.eup %14099 }
 0x488   :  { %v15317_v12 = vpop.eup %14101  ;;  %v3425_v55 = vsel %vm3175_vm3, %v15315_v7, 0.0 }
 0x489   :  { %v3220_v19 = vpop.xlane.xlu0 %3219  ;;  %v3404_v22 = vsel %vm3175_vm3, %v15317_v12, 0.0  ;;  %3426 = vadd.xlane.f32.xlu1 %v3425_v55  ;;  %v3259_v55 = vpop.xlane.xlu1 %3258 }
 0x48a   :  { %v3286_v35 = vsub.f32 %v15173_v23, %v3220_v19  ;;  %3405 = vadd.xlane.f32.xlu0 %v3404_v22  ;;  %v3295_v23 = vsub.f32 %v15155_v62, %v3247_v15 }
 0x48b   :  { %v15324_v29 = vpop.eup %14103 }
 0x48c   :  { %v3332_v26 = vmul.f32 1.442695, %v3286_v35  ;;  %v3431_v28 = vsel %vm3175_vm3, %v15324_v29, 0.0 }
 0x48d   :  { %v3226_v33 = vpop.xlane.xlu0 %3225  ;;  %3432 = vadd.xlane.f32.xlu1 %v3431_v28  ;;  %v3350_v28 = vmul.f32 1.442695, %v3295_v23  ;;  %v3265_v62 = vpop.xlane.xlu1 %3264 }
 0x48e   :  { %14105 = vpow2.f32 %v3332_v26  ;;  %v3288_v52 = vsub.f32 %v15183_v50, %v3226_v33  ;;  %v3297_v26 = vsub.f32 %v15163_v8, %v3253_v39 }
 0x490   :  { %v3336_v61 = vmul.f32 1.442695, %v3288_v52 }
 0x491   :  { %v3232_v16 = vpop.xlane.xlu0 %3231 }
 0x492   :  { %14107 = vpow2.f32 %v3336_v61  ;;  %v3290_v43 = vsub.f32 %v15193_v10, %v3232_v16  ;;  %v3354_v61 = vmul.f32 1.442695, %v3297_v26 }
 0x494   :  { %v3340_v47 = vmul.f32 1.442695, %v3290_v43 }
 0x495   :  { %v3238_v19 = vpop.xlane.xlu0 %3237 }
 0x496   :  { %14109 = vpow2.f32 %v3340_v47  ;;  %v3292_v22 = vsub.f32 %v15201_v41, %v3238_v19  ;;  %v3299_v41 = vsub.f32 %v15169_v17, %v3259_v55  ;;  %v3301_v47 = vsub.f32 %v15179_v42, %v3265_v62 }
 0x498   :  { %v15332_v35 = vpop.eup %14105  ;;  %v3344_v50 = vmul.f32 1.442695, %v3292_v22  ;;  %v3271_v22 = vpop.xlane.xlu1 %3270 }
 0x499   :  { %v3244_v33 = vpop.xlane.xlu0 %3243  ;;  %v3410_v52 = vsel %vm3175_vm3, %v15332_v35, 0.0 }
 0x49a   :  { %14111 = vpow2.f32 %v3344_v50  ;;  %v3294_v10 = vsub.f32 %v15208_v59, %v3244_v33  ;;  %3411 = vadd.xlane.f32.xlu0 %v3410_v52  ;;  %v3358_v59 = vmul.f32 1.442695, %v3299_v41  ;;  %v3303_v50 = vsub.f32 %v15191_v2, %v3271_v22 }
 0x49b   :  { %14113 = vpow2.f32 %v3350_v28 }
 0x49c   :  { %v15338_v15 = vpop.eup %14107  ;;  %v3348_v16 = vmul.f32 1.442695, %v3294_v10 }
 0x49d   :  { %v3250_v43 = vpop.xlane.xlu0 %3249  ;;  %v3416_v8 = vsel %vm3175_vm3, %v15338_v15, 0.0 }
 0x49e   :  { %14115 = vpow2.f32 %v3348_v16  ;;  %v3296_v39 = vsub.f32 %v15212_v14, %v3250_v43  ;;  %3417 = vadd.xlane.f32.xlu0 %v3416_v8  ;;  %v3362_v14 = vmul.f32 1.442695, %v3301_v47 }
 0x49f   :  { %14117 = vpow2.f32 %v3354_v61 }
 0x4a0   :  { %v15344_v23 = vpop.eup %14109  ;;  %v3352_v19 = vmul.f32 1.442695, %v3296_v39 }
 0x4a1   :  { %v3256_v28 = vpop.xlane.xlu0 %3255  ;;  %v3422_v17 = vsel %vm3175_vm3, %v15344_v23, 0.0 }
 0x4a2   :  { %14119 = vpow2.f32 %v3352_v19  ;;  %v3298_v55 = vsub.f32 %v15218_v36, %v3256_v28  ;;  %3423 = vadd.xlane.f32.xlu0 %v3422_v17  ;;  %v3366_v36 = vmul.f32 1.442695, %v3303_v50 }
 0x4a3   :  { %14121 = vpow2.f32 %v3358_v59 }
 0x4a4   :  { %v15350_v26 = vpop.eup %14111  ;;  %v3356_v33 = vmul.f32 1.442695, %v3298_v55 }
 0x4a5   :  { %v3262_v52 = vpop.xlane.xlu0 %3261  ;;  %v3428_v42 = vsel %vm3175_vm3, %v15350_v26, 0.0  ;;  %v15355_v10 = vpop.eup %14113 }
 0x4a6   :  { %14123 = vpow2.f32 %v3356_v33  ;;  %v3300_v62 = vsub.f32 %v15226_v63, %v3262_v52  ;;  %3429 = vadd.xlane.f32.xlu0 %v3428_v42  ;;  %v3437_v2 = vsel %vm3175_vm3, %v15355_v10, 0.0 }
 0x4a7   :  { %14125 = vpow2.f32 %v3362_v14 }
 0x4a8   :  { %v15358_v61 = vpop.eup %14115  ;;  %v3360_v41 = vmul.f32 1.442695, %v3300_v62 }
 0x4a9   :  { %v3370_v16 = vpop.xlane.xlu0 %3369  ;;  %v3434_v43 = vsel %vm3175_vm3, %v15358_v61, 0.0  ;;  %v15364_v8 = vpop.eup %14117 }
 0x4aa   :  { %14127 = vpow2.f32 %v3360_v41  ;;  %3438 = vadd.xlane.f32.xlu0 %v3437_v2  ;;  %3435 = vadd.xlane.f32.xlu1 %v3434_v43  ;;  %v3443_v59 = vsel %vm3175_vm3, %v15364_v8, 0.0 }
 0x4ab   :  { %14129 = vrcp.f32 %v3370_v16  ;;  %v16874_v16 = vmov 0.0  }
 0x4ac   :  { %v15366_v63 = vpop.eup %14119  ;;  %14131 = vpow2.f32 %v3366_v36 }
 0x4ad   :  { %v3268_v39 = vpop.xlane.xlu0 %3267  ;;  %v3440_v47 = vsel %vm3175_vm3, %v15366_v63, 0.0  ;;  %v15372_v19 = vpop.eup %14121 }
 0x4ae   :  { %v3302_v22 = vsub.f32 %v15234_v48, %v3268_v39  ;;  %3444 = vadd.xlane.f32.xlu0 %v3443_v59  ;;  %3441 = vadd.xlane.f32.xlu1 %v3440_v47  ;;  %v3449_v55 = vsel %vm3175_vm3, %v15372_v19, 0.0 }
 0x4b0   :  { %v15375_v28 = vpop.eup %14123  ;;  %v3364_v17 = vmul.f32 1.442695, %v3302_v22 }
 0x4b1   :  { %v3446_v14 = vsel %vm3175_vm3, %v15375_v28, 0.0  ;;  %v15381_v50 = vpop.eup %14125 }
 0x4b2   :  { %14133 = vpow2.f32 %v3364_v17  ;;  %3450 = vadd.xlane.f32.xlu0 %v3449_v55  ;;  %3447 = vadd.xlane.f32.xlu1 %v3446_v14  ;;  %v3455_v48 = vsel %vm3175_vm3, %v15381_v50, 0.0 }
 0x4b4   :  { %v15383_v33 = vpop.eup %14127 }
 0x4b5   :  { %v14130_v52 = vpop.eup %14129  ;;  %v3452_v42 = vsel %vm3175_vm3, %v15383_v33, 0.0 }
 0x4b6   :  { %v15389_v62 = vpop.eup %14131  ;;  %3456 = vadd.xlane.f32.xlu0 %v3455_v48  ;;  %3453 = vadd.xlane.f32.xlu1 %v3452_v42  ;;  %v3496_v36 = vmul.f32 %v14130_v52, %v15230_v25  ;;  %v15403_v25 = vpop.permute.xlu1 %758 }
 0x4b7   :  { %v3461_v41 = vsel %vm3175_vm3, %v15389_v62, 0.0 }
 0x4b8   :  { %13372 = vmatmul.mubr.msk.f32.vlgmr.msra.gmra.mrb[44].mxu0 %vm3175_vm3, %v3496_v36 }
 0x4b9   :  { %13380 = vmatpush3.msra.mxu0 %v14874_v31  ;;  %13381 = vmatprep.mubr.msk.f32.mxu0 %vm14428_vm1, %v16874_v16 }
 0x4ba   :  { %3462 = vadd.xlane.f32.xlu0 %v3461_v41  ;;  %13389 = vmatprep.subr.mxu0 %v16874_v16 }
 0x4bc   :  { %v15399_v2 = vpop.eup %14133 }
 0x4bd   :  { %v3458_v43 = vsel %vm3175_vm3, %v15399_v2, 0.0 }
 0x4be   :  { %3459 = vadd.xlane.f32.xlu1 %v3458_v43 }
 0x4c5   :  { %v3373_v39 = vpop.xlane.xlu1 %3372 }
 0x4c6   :  { %14135 = vrcp.f32 %v3373_v39 }
 0x4c9   :  { %v3379_v31 = vpop.xlane.xlu1 %3378 }
 0x4ca   :  { %14137 = vrcp.f32 %v3379_v31 }
 0x4cd   :  { %v3385_v59 = vpop.xlane.xlu1 %3384 }
 0x4ce   :  { %14139 = vrcp.f32 %v3385_v59 }
 0x4cf   :  { %762 = vrot.lane.b32.xlu1 %v14904_v34, %s14431_s20 }
 0x4d0   :  { %v14136_v47 = vpop.eup %14135  ;;  %764 = vrot.lane.b32.xlu0 %v14896_v38, %s14431_s20 }
 0x4d1   :  { %v3391_v22 = vpop.xlane.xlu1 %3390  ;;  %v3497_v17 = vmul.f32 %v14136_v47, %v15244_v0 }
 0x4d2   :  { %14141 = vrcp.f32 %v3391_v22 }
 0x4d3   :  { %13377 = vmatmul.mubr.msk.f32.vlgmr.msra.gmra.mrb[44].mxu1 %vm3175_vm3, %v3497_v17 }
 0x4d4   :  { %v14138_v55 = vpop.eup %14137  ;;  %13385 = vmatpush3.msra.mxu1 %v14867_v30  ;;  %13386 = vmatprep.mubr.msk.f32.mxu1 %vm14428_vm1, %v16874_v16 }
 0x4d5   :  { %13394 = vmatprep.subr.mxu1 %v16874_v16  ;;  %v3499_v14 = vmul.f32 %v14138_v55, %v15250_v46 }
 0x4d7   :  { %13387 = vmatmul.mubr.msk.f32.vlgmr.msra.gmra.mrb[46].mxu1 %vm3175_vm3, %v3499_v14 }
 0x4d8   :  { %v14140_v52 = vpop.eup %14139  ;;  %13395 = vmatpush3.msra.mxu1 %v14884_v32  ;;  %13396 = vmatprep.mubr.msk.f32.mxu1 %vm14428_vm1, %v16874_v16  ;;  %v15428_v32 = vpop.permute.xlu0 %760 }
 0x4d9   :  { %13404 = vmatprep.subr.mxu1 %v16874_v16  ;;  %v3501_v0 = vmul.f32 %v14140_v52, %v15254_v9 }
 0x4db   :  { %13397 = vmatmul.mubr.msk.f32.vlgmr.msra.gmra.mrb[48].mxu1 %vm3175_vm3, %v3501_v0 }
 0x4dc   :  { %v14142_v30 = vpop.eup %14141  ;;  %13405 = vmatpush3.msra.mxu1 %v14896_v38  ;;  %13406 = vmatprep.mubr.msk.f32.mxu1 %vm14428_vm1, %v16874_v16 }
 0x4dd   :  { %13414 = vmatprep.subr.mxu1 %v16874_v16  ;;  %v3503_v46 = vmul.f32 %v14142_v30, %v15259_v13 }
 0x4df   :  { %13407 = vmatmul.mubr.msk.f32.vlgmr.msra.gmra.mrb[50].mxu1 %vm3175_vm3, %v3503_v46 }
 0x4e0   :  { %13415 = vmatpush3.msra.mxu1 %v15105_v4  ;;  %13416 = vmatprep.mubr.msk.f32.mxu1 %vm14428_vm1, %v16874_v16 }
 0x4e1   :  { %13424 = vmatprep.subr.mxu1 %v16874_v16 }
 0x4e2   :  { %v3376_v9 = vpop.xlane.xlu0 %3375  ;;  %v3397_v38 = vpop.xlane.xlu1 %3396 }
 0x4e3   :  { %14143 = vrcp.f32 %v3376_v9  ;;  %v16875_v9 = vld [vmem:[#allocation15_spill] sm:$0xff] }
 0x4e4   :  { %14145 = vrcp.f32 %v3397_v38 }
 0x4e6   :  { %v3382_v48 = vpop.xlane.xlu0 %3381 }
 0x4e7   :  { %14147 = vrcp.f32 %v3382_v48 }
 0x4ea   :  { %v3388_v42 = vpop.xlane.xlu0 %3387 }
 0x4eb   :  { %14149 = vrcp.f32 %v3388_v42  ;;  %v16876_v42 = vld [vmem:[#allocation19_spill] sm:$0xff] }
 0x4ed   :  { %v14144_v13 = vpop.eup %14143 }
 0x4ee   :  { %v14146_v36 = vpop.eup %14145  ;;  %v3394_v41 = vpop.xlane.xlu0 %3393  ;;  %v3498_v43 = vmul.f32 %v14144_v13, %v15267_v57 }
 0x4ef   :  { %14151 = vrcp.f32 %v3394_v41  ;;  %v3505_v4 = vmul.f32 %v14146_v36, %v15269_v40 }
 0x4f0   :  { %13382 = vmatmul.mubr.msk.f32.vlgmr.msra.gmra.mrb[46].mxu0 %vm3175_vm3, %v3498_v43  ;;  %v16877_v43 = vld [vmem:[#allocation16_spill] sm:$0xff] }
 0x4f1   :  { %v14148_v39 = vpop.eup %14147  ;;  %13390 = vmatpush3.msra.mxu0 %v14890_v37  ;;  %13417 = vmatmul.mubr.msk.f32.vlgmr.msra.gmra.mrb[52].mxu1 %vm3175_vm3, %v3505_v4 }
 0x4f2   :  { %13425 = vmatpush3.msra.mxu1 %v15121_v18  ;;  %13391 = vmatprep.mubr.msk.f32.mxu0 %vm14428_vm1, %v16874_v16  ;;  %v3500_v31 = vmul.f32 %v14148_v39, %v15275_v3 }
 0x4f3   :  { %13399 = vmatprep.subr.mxu0 %v16874_v16  ;;  %13426 = vmatprep.mubr.msk.f32.mxu1 %vm14428_vm1, %v16874_v16 }
 0x4f4   :  { %13392 = vmatmul.mubr.msk.f32.vlgmr.msra.gmra.mrb[48].mxu0 %vm3175_vm3, %v3500_v31  ;;  %13434 = vmatprep.subr.mxu1 %v16874_v16 }
 0x4f5   :  { %v14150_v57 = vpop.eup %14149  ;;  %13400 = vmatpush3.msra.mxu0 %v14904_v34  ;;  %13401 = vmatprep.mubr.msk.f32.mxu0 %vm14428_vm1, %v16874_v16 }
 0x4f6   :  { %13409 = vmatprep.subr.mxu0 %v16874_v16  ;;  %v3502_v37 = vmul.f32 %v14150_v57, %v15279_v56  ;;  %v16878_v57 = vld [vmem:[#allocation18_spill] sm:$0xff] }
 0x4f8   :  { %13402 = vmatmul.mubr.msk.f32.vlgmr.msra.gmra.mrb[50].mxu0 %vm3175_vm3, %v3502_v37 }
 0x4f9   :  { %v14152_v18 = vpop.eup %14151  ;;  %13410 = vmatpush3.msra.mxu0 %v15145_v51  ;;  %13411 = vmatprep.mubr.msk.f32.mxu0 %vm14428_vm1, %v16874_v16 }
 0x4fa   :  { %13419 = vmatprep.subr.mxu0 %v16874_v16  ;;  %v3504_v40 = vmul.f32 %v14152_v18, %v15283_v53 }
 0x4fc   :  { %13412 = vmatmul.mubr.msk.f32.vlgmr.msra.gmra.mrb[52].mxu0 %vm3175_vm3, %v3504_v40 }
 0x4fd   :  { %13420 = vmatpush3.msra.mxu0 %v15181_v49  ;;  %13421 = vmatprep.mubr.msk.f32.mxu0 %vm14428_vm1, %v16874_v16 }
 0x4fe   :  { %13429 = vmatprep.subr.mxu0 %v16874_v16 }
 0x502   :  { %v3403_v34 = vpop.xlane.xlu1 %3402 }
 0x503   :  { %14153 = vrcp.f32 %v3403_v34 }
 0x506   :  { %v3409_v3 = vpop.xlane.xlu1 %3408 }
 0x507   :  { %14155 = vrcp.f32 %v3409_v3  ;;  %v3400_v51 = vpop.xlane.xlu0 %3399 }
 0x508   :  { %14157 = vrcp.f32 %v3400_v51  ;;  %v16879_v51 = vld [vmem:[#allocation13_spill] sm:$0xff] }
 0x50d   :  { %v14154_v56 = vpop.eup %14153 }
 0x50e   :  { %v3415_v59 = vpop.xlane.xlu1 %3414  ;;  %v3507_v47 = vmul.f32 %v14154_v56, %v15291_v1 }
 0x50f   :  { %14159 = vrcp.f32 %v3415_v59  ;;  %v16880_v59 = vld [vmem:[#allocation12_spill] sm:$0xff] }
 0x510   :  { %13427 = vmatmul.mubr.msk.f32.vlgmr.msra.gmra.mrb[54].mxu1 %vm3175_vm3, %v3507_v47 }
 0x511   :  { %v14156_v53 = vpop.eup %14155  ;;  %13435 = vmatpush3.msra.mxu1 %v15151_v58  ;;  %13436 = vmatprep.mubr.msk.f32.mxu1 %vm14428_vm1, %v16874_v16 }
 0x512   :  { %v14158_v49 = vpop.eup %14157  ;;  %13444 = vmatprep.subr.mxu1 %v16874_v16  ;;  %v3421_v22 = vpop.xlane.xlu1 %3420  ;;  %v3509_v17 = vmul.f32 %v14156_v53, %v15296_v11 }
 0x513   :  { %14161 = vrcp.f32 %v3421_v22  ;;  %v3506_v55 = vmul.f32 %v14158_v49, %v15298_v27  ;;  %v16881_v49 = vld [vmem:[#allocation17_spill] sm:$0xff] }
 0x514   :  { %13437 = vmatmul.mubr.msk.f32.vlgmr.msra.gmra.mrb[56].mxu1 %vm3175_vm3, %v3509_v17  ;;  %v16882_v17 = vld [vmem:[#allocation14_spill] sm:$0xff] }
 0x515   :  { %13445 = vmatpush3.msra.mxu1 %v15171_v20  ;;  %13422 = vmatmul.mubr.msk.f32.vlgmr.msra.gmra.mrb[54].mxu0 %vm3175_vm3, %v3506_v55 }
 0x516   :  { %13430 = vmatpush3.msra.mxu0 %v15214_v21  ;;  %v3427_v58 = vpop.xlane.xlu1 %3426  ;;  %13446 = vmatprep.mubr.msk.f32.mxu1 %vm14428_vm1, %v16874_v16 }
 0x517   :  { %v3406_v1 = vpop.xlane.xlu0 %3405  ;;  %14163 = vrcp.f32 %v3427_v58  ;;  %13454 = vmatprep.subr.mxu1 %v16874_v16  ;;  %13431 = vmatprep.mubr.msk.f32.mxu0 %vm14428_vm1, %v16874_v16 }
 0x518   :  { %14165 = vrcp.f32 %v3406_v1  ;;  %13439 = vmatprep.subr.mxu0 %v16874_v16 }
 0x519   :  { %v14160_v11 = vpop.eup %14159 }
 0x51a   :  { %v3433_v20 = vpop.xlane.xlu1 %3432  ;;  %v3511_v27 = vmul.f32 %v14160_v11, %v15307_v45 }
 0x51b   :  { %14167 = vrcp.f32 %v3433_v20 }
 0x51c   :  { %13447 = vmatmul.mubr.msk.f32.vlgmr.msra.gmra.mrb[58].mxu1 %vm3175_vm3, %v3511_v27 }
 0x51d   :  { %v14162_v21 = vpop.eup %14161  ;;  %13455 = vmatpush3.msra.mxu1 %v15107_v5  ;;  %13456 = vmatprep.mubr.msk.f32.mxu1 %vm14428_vm1, %v16874_v16 }
 0x51e   :  { %13464 = vmatprep.subr.mxu1 %v16874_v16  ;;  %v3513_v14 = vmul.f32 %v14162_v21, %v15311_v6 }
 0x520   :  { %13457 = vmatmul.mubr.msk.f32.vlgmr.msra.gmra.mrb[60].mxu1 %vm3175_vm3, %v3513_v14 }
 0x521   :  { %v14164_v52 = vpop.eup %14163  ;;  %13465 = vmatpush3.msra.mxu1 %v15127_v24  ;;  %13466 = vmatprep.mubr.msk.f32.mxu1 %vm14428_vm1, %v16874_v16 }
 0x522   :  { %v14166_v45 = vpop.eup %14165  ;;  %13474 = vmatprep.subr.mxu1 %v16874_v16  ;;  %v3515_v5 = vmul.f32 %v14164_v52, %v15315_v7 }
 0x523   :  { %v3508_v0 = vmul.f32 %v14166_v45, %v15317_v12 }
 0x524   :  { %13467 = vmatmul.mubr.msk.f32.vlgmr.msra.gmra.mrb[62].mxu1 %vm3175_vm3, %v3515_v5 }
 0x525   :  { %v14168_v30 = vpop.eup %14167  ;;  %13432 = vmatmul.mubr.msk.f32.vlgmr.msra.gmra.mrb[56].mxu0 %vm3175_vm3, %v3508_v0  ;;  %13475 = vmatpush3.msra.mxu1 %v15206_v54 }
 0x526   :  { %13440 = vmatpush3.msra.mxu0 %v15232_v44  ;;  %13476 = vmatprep.mubr.msk.f32.mxu1 %vm14428_vm1, %v16874_v16  ;;  %v3517_v24 = vmul.f32 %v14168_v30, %v15324_v29 }
 0x527   :  { %v3412_v6 = vpop.xlane.xlu0 %3411  ;;  %13484 = vmatprep.subr.mxu1 %v16874_v16  ;;  %13441 = vmatprep.mubr.msk.f32.mxu0 %vm14428_vm1, %v16874_v16 }
 0x528   :  { %14169 = vrcp.f32 %v3412_v6  ;;  %13477 = vmatmul.mubr.msk.f32.vlgmr.msra.gmra.mrb[64].mxu1 %vm3175_vm3, %v3517_v24  ;;  %13449 = vmatprep.subr.mxu0 %v16874_v16 }
 0x529   :  { %13485 = vmatpush3.msra.mxu1 %v15224_v60  ;;  %13486 = vmatprep.mubr.msk.f32.mxu1 %vm14428_vm1, %v16874_v16 }
 0x52a   :  { %13494 = vmatprep.subr.mxu1 %v16874_v16 }
 0x52b   :  { %v3418_v54 = vpop.xlane.xlu0 %3417 }
 0x52c   :  { %14171 = vrcp.f32 %v3418_v54 }
 0x52f   :  { %v3424_v44 = vpop.xlane.xlu0 %3423 }
 0x530   :  { %14173 = vrcp.f32 %v3424_v44 }
 0x532   :  { %v14170_v7 = vpop.eup %14169 }
 0x533   :  { %v3430_v12 = vpop.xlane.xlu0 %3429  ;;  %v3510_v29 = vmul.f32 %v14170_v7, %v15332_v35 }
 0x534   :  { %14175 = vrcp.f32 %v3430_v12 }
 0x535   :  { %13442 = vmatmul.mubr.msk.f32.vlgmr.msra.gmra.mrb[58].mxu0 %vm3175_vm3, %v3510_v29 }
 0x536   :  { %v14172_v46 = vpop.eup %14171  ;;  %13450 = vmatpush3.msra.mxu0 %v16875_v9  ;;  %13451 = vmatprep.mubr.msk.f32.mxu0 %vm14428_vm1, %v16874_v16 }
 0x537   :  { %v3439_v60 = vpop.xlane.xlu0 %3438  ;;  %v3436_v38 = vpop.xlane.xlu1 %3435  ;;  %13459 = vmatprep.subr.mxu0 %v16874_v16  ;;  %v3512_v48 = vmul.f32 %v14172_v46, %v15338_v15 }
 0x538   :  { %14177 = vrcp.f32 %v3439_v60 }
 0x539   :  { %14179 = vrcp.f32 %v3436_v38  ;;  %13452 = vmatmul.mubr.msk.f32.vlgmr.msra.gmra.mrb[60].mxu0 %vm3175_vm3, %v3512_v48 }
 0x53a   :  { %v14174_v35 = vpop.eup %14173  ;;  %13460 = vmatpush3.msra.mxu0 %v16876_v42  ;;  %13461 = vmatprep.mubr.msk.f32.mxu0 %vm14428_vm1, %v16874_v16 }
 0x53b   :  { %v3445_v13 = vpop.xlane.xlu0 %3444  ;;  %v3442_v36 = vpop.xlane.xlu1 %3441  ;;  %13469 = vmatprep.subr.mxu0 %v16874_v16  ;;  %v3514_v41 = vmul.f32 %v14174_v35, %v15344_v23 }
 0x53c   :  { %14181 = vrcp.f32 %v3445_v13 }
 0x53d   :  { %14183 = vrcp.f32 %v3442_v36  ;;  %13462 = vmatmul.mubr.msk.f32.vlgmr.msra.gmra.mrb[62].mxu0 %vm3175_vm3, %v3514_v41 }
 0x53e   :  { %v14176_v15 = vpop.eup %14175  ;;  %13470 = vmatpush3.msra.mxu0 %v16877_v43  ;;  %13471 = vmatprep.mubr.msk.f32.mxu0 %vm14428_vm1, %v16874_v16 }
 0x53f   :  { %v3451_v4 = vpop.xlane.xlu0 %3450  ;;  %v3448_v39 = vpop.xlane.xlu1 %3447  ;;  %13479 = vmatprep.subr.mxu0 %v16874_v16  ;;  %v3516_v31 = vmul.f32 %v14176_v15, %v15350_v26 }
 0x540   :  { %14185 = vrcp.f32 %v3451_v4 }
 0x541   :  { %14187 = vrcp.f32 %v3448_v39  ;;  %13472 = vmatmul.mubr.msk.f32.vlgmr.msra.gmra.mrb[64].mxu0 %vm3175_vm3, %v3516_v31 }
 0x542   :  { %v14178_v23 = vpop.eup %14177  ;;  %13480 = vmatpush3.msra.mxu0 %v16878_v57  ;;  %13481 = vmatprep.mubr.msk.f32.mxu0 %vm14428_vm1, %v16874_v16 }
 0x543   :  { %v14180_v37 = vpop.eup %14179  ;;  %v3457_v18 = vpop.xlane.xlu0 %3456  ;;  %13489 = vmatprep.subr.mxu0 %v16874_v16  ;;  %v3519_v34 = vmul.f32 %v14178_v23, %v15355_v10 }
 0x544   :  { %v3454_v40 = vpop.xlane.xlu1 %3453  ;;  %14189 = vrcp.f32 %v3457_v18  ;;  %v3518_v26 = vmul.f32 %v14180_v37, %v15358_v61 }
 0x545   :  { %14191 = vrcp.f32 %v3454_v40  ;;  %13487 = vmatmul.mubr.msk.f32.vlgmr.msra.gmra.mrb[66].mxu1 %vm3175_vm3, %v3519_v34 }
 0x546   :  { %v14182_v3 = vpop.eup %14181  ;;  %13482 = vmatmul.mubr.msk.f32.vlgmr.msra.gmra.mrb[66].mxu0 %vm3175_vm3, %v3518_v26  ;;  %13495 = vmatpush3.msra.mxu1 %v16879_v51  ;;  %v5985_v51 = vld [vmem:[#allocation7] sm:$0xff] }
 0x547   :  { %v14184_v56 = vpop.eup %14183  ;;  %13490 = vmatpush3.msra.mxu0 %v16880_v59  ;;  %v3463_v47 = vpop.xlane.xlu0 %3462  ;;  %13491 = vmatprep.mubr.msk.f32.mxu0 %vm14428_vm1, %v16874_v16  ;;  %v3521_v10 = vmul.f32 %v14182_v3, %v15364_v8 }
 0x548   :  { %14193 = vrcp.f32 %v3463_v47  ;;  %13496 = vmatprep.mubr.msk.f32.mxu1 %vm14428_vm1, %v16874_v16  ;;  %13499 = vmatprep.subr.mxu0 %v16874_v16  ;;  %v3520_v61 = vmul.f32 %v14184_v56, %v15366_v63  ;;  %v5986_v56 = vld [vmem:[#allocation7 + $0x8] sm:$0xff] }
 0x549   :  { %13504 = vmatprep.subr.mxu1 %v16874_v16  ;;  %13497 = vmatmul.mubr.msk.f32.vlgmr.msra.gmra.mrb[68].mxu1 %vm3175_vm3, %v3521_v10  ;;  %v13991_v59 = vpack.c.bf16 %v5986_v56, %v5985_v51 }
 0x54a   :  { %v14186_v53 = vpop.eup %14185  ;;  %13492 = vmatmul.mubr.msk.f32.vlgmr.msra.gmra.mrb[68].mxu0 %vm3175_vm3, %v3520_v61  ;;  %13505 = vmatpush3.msra.mxu1 %v16881_v49 }
 0x54b   :  { %v14188_v22 = vpop.eup %14187  ;;  %13500 = vmatpush3.msra.mxu0 %v16882_v17  ;;  %v3460_v8 = vpop.xlane.xlu1 %3459  ;;  %13501 = vmatprep.mubr.msk.f32.mxu0 %vm14428_vm1, %v16874_v16  ;;  %v3523_v55 = vmul.f32 %v14186_v53, %v15372_v19 }
 0x54c   :  { %14195 = vrcp.f32 %v3460_v8  ;;  %13506 = vmatprep.mubr.msk.f32.mxu1 %vm14428_vm1, %v16874_v16  ;;  %13509 = vmatprep.subr.mxu0 %v16874_v16  ;;  %v3522_v63 = vmul.f32 %v14188_v22, %v15375_v28  ;;  %v765_v20 = vpop.permute.xlu0 %764 }
 0x54d   :  { %13514 = vmatprep.subr.mxu1 %v16874_v16  ;;  %13507 = vmatmul.mubr.msk.f32.vlgmr.msra.gmra.mrb[70].mxu1 %vm3175_vm3, %v3523_v55 }
 0x54e   :  { %v14190_v58 = vpop.eup %14189  ;;  %13502 = vmatmul.mubr.msk.f32.vlgmr.msra.gmra.mrb[70].mxu0 %vm3175_vm3, %v3522_v63  ;;  %13515 = vmatpush3.msra.mxu1 %v15428_v32 }
 0x54f   :  { %v14192_v1 = vpop.eup %14191  ;;  %13510 = vmatpush3.msra.mxu0 %v15403_v25  ;;  %13511 = vmatprep.mubr.msk.f32.mxu0 %vm14428_vm1, %v16874_v16  ;;  %v3525_v19 = vmul.f32 %v14190_v58, %v15381_v50  ;;  %v763_v11 = vpop.permute.xlu1 %762 }
 0x550   :  { %13516 = vmatprep.mubr.msk.f32.mxu1 %vm14428_vm1, %v16874_v16  ;;  %13519 = vmatprep.subr.mxu0 %v16874_v16  ;;  %v3524_v28 = vmul.f32 %v14192_v1, %v15383_v33 }
 0x551   :  { %13524 = vmatprep.subr.mxu1 %v16874_v16  ;;  %13517 = vmatmul.mubr.msk.f32.vlgmr.msra.gmra.mrb[72].mxu1 %vm3175_vm3, %v3525_v19 }
 0x552   :  { %v14194_v32 = vpop.eup %14193  ;;  %13512 = vmatmul.mubr.msk.f32.vlgmr.msra.gmra.mrb[72].mxu0 %vm3175_vm3, %v3524_v28  ;;  %13525 = vmatpush3.msra.mxu1 %v765_v20 }
 0x553   :  { %13520 = vmatpush3.msra.mxu0 %v763_v11  ;;  %13526 = vmatprep.mubr.msk.f32.mxu1 %vm14428_vm1, %v16874_v16  ;;  %v3527_v50 = vmul.f32 %v14194_v32, %v15389_v62 }
 0x554   :  { %13521 = vmatprep.mubr.msk.f32.mxu0 %vm14428_vm1, %v16874_v16  ;;  %13992 = vmatprep.subr.bf16.mxu1 %v13991_v59 }
 0x555   :  { %13527 = vmatmul.mubr.msk.f32.vlgmr.msra.gmra.mrb[74].mxu1 %vm3175_vm3, %v3527_v50 }
 0x556   :  { %v14196_v33 = vpop.eup %14195  ;;  %13994 = vmatpush3.bf16.msra.mxu1 %v13991_v59 }
 0x557   :  { %v3526_v25 = vmul.f32 %v14196_v33, %v15399_v2 }
 0x559   :  { %13522 = vmatmul.mubr.msk.f32.vlgmr.msra.gmra.mrb[74].mxu0 %vm3175_vm3, %v3526_v25 }
 0x58b   :  { %v15585_v27 = vpop.f32.mrb[44].mxu0 }
 0x58c   :  { %v13373_v21 = vpop.f32.mrb[45].mxu0 }
 0x5a6   :  { %v15587_v14 = vpop.f32.mrb[44].mxu1 }
 0x5a7   :  { %v13378_v52 = vpop.f32.mrb[45].mxu1 }
 0x5aa   :  { %v15589_v45 = vpop.f32.mrb[46].mxu1 }
 0x5ab   :  { %v13388_v5 = vpop.f32.mrb[47].mxu1 }
 0x5ae   :  { %v15591_v62 = vpop.f32.mrb[48].mxu1 }
 0x5af   :  { %v13398_v0 = vpop.f32.mrb[49].mxu1 }
 0x5b2   :  { %v15593_v30 = vpop.f32.mrb[50].mxu1 }
 0x5b3   :  { %v13408_v24 = vpop.f32.mrb[51].mxu1 }
 0x5c3   :  { %v15595_v6 = vpop.f32.mrb[46].mxu0 }
 0x5c4   :  { %v13383_v2 = vpop.f32.mrb[47].mxu0  ;;  %v4254_v54 = vpop.f32.mrb[52].mxu1 }
 0x5c5   :  { %5874 = vrot.lane.b32.xlu0 %v4254_v54, %s14432_s16  ;;  %v13418_v44 = vpop.f32.mrb[53].mxu1 }
 0x5c7   :  { %v15598_v7 = vpop.f32.mrb[48].mxu0 }
 0x5c8   :  { %v13393_v12 = vpop.f32.mrb[49].mxu0 }
 0x5cb   :  { %v15600_v29 = vpop.f32.mrb[50].mxu0 }
 0x5cc   :  { %v13403_v46 = vpop.f32.mrb[51].mxu0 }
 0x5cf   :  { %v4181_v9 = vpop.f32.mrb[52].mxu0 }
 0x5d0   :  { %v13413_v60 = vpop.f32.mrb[53].mxu0  ;;  %5872 = vrot.lane.b32.xlu1 %v4181_v9, %s14432_s16 }
 0x5e3   :  { %v4400_v38 = vpop.f32.mrb[54].mxu1 }
 0x5e4   :  { %5878 = vrot.lane.b32.xlu0 %v4400_v38, %s14432_s16  ;;  %v13428_v48 = vpop.f32.mrb[55].mxu1 }
 0x5e7   :  { %v4546_v35 = vpop.f32.mrb[56].mxu1 }
 0x5e8   :  { %v4327_v42 = vpop.f32.mrb[54].mxu0  ;;  %5882 = vrot.lane.b32.xlu0 %v4546_v35, %s14432_s16  ;;  %v13438_v13 = vpop.f32.mrb[57].mxu1 }
 0x5e9   :  { %v13423_v36 = vpop.f32.mrb[55].mxu0  ;;  %5876 = vrot.lane.b32.xlu1 %v4327_v42, %s14432_s16 }
 0x5ef   :  { %v4692_v41 = vpop.f32.mrb[58].mxu1 }
 0x5f0   :  { %5886 = vrot.lane.b32.xlu0 %v4692_v41, %s14432_s16  ;;  %v13448_v15 = vpop.f32.mrb[59].mxu1 }
 0x5f3   :  { %v4838_v43 = vpop.f32.mrb[60].mxu1 }
 0x5f4   :  { %5906 = vrot.lane.b32.xlu0 %v4838_v43, %s14424_s26  ;;  %v13458_v4 = vpop.f32.mrb[61].mxu1 }
 0x5f7   :  { %v4984_v39 = vpop.f32.mrb[62].mxu1 }
 0x5f8   :  { %v4473_v31 = vpop.f32.mrb[56].mxu0  ;;  %5910 = vrot.lane.b32.xlu0 %v4984_v39, %s14424_s26  ;;  %v13468_v23 = vpop.f32.mrb[63].mxu1 }
 0x5f9   :  { %v13433_v57 = vpop.f32.mrb[57].mxu0  ;;  %5880 = vrot.lane.b32.xlu1 %v4473_v31, %s14432_s16 }
 0x5fb   :  { %v5130_v37 = vpop.f32.mrb[64].mxu1 }
 0x5fc   :  { %5914 = vrot.lane.b32.xlu0 %v5130_v37, %s14424_s26  ;;  %v13478_v18 = vpop.f32.mrb[65].mxu1 }
 0x608   :  { %v4619_v40 = vpop.f32.mrb[58].mxu0 }
 0x609   :  { %v13443_v34 = vpop.f32.mrb[59].mxu0  ;;  %5884 = vrot.lane.b32.xlu1 %v4619_v40, %s14432_s16 }
 0x60c   :  { %v4765_v26 = vpop.f32.mrb[60].mxu0 }
 0x60d   :  { %v13453_v3 = vpop.f32.mrb[61].mxu0  ;;  %5904 = vrot.lane.b32.xlu1 %v4765_v26, %s14424_s26 }
 0x610   :  { %v4911_v47 = vpop.f32.mrb[62].mxu0 }
 0x611   :  { %v13463_v10 = vpop.f32.mrb[63].mxu0  ;;  %5908 = vrot.lane.b32.xlu1 %v4911_v47, %s14424_s26 }
 0x614   :  { %v5057_v61 = vpop.f32.mrb[64].mxu0 }
 0x615   :  { %v13473_v53 = vpop.f32.mrb[65].mxu0  ;;  %5912 = vrot.lane.b32.xlu1 %v5057_v61, %s14424_s26 }
 0x618   :  { %v5276_v49 = vpop.f32.mrb[66].mxu1 }
 0x619   :  { %v5203_v22 = vpop.f32.mrb[66].mxu0  ;;  %5918 = vrot.lane.b32.xlu0 %v5276_v49, %s14424_s26  ;;  %v13488_v17 = vpop.f32.mrb[67].mxu1 }
 0x61a   :  { %5916 = vrot.lane.b32.xlu1 %v5203_v22, %s14424_s26  ;;  %v13483_v8 = vpop.f32.mrb[67].mxu0 }
 0x61c   :  { %v5422_v55 = vpop.f32.mrb[68].mxu1 }
 0x61d   :  { %v5349_v63 = vpop.f32.mrb[68].mxu0  ;;  %5938 = vrot.lane.b32.xlu0 %v5422_v55, %s14433_s21  ;;  %v13498_v58 = vpop.f32.mrb[69].mxu1 }
 0x61e   :  { %5936 = vrot.lane.b32.xlu1 %v5349_v63, %s14433_s21  ;;  %v13493_v1 = vpop.f32.mrb[69].mxu0 }
 0x61f   :  { %v6123_v1 = vld [vmem:[#allocation2] sm:$0xff] }
 0x620   :  { %v5568_v19 = vpop.f32.mrb[70].mxu1 }
 0x621   :  { %v5495_v11 = vpop.f32.mrb[70].mxu0  ;;  %5942 = vrot.lane.b32.xlu0 %v5568_v19, %s14433_s21  ;;  %v13508_v28 = vpop.f32.mrb[71].mxu1 }
 0x622   :  { %5940 = vrot.lane.b32.xlu1 %v5495_v11, %s14433_s21  ;;  %v13503_v20 = vpop.f32.mrb[71].mxu0 }
 0x624   :  { %v5714_v32 = vpop.f32.mrb[72].mxu1 }
 0x625   :  { %v5641_v50 = vpop.f32.mrb[72].mxu0  ;;  %5946 = vrot.lane.b32.xlu0 %v5714_v32, %s14433_s21  ;;  %v13518_v33 = vpop.f32.mrb[73].mxu1 }
 0x626   :  { %5944 = vrot.lane.b32.xlu1 %v5641_v50, %s14433_s21  ;;  %v13513_v25 = vpop.f32.mrb[73].mxu0 }
 0x628   :  { %v5860_v21 = vpop.f32.mrb[74].mxu1 }
 0x629   :  { %5950 = vrot.lane.b32.xlu0 %v5860_v21, %s14433_s21  ;;  %v13528_v52 = vpop.f32.mrb[75].mxu1 }
 0x62c   :  { %v5787_v5 = vpop.f32.mrb[74].mxu0 }
 0x62d   :  { %5948 = vrot.lane.b32.xlu1 %v5787_v5, %s14433_s21  ;;  %v13523_v0 = vpop.f32.mrb[75].mxu0 }
 0x637   :  { %v5875_v24 = vpop.permute.xlu0 %5874 }
 0x638   :  { %v5961_v43 = vsel %vm774_vm2, %v15587_v14, %v5875_v24 }
 0x642   :  { %v5873_v54 = vpop.permute.xlu1 %5872 }
 0x643   :  { %v5960_v4 = vsel %vm774_vm2, %v15585_v27, %v5873_v54 }
 0x656   :  { %v5879_v2 = vpop.permute.xlu0 %5878 }
 0x657   :  { %v5963_v40 = vsel %vm774_vm2, %v15589_v45, %v5879_v2 }
 0x65a   :  { %v5883_v44 = vpop.permute.xlu0 %5882 }
 0x65b   :  { %v5877_v12 = vpop.permute.xlu1 %5876  ;;  %v5965_v45 = vsel %vm774_vm2, %v15591_v62, %v5883_v44 }
 0x65c   :  { %v5962_v14 = vsel %vm774_vm2, %v15595_v6, %v5877_v12 }
 0x662   :  { %v5887_v46 = vpop.permute.xlu0 %5886 }
 0x663   :  { %v5967_v22 = vsel %vm774_vm2, %v15593_v30, %v5887_v46  ;;  %v12626_v30 = vld [vmem:[%s16859_s11] ss:$0 sm:$0xff] }
 0x666   :  { %v5907_v60 = vpop.permute.xlu0 %5906 }
 0x667   :  { %v5969_v39 = vsel %vm3175_vm3, %v5961_v43, %v5907_v60  ;;  %v6124_v60 = vld [vmem:[#allocation2 + $0x8] sm:$0xff] }
 0x66a   :  { %v5911_v35 = vpop.permute.xlu0 %5910 }
 0x66b   :  { %v5881_v9 = vpop.permute.xlu1 %5880  ;;  %v5971_v27 = vsel %vm3175_vm3, %v5963_v40, %v5911_v35  ;;  %v6127_v35 = vld [vmem:[#allocation2 + $0x20] sm:$0xff] }
 0x66c   :  { %v5964_v6 = vsel %vm774_vm2, %v15598_v7, %v5881_v9 }
 0x66e   :  { %v5915_v13 = vpop.permute.xlu0 %5914 }
 0x66f   :  { %v5973_v59 = vsel %vm3175_vm3, %v5965_v45, %v5915_v13  ;;  %v6129_v13 = vld [vmem:[#allocation2 + $0x30] sm:$0xff] }
 0x67b   :  { %v5885_v38 = vpop.permute.xlu1 %5884 }
 0x67c   :  { %v5966_v62 = vsel %vm774_vm2, %v15600_v29, %v5885_v38  ;;  %v6125_v38 = vld [vmem:[#allocation2 + $0x10] sm:$0xff] }
 0x67f   :  { %v5905_v48 = vpop.permute.xlu1 %5904 }
 0x680   :  { %v5968_v23 = vsel %vm3175_vm3, %v5960_v4, %v5905_v48  ;;  %v6126_v48 = vld [vmem:[#allocation2 + $0x18] sm:$0xff] }
 0x683   :  { %v5909_v42 = vpop.permute.xlu1 %5908 }
 0x684   :  { %v5970_v26 = vsel %vm3175_vm3, %v5962_v14, %v5909_v42  ;;  %v6128_v42 = vld [vmem:[#allocation2 + $0x28] sm:$0xff] }
 0x687   :  { %v5913_v36 = vpop.permute.xlu1 %5912 }
 0x688   :  { %v5972_v10 = vsel %vm3175_vm3, %v5964_v6, %v5913_v36  ;;  %v6130_v36 = vld [vmem:[#allocation2 + $0x38] sm:$0xff] }
 0x68b   :  { %v5919_v41 = vpop.permute.xlu0 %5918 }
 0x68c   :  { %v5917_v15 = vpop.permute.xlu1 %5916  ;;  %v5975_v55 = vsel %vm3175_vm3, %v5967_v22, %v5919_v41 }
 0x68d   :  { %v5974_v17 = vsel %vm3175_vm3, %v5966_v62, %v5917_v15 }
 0x68f   :  { %v5939_v31 = vpop.permute.xlu0 %5938 }
 0x690   :  { %v5937_v57 = vpop.permute.xlu1 %5936  ;;  %v5978_v37 = vsel %vm5976_vm4, %v5969_v39, %v5939_v31 }
 0x691   :  { %v5977_v18 = vsel %vm5976_vm4, %v5968_v23, %v5937_v57 }
 0x692   :  { %13533 = vmatprep.mubr.msk.f32.mxu1 %vm97_vm0, %v5977_v18 }
 0x693   :  { %13534 = vmatmul.mubr.msk.f32.vlgmr.msra.gmra.mrb[76].mxu1 %vm97_vm0, %v5978_v37  ;;  %v5943_v34 = vpop.permute.xlu0 %5942 }
 0x694   :  { %v5941_v3 = vpop.permute.xlu1 %5940  ;;  %v5980_v51 = vsel %vm5976_vm4, %v5971_v27, %v5943_v34 }
 0x695   :  { %v5979_v56 = vsel %vm5976_vm4, %v5970_v26, %v5941_v3 }
 0x696   :  { %13536 = vmatprep.mubr.msk.f32.mxu1 %vm97_vm0, %v5979_v56 }
 0x697   :  { %13537 = vmatmul.mubr.msk.f32.gmra.mrb[78].mxu1 %vm97_vm0, %v5980_v51  ;;  %v5947_v47 = vpop.permute.xlu0 %5946 }
 0x698   :  { %v5945_v61 = vpop.permute.xlu1 %5944  ;;  %v5982_v53 = vsel %vm5976_vm4, %v5973_v59, %v5947_v47 }
 0x699   :  { %v5981_v49 = vsel %vm5976_vm4, %v5972_v10, %v5945_v61 }
 0x69a   :  { %13539 = vmatprep.mubr.msk.f32.mxu1 %vm97_vm0, %v5981_v49 }
 0x69b   :  { %13540 = vmatmul.mubr.msk.f32.gmra.mrb[80].mxu1 %vm97_vm0, %v5982_v53  ;;  %v5951_v7 = vpop.permute.xlu0 %5950 }
 0x69c   :  { %v5984_v58 = vsel %vm5976_vm4, %v5975_v55, %v5951_v7 }
 0x69f   :  { %v5949_v8 = vpop.permute.xlu1 %5948 }
 0x6a0   :  { %v5983_v63 = vsel %vm5976_vm4, %v5974_v17, %v5949_v8 }
 0x6a1   :  { %13542 = vmatprep.mubr.msk.f32.mxu1 %vm97_vm0, %v5983_v63 }
 0x6a2   :  { %13543 = vmatmul.mubr.msk.f32.gmra.mrb[82].mxu1 %vm97_vm0, %v5984_v58 }
 0x6a3   :  { %13561 = vmatprep.mubr.msk.f32.mxu1 %vm6131_vm5, %v6123_v1 }
 0x766   :  { %v13535_v29 = vpop.f32.mrb[76].mxu1 }
 0x767   :  { %v6090_v19 = vadd.f32 %v13535_v29, %v12626_v30  ;;  %v6084_v11 = vpop.f32.mrb[77].mxu1 }
 0x768   :  { %v6085_v28 = vadd.f32 %v12626_v30, %v6084_v11 }
 0x76a   :  { %v13995_v20 = vpack.c.bf16 %v6090_v19, %v6085_v28  ;;  %v13538_v32 = vpop.f32.mrb[78].mxu1 }
 0x76b   :  { %v6100_v50 = vadd.f32 %v13538_v32, %v12626_v30  ;;  %v6094_v33 = vpop.f32.mrb[79].mxu1 }
 0x76c   :  { %v6095_v25 = vadd.f32 %v12626_v30, %v6094_v33  ;;  %13996 = vmatprep.subr.bf16.mxu1 %v13995_v20 }
 0x76d   :  { %13998 = vmatpush3.bf16.msra.mxu1 %v13995_v20 }
 0x76e   :  { %v13999_v21 = vpack.c.bf16 %v6100_v50, %v6095_v25  ;;  %v13541_v52 = vpop.f32.mrb[80].mxu1 }
 0x76f   :  { %v6110_v5 = vadd.f32 %v13541_v52, %v12626_v30  ;;  %v6104_v0 = vpop.f32.mrb[81].mxu1 }
 0x770   :  { %v6105_v24 = vadd.f32 %v12626_v30, %v6104_v0  ;;  %14000 = vmatprep.subr.bf16.mxu1 %v13999_v21 }
 0x771   :  { %14002 = vmatpush3.bf16.msra.mxu1 %v13999_v21 }
 0x772   :  { %v14003_v2 = vpack.c.bf16 %v6110_v5, %v6105_v24 }
 0x774   :  { %14004 = vmatprep.subr.bf16.mxu1 %v14003_v2 }
 0x775   :  { %14006 = vmatpush3.bf16.msra.mxu1 %v14003_v2  ;;  %v13544_v54 = vpop.f32.mrb[82].mxu1 }
 0x776   :  { %v6120_v44 = vadd.f32 %v13544_v54, %v12626_v30  ;;  %v6114_v12 = vpop.f32.mrb[83].mxu1 }
 0x777   :  { %v6115_v46 = vadd.f32 %v12626_v30, %v6114_v12 }
 0x779   :  { %v14007_v9 = vpack.c.bf16 %v6120_v44, %v6115_v46 }
 0x77b   :  { %14008 = vmatprep.subr.bf16.mxu1 %v14007_v9 }
 0x77c   :  { %14010 = vmatpush3.bf16.msra.mxu1 %v14007_v9 }
 0x77f   :  { %13562 = vmatmul.mubr.msk.f32.vlgmr.msra.gmra.mrb[84].mxu1 %vm6131_vm5, %v6124_v60  ;;  %v12644_v60 = vld [vmem:[%s16851_s3 + $0x8] sm:$0xff] }
 0x780   :  { %13564 = vmatprep.mubr.msk.f32.mxu1 %vm6131_vm5, %v6125_v38  ;;  %v12643_v38 = vld [vmem:[%s16850_s2 + $0x8] sm:$0xff] }
 0x783   :  { %13565 = vmatmul.mubr.msk.f32.gmra.mrb[86].mxu1 %vm6131_vm5, %v6126_v48  ;;  %v12657_v48 = vld [vmem:[%s16853_s5 + $0x10] sm:$0xff] }
 0x784   :  { %13567 = vmatprep.mubr.msk.f32.mxu1 %vm6131_vm5, %v6127_v35  ;;  %v12658_v35 = vld [vmem:[%s16853_s5 + $0x18] sm:$0xff] }
 0x787   :  { %13568 = vmatmul.mubr.msk.f32.gmra.mrb[88].mxu1 %vm6131_vm5, %v6128_v42  ;;  %v12645_v42 = vld [vmem:[%s16852_s4 + $0x10] sm:$0xff] }
 0x788   :  { %13570 = vmatprep.mubr.msk.f32.mxu1 %vm6131_vm5, %v6129_v13  ;;  %v14015_v13 = vpack.c.bf16 %v12658_v35, %v12657_v48 }
 0x78a   :  { %14016 = vmatprep.subr.bf16.mxu1 %v14015_v13 }
 0x78b   :  { %13571 = vmatmul.mubr.msk.f32.gmra.mrb[90].mxu1 %vm6131_vm5, %v6130_v36  ;;  %v12646_v36 = vld [vmem:[%s16852_s4 + $0x18] sm:$0xff] }
 0x78c   :  { %14018 = vmatpush3.bf16.msra.mxu1 %v14015_v13 }
 0x78d   :  { %13621 = vmatprep.subr.mxu1 %v16874_v16 }
 0x852   :  { %v13563_v41 = vpop.f32.mrb[84].mxu1 }
 0x853   :  { %v6222_v15 = vpop.f32.mrb[85].mxu1  ;;  %v6264_v43 = vsel %vm97_vm0, %v13563_v41, 0.0 }
 0x854   :  { %6265 = vadd.xlane.f32.xlu0 %v6264_v43  ;;  %v6261_v4 = vsel %vm97_vm0, %v6222_v15, 0.0  ;;  %v6639_v43 = vld [vmem:[#allocation5 + $0x18] sm:$0xff] }
 0x855   :  { %6262 = vadd.xlane.f32.xlu1 %v6261_v4 }
 0x856   :  { %v13566_v39 = vpop.f32.mrb[86].mxu1 }
 0x857   :  { %v6232_v31 = vpop.f32.mrb[87].mxu1  ;;  %v6270_v23 = vsel %vm97_vm0, %v13566_v39, 0.0 }
 0x858   :  { %v6267_v57 = vsel %vm97_vm0, %v6232_v31, 0.0 }
 0x859   :  { %6271 = vadd.xlane.f32.xlu1 %v6270_v23  ;;  %6268 = vadd.xlane.f32.xlu0 %v6267_v57 }
 0x85a   :  { %v13569_v37 = vpop.f32.mrb[88].mxu1 }
 0x85b   :  { %v6242_v18 = vpop.f32.mrb[89].mxu1  ;;  %v6276_v40 = vsel %vm97_vm0, %v13569_v37, 0.0 }
 0x85c   :  { %v6273_v14 = vsel %vm97_vm0, %v6242_v18, 0.0 }
 0x85d   :  { %6277 = vadd.xlane.f32.xlu1 %v6276_v40  ;;  %6274 = vadd.xlane.f32.xlu0 %v6273_v14 }
 0x85e   :  { %v13572_v27 = vpop.f32.mrb[90].mxu1 }
 0x85f   :  { %v6252_v34 = vpop.f32.mrb[91].mxu1  ;;  %v6282_v26 = vsel %vm97_vm0, %v13572_v27, 0.0 }
 0x860   :  { %v6279_v3 = vsel %vm97_vm0, %v6252_v34, 0.0 }
 0x861   :  { %6283 = vadd.xlane.f32.xlu1 %v6282_v26  ;;  %6280 = vadd.xlane.f32.xlu0 %v6279_v3 }
 0x8e1   :  { %v6266_v51 = vpop.xlane.xlu0 %6265 }
 0x8e2   :  { %v6263_v56 = vpop.xlane.xlu1 %6262 }
 0x8e3   :  { %v6285_v45 = vadd.f32 %v6266_v51, %v6263_v56 }
 0x8e6   :  { %v6272_v6 = vpop.xlane.xlu1 %6271  ;;  %v6269_v59 = vpop.xlane.xlu0 %6268 }
 0x8e7   :  { %v6286_v47 = vadd.f32 %v6285_v45, %v6269_v59 }
 0x8e9   :  { %v6287_v10 = vadd.f32 %v6286_v47, %v6272_v6 }
 0x8ea   :  { %v6278_v61 = vpop.xlane.xlu1 %6277  ;;  %v6275_v53 = vpop.xlane.xlu0 %6274 }
 0x8eb   :  { %v6288_v49 = vadd.f32 %v6287_v10, %v6275_v53 }
 0x8ed   :  { %v6289_v62 = vadd.f32 %v6288_v49, %v6278_v61 }
 0x8ee   :  { %v6281_v7 = vpop.xlane.xlu0 %6280  ;;  %v6284_v17 = vpop.xlane.xlu1 %6283 }
 0x8ef   :  { %v6290_v22 = vadd.f32 %v6289_v62, %v6281_v7 }
 0x8f1   :  { %v6291_v8 = vadd.f32 %v6290_v22, %v6284_v17 }
 0x8f3   :  { %v6292_v55 = vmul.f32 0.0078125, %v6291_v8 }
 0x8f5   :  { %v15684_v63 = vsub.f32 %v13563_v41, %v6292_v55  ;;  %v15686_v58 = vsub.f32 %v6222_v15, %v6292_v55  ;;  %v15688_v1 = vsub.f32 %v13566_v39, %v6292_v55  ;;  %v15690_v30 = vsub.f32 %v6232_v31, %v6292_v55  ;;  %v6638_v15 = vld [vmem:[#allocation5 + $0x10] sm:$0xff] }
 0x8f6   :  { %v15696_v11 = vsub.f32 %v13569_v37, %v6292_v55  ;;  %v15698_v28 = vsub.f32 %v6242_v18, %v6292_v55  ;;  %v15706_v25 = vsub.f32 %v13572_v27, %v6292_v55  ;;  %v15708_v21 = vsub.f32 %v6252_v34, %v6292_v55 }
 0x8f7   :  { %v6302_v29 = vmul.f32 %v15684_v63, %v15684_v63  ;;  %v6301_v19 = vmul.f32 %v15686_v58, %v15686_v58  ;;  %v6304_v50 = vmul.f32 %v15688_v1, %v15688_v1  ;;  %v6303_v33 = vmul.f32 %v15690_v30, %v15690_v30 }
 0x8f8   :  { %v6306_v0 = vmul.f32 %v15696_v11, %v15696_v11  ;;  %v6305_v24 = vmul.f32 %v15698_v28, %v15698_v28  ;;  %v6308_v44 = vmul.f32 %v15706_v25, %v15706_v25  ;;  %v6307_v12 = vmul.f32 %v15708_v21, %v15708_v21 }
 0x8f9   :  { %v6312_v20 = vsel %vm97_vm0, %v6302_v29, 0.0  ;;  %v6309_v32 = vsel %vm97_vm0, %v6301_v19, 0.0  ;;  %v6318_v52 = vsel %vm97_vm0, %v6304_v50, 0.0  ;;  %v6315_v5 = vsel %vm97_vm0, %v6303_v33, 0.0 }
 0x8fa   :  { %6313 = vadd.xlane.f32.xlu1 %v6312_v20  ;;  %6310 = vadd.xlane.f32.xlu0 %v6309_v32  ;;  %v6324_v2 = vsel %vm97_vm0, %v6306_v0, 0.0  ;;  %v6321_v54 = vsel %vm97_vm0, %v6305_v24, 0.0  ;;  %v6330_v46 = vsel %vm97_vm0, %v6308_v44, 0.0  ;;  %v6327_v9 = vsel %vm97_vm0, %v6307_v12, 0.0  ;;  %v12660_v0 = vld [vmem:[%s16857_s9 + $0x1] ss:$0 sm:$0xff] }
 0x8fb   :  { %v14011_v41 = vpack.c.bf16 %v12646_v36, %v12645_v42  ;;  %v14019_v4 = vpack.c.bf16 %v6639_v43, %v6638_v15 }
 0x8fd   :  { %14012 = vmatprep.subr.bf16.mxu0 %v14011_v41 }
 0x8fe   :  { %6319 = vadd.xlane.f32.xlu1 %v6318_v52  ;;  %6316 = vadd.xlane.f32.xlu0 %v6315_v5 }
 0x8ff   :  { %14014 = vmatpush3.bf16.msra.mxu0 %v14011_v41 }
 0x900   :  { %14020 = vmatprep.subr.bf16.mxu0 %v14019_v4 }
 0x902   :  { %6325 = vadd.xlane.f32.xlu1 %v6324_v2  ;;  %6322 = vadd.xlane.f32.xlu0 %v6321_v54  ;;  %v15786_v54 = vld [vmem:[%s16856_s8 + $0x1] ss:$0 sm:$0xff] }
 0x906   :  { %6331 = vadd.xlane.f32.xlu1 %v6330_v46  ;;  %6328 = vadd.xlane.f32.xlu0 %v6327_v9 }
 0x917   :  { %6370 = vperm.xlu1 %14066, %v12644_v60  }
 0x91c   :  { %6355 = vperm.xlu0 %14065, %v12643_v38  }
 0x987   :  { %v6314_v39 = vpop.xlane.xlu1 %6313  ;;  %v6311_v31 = vpop.xlane.xlu0 %6310 }
 0x988   :  { %v6333_v23 = vadd.f32 %v6314_v39, %v6311_v31 }
 0x98b   :  { %v6320_v57 = vpop.xlane.xlu1 %6319  ;;  %v6317_v37 = vpop.xlane.xlu0 %6316 }
 0x98c   :  { %v6334_v18 = vadd.f32 %v6333_v23, %v6317_v37 }
 0x98e   :  { %v6335_v40 = vadd.f32 %v6334_v18, %v6320_v57 }
 0x98f   :  { %v6326_v14 = vpop.xlane.xlu1 %6325  ;;  %v6323_v27 = vpop.xlane.xlu0 %6322 }
 0x990   :  { %v6336_v34 = vadd.f32 %v6335_v40, %v6323_v27 }
 0x992   :  { %v6337_v26 = vadd.f32 %v6336_v34, %v6326_v14 }
 0x993   :  { %v6329_v3 = vpop.xlane.xlu0 %6328  ;;  %v6332_v56 = vpop.xlane.xlu1 %6331 }
 0x994   :  { %v6338_v51 = vadd.f32 %v6337_v26, %v6329_v3 }
 0x996   :  { %v6339_v45 = vadd.f32 %v6338_v51, %v6332_v56 }
 0x997   :  { %v6371_v55 = vpop.permute.xlu1 %6370 }
 0x998   :  { %v6340_v6 = vmul.f32 0.0078125, %v6339_v45 }
 0x99a   :  { %v6341_v59 = vadd.f32 1e-05, %v6340_v6 }
 0x99b   :  { %v6356_v49 = vpop.permute.xlu0 %6355 }
 0x99c   :  { %14197 = vrsqrt.f32 %v6341_v59 }
 0x9a6   :  { %v14198_v47 = vpop.eup %14197 }
 0x9a7   :  { %v6343_v10 = vmul.f32 %v14198_v47, %v15686_v58  ;;  %v6344_v61 = vmul.f32 %v14198_v47, %v15684_v63  ;;  %v6345_v53 = vmul.f32 %v14198_v47, %v15690_v30  ;;  %v6346_v62 = vmul.f32 %v14198_v47, %v15688_v1 }
 0x9a8   :  { %v6347_v8 = vmul.f32 %v14198_v47, %v15698_v28  ;;  %v6348_v32 = vmul.f32 %v14198_v47, %v15696_v11  ;;  %v6349_v30 = vmul.f32 %v14198_v47, %v15708_v21  ;;  %v6350_v11 = vmul.f32 %v14198_v47, %v15706_v25 }
 0x9a9   :  { %v6358_v7 = vmul.f32 %v6356_v49, %v6343_v10  ;;  %v6359_v22 = vmul.f32 %v6356_v49, %v6344_v61  ;;  %v6360_v17 = vmul.f32 %v6356_v49, %v6345_v53  ;;  %v6361_v20 = vmul.f32 %v6356_v49, %v6346_v62 }
 0x9aa   :  { %v6362_v58 = vmul.f32 %v6356_v49, %v6347_v8  ;;  %v6363_v28 = vmul.f32 %v6356_v49, %v6348_v32  ;;  %v6364_v33 = vmul.f32 %v6356_v49, %v6349_v30  ;;  %v6365_v52 = vmul.f32 %v6356_v49, %v6350_v11 }
 0x9ab   :  { %v6373_v29 = vadd.f32 %v6371_v55, %v6358_v7  ;;  %v6374_v19 = vadd.f32 %v6371_v55, %v6359_v22  ;;  %v6375_v63 = vadd.f32 %v6371_v55, %v6360_v17  ;;  %v6376_v1 = vadd.f32 %v6371_v55, %v6361_v20  ;;  %v12670_v7 = vld [vmem:[%s16858_s10 + $0x1] ss:$0 sm:$0xff] }
 0x9ac   :  { %v6377_v50 = vadd.f32 %v6371_v55, %v6362_v58  ;;  %v6378_v21 = vadd.f32 %v6371_v55, %v6363_v28  ;;  %v6379_v5 = vadd.f32 %v6371_v55, %v6364_v33  ;;  %v6380_v25 = vadd.f32 %v6371_v55, %v6365_v52 }
 0x9ad   :  { %13577 = vmatprep.mubr.msk.f32.mxu0 %vm97_vm0, %v6373_v29  ;;  %13593 = vmatprep.mubr.msk.f32.mxu1 %vm97_vm0, %v6373_v29 }
 0x9ae   :  { %13578 = vmatmul.mubr.msk.f32.vlgmr.msra.gmra.mrb[76].mxu0 %vm97_vm0, %v6374_v19  ;;  %13594 = vmatmul.mubr.msk.f32.vlgmr.msra.gmra.mrb[92].mxu1 %vm97_vm0, %v6374_v19 }
 0x9af   :  { %13580 = vmatprep.mubr.msk.f32.mxu0 %vm97_vm0, %v6375_v63  ;;  %13596 = vmatprep.mubr.msk.f32.mxu1 %vm97_vm0, %v6375_v63 }
 0x9b0   :  { %14022 = vmatpush3.bf16.msra.mxu0 %v14019_v4 }
 0x9b1   :  { %13626 = vmatprep.subr.mxu0 %v16874_v16 }
 0x9b2   :  { %13581 = vmatmul.mubr.msk.f32.gmra.mrb[78].mxu0 %vm97_vm0, %v6376_v1  ;;  %13597 = vmatmul.mubr.msk.f32.gmra.mrb[94].mxu1 %vm97_vm0, %v6376_v1 }
 0x9b3   :  { %13583 = vmatprep.mubr.msk.f32.mxu0 %vm97_vm0, %v6377_v50  ;;  %13599 = vmatprep.mubr.msk.f32.mxu1 %vm97_vm0, %v6377_v50 }
 0x9b6   :  { %13584 = vmatmul.mubr.msk.f32.gmra.mrb[80].mxu0 %vm97_vm0, %v6378_v21  ;;  %13600 = vmatmul.mubr.msk.f32.gmra.mrb[96].mxu1 %vm97_vm0, %v6378_v21 }
 0x9b7   :  { %13586 = vmatprep.mubr.msk.f32.mxu0 %vm97_vm0, %v6379_v5  ;;  %13602 = vmatprep.mubr.msk.f32.mxu1 %vm97_vm0, %v6379_v5 }
 0x9ba   :  { %13587 = vmatmul.mubr.msk.f32.gmra.mrb[82].mxu0 %vm97_vm0, %v6380_v25  ;;  %13603 = vmatmul.mubr.msk.f32.gmra.mrb[98].mxu1 %vm97_vm0, %v6380_v25 }
 0x9bb   :  { %13609 = vmatprep.mubr.msk.f32.mxu0 %vm97_vm0, %v6373_v29  ;;  %13623 = vmatprep.mubr.msk.f32.mxu1 %vm14428_vm1, %v16874_v16 }
 0x9be   :  { %13610 = vmatmul.mubr.msk.f32.vlgmr.msra.gmra.mrb[84].mxu0 %vm97_vm0, %v6374_v19 }
 0x9bf   :  { %13612 = vmatprep.mubr.msk.f32.mxu0 %vm97_vm0, %v6375_v63 }
 0x9c2   :  { %13613 = vmatmul.mubr.msk.f32.gmra.mrb[86].mxu0 %vm97_vm0, %v6376_v1 }
 0x9c3   :  { %13615 = vmatprep.mubr.msk.f32.mxu0 %vm97_vm0, %v6377_v50 }
 0x9c6   :  { %13616 = vmatmul.mubr.msk.f32.gmra.mrb[88].mxu0 %vm97_vm0, %v6378_v21 }
 0x9c7   :  { %13618 = vmatprep.mubr.msk.f32.mxu0 %vm97_vm0, %v6379_v5 }
 0x9ca   :  { %13619 = vmatmul.mubr.msk.f32.gmra.mrb[90].mxu0 %vm97_vm0, %v6380_v25 }
 0x9cb   :  { %13628 = vmatprep.mubr.msk.f32.mxu0 %vm14428_vm1, %v16874_v16 }
 0xa81   :  { %v13579_v24 = vpop.f32.mrb[76].mxu0  ;;  %v13595_v2 = vpop.f32.mrb[92].mxu1 }
 0xa82   :  { %v15788_v44 = vadd.f32 %v13595_v2, %v12660_v0  ;;  %v6482_v12 = vpop.f32.mrb[77].mxu0  ;;  %v6598_v46 = vpop.f32.mrb[93].mxu1  ;;  %v15797_v60 = vadd.f32 %v13579_v24, %v15786_v54 }
 0xa83   :  { %v15790_v9 = vadd.f32 %v12660_v0, %v6598_v46  ;;  %v15804_v35 = vadd.f32 %v15786_v54, %v6482_v12 }
 0xa84   :  { %6819 = vrot.lane.b32.xlu0 %v15788_v44, %s14430_s19  ;;  %13627 = vmatpush3.xpose.msk.msra.mxu0 %vm774_vm2, %v15788_v44 }
 0xa85   :  { %v13598_v38 = vpop.f32.mrb[94].mxu1  ;;  %6817 = vrot.lane.b32.xlu1 %v15790_v9, %s14430_s19  ;;  %v13582_v48 = vpop.f32.mrb[78].mxu0  ;;  %13622 = vmatpush3.xpose.msk.msra.mxu1 %vm774_vm2, %v15790_v9 }
 0xa86   :  { %v15806_v42 = vadd.f32 %v13598_v38, %v12660_v0  ;;  %v6492_v13 = vpop.f32.mrb[79].mxu0  ;;  %v6608_v36 = vpop.f32.mrb[95].mxu1  ;;  %13636 = vmatprep.subr.mxu0 %v16874_v16  ;;  %13631 = vmatprep.subr.mxu1 %v16874_v16  ;;  %v15823_v4 = vadd.f32 %v13582_v48, %v15786_v54 }
 0xa87   :  { %v15810_v41 = vadd.f32 %v12660_v0, %v6608_v36  ;;  %13629 = vmatmul.mubr.msk.f32.vlgmr.msra.gmra.mrb[92].mxu0 %vm774_vm2, %v15797_v60  ;;  %v15832_v57 = vadd.f32 %v15786_v54, %v6492_v13 }
 0xa88   :  { %6763 = vrot.lane.b32.xlu0 %v15797_v60, %s14430_s19  ;;  %13624 = vmatmul.mubr.msk.f32.vlgmr.msra.gmra.mrb[100].mxu1 %vm774_vm2, %v15804_v35 }
 0xa89   :  { %13637 = vmatpush3.xpose.msk.msra.mxu0 %vm774_vm2, %v15806_v42  ;;  %v13585_v15 = vpop.f32.mrb[80].mxu0  ;;  %v13601_v43 = vpop.f32.mrb[96].mxu1  ;;  %6761 = vrot.lane.b32.xlu1 %v15804_v35, %s14430_s19 }
 0xa8a   :  { %v15825_v39 = vadd.f32 %v13601_v43, %v12660_v0  ;;  %13632 = vmatpush3.xpose.msk.msra.mxu1 %vm774_vm2, %v15810_v41  ;;  %v6502_v31 = vpop.f32.mrb[81].mxu0  ;;  %v6618_v23 = vpop.f32.mrb[97].mxu1  ;;  %13638 = vmatprep.mubr.msk.f32.mxu0 %vm14428_vm1, %v16874_v16  ;;  %v15851_v34 = vadd.f32 %v13585_v15, %v15786_v54 }
 0xa8b   :  { %v15834_v37 = vadd.f32 %v12660_v0, %v6618_v23  ;;  %13633 = vmatprep.mubr.msk.f32.mxu1 %vm14428_vm1, %v16874_v16  ;;  %13646 = vmatprep.subr.mxu0 %v16874_v16  ;;  %v15860_v3 = vadd.f32 %v15786_v54, %v6502_v31 }
 0xa8c   :  { %13639 = vmatmul.mubr.msk.f32.vlgmr.msra.gmra.mrb[94].mxu0 %vm774_vm2, %v15823_v4  ;;  %6835 = vrot.lane.b32.xlu0 %v15788_v44, %s14429_s18 }
 0xa8d   :  { %13634 = vmatmul.mubr.msk.f32.vlgmr.msra.gmra.mrb[102].mxu1 %vm774_vm2, %v15832_v57  ;;  %13641 = vmatprep.subr.mxu1 %v16874_v16  ;;  %v13588_v18 = vpop.f32.mrb[82].mxu0  ;;  %v13604_v40 = vpop.f32.mrb[98].mxu1 }
 0xa8e   :  { %13647 = vmatpush3.xpose.msk.msra.mxu0 %vm774_vm2, %v15825_v39  ;;  %6833 = vrot.lane.b32.xlu1 %v15790_v9, %s14429_s18  ;;  %v6512_v14 = vpop.f32.mrb[83].mxu0  ;;  %v6628_v27 = vpop.f32.mrb[99].mxu1  ;;  %v15853_v26 = vadd.f32 %v13604_v40, %v12660_v0  ;;  %v6518_v6 = vadd.f32 %v13588_v18, %v15786_v54 }
 0xa8f   :  { %13642 = vmatpush3.xpose.msk.msra.mxu1 %vm774_vm2, %v15834_v37  ;;  %13648 = vmatprep.mubr.msk.f32.mxu0 %vm14428_vm1, %v16874_v16  ;;  %v15862_v51 = vadd.f32 %v12660_v0, %v6628_v27  ;;  %v6513_v59 = vadd.f32 %v15786_v54, %v6512_v14 }
 0xa90   :  { %13643 = vmatprep.mubr.msk.f32.mxu1 %vm14428_vm1, %v16874_v16  ;;  %13656 = vmatprep.subr.mxu0 %v16874_v16 }
 0xa91   :  { %13649 = vmatmul.mubr.msk.f32.vlgmr.msra.gmra.mrb[96].mxu0 %vm774_vm2, %v15851_v34  ;;  %6779 = vrot.lane.b32.xlu0 %v15797_v60, %s14429_s18  ;;  %v15871_v56 = vpop.f32.mrb[84].mxu0 }
 0xa92   :  { %13644 = vmatmul.mubr.msk.f32.vlgmr.msra.gmra.mrb[104].mxu1 %vm774_vm2, %v15860_v3  ;;  %13651 = vmatprep.subr.mxu1 %v16874_v16  ;;  %v6714_v45 = vpop.f32.mrb[85].mxu0  ;;  %v15984_v17 = vadd.f32 %v15871_v56, %v12670_v7 }
 0xa93   :  { %13657 = vmatpush3.xpose.msk.msra.mxu0 %vm774_vm2, %v15853_v26  ;;  %6777 = vrot.lane.b32.xlu1 %v15804_v35, %s14429_s18  ;;  %v15980_v22 = vadd.f32 %v12670_v7, %v6714_v45 }
 0xa94   :  { %13652 = vmatpush3.xpose.msk.msra.mxu1 %vm774_vm2, %v15862_v51  ;;  %13658 = vmatprep.mubr.msk.f32.mxu0 %vm14428_vm1, %v16874_v16 }
 0xa95   :  { %13653 = vmatprep.mubr.msk.f32.mxu1 %vm14428_vm1, %v16874_v16  ;;  %6823 = vrot.lane.b32.xlu0 %v15806_v42, %s14430_s19  ;;  %v13614_v47 = vpop.f32.mrb[86].mxu0 }
 0xa96   :  { %13659 = vmatmul.mubr.msk.f32.vlgmr.msra.gmra.mrb[98].mxu0 %vm774_vm2, %v6518_v6  ;;  %v6724_v10 = vpop.f32.mrb[87].mxu0  ;;  %13666 = vmatprep.subr.mxu0 %v16874_v16  ;;  %v15996_v8 = vadd.f32 %v13614_v47, %v12670_v7 }
 0xa97   :  { %13654 = vmatmul.mubr.msk.f32.vlgmr.msra.gmra.mrb[106].mxu1 %vm774_vm2, %v6513_v59  ;;  %6821 = vrot.lane.b32.xlu1 %v15810_v41, %s14430_s19  ;;  %v16004_v55 = vadd.f32 %v12670_v7, %v6724_v10 }
 0xa98   :  { %13661 = vmatprep.subr.mxu1 %v16874_v16  ;;  %13668 = vmatprep.mubr.msk.f32.mxu0 %vm14428_vm1, %v16874_v16 }
 0xa99   :  { %6767 = vrot.lane.b32.xlu0 %v15823_v4, %s14430_s19  ;;  %v15900_v61 = vpop.f32.mrb[88].mxu0  ;;  %13663 = vmatprep.mubr.msk.f32.mxu1 %vm14428_vm1, %v16874_v16 }
 0xa9a   :  { %v15904_v53 = vpop.f32.mrb[89].mxu0  ;;  %v16026_v58 = vadd.f32 %v15900_v61, %v12670_v7 }
 0xa9b   :  { %6765 = vrot.lane.b32.xlu1 %v15832_v57, %s14430_s19  ;;  %v16017_v32 = vadd.f32 %v12670_v7, %v15904_v53 }
 0xa9d   :  { %6839 = vrot.lane.b32.xlu0 %v15806_v42, %s14429_s18  ;;  %v15910_v49 = vpop.f32.mrb[90].mxu0 }
 0xa9e   :  { %v15912_v62 = vpop.f32.mrb[91].mxu0  ;;  %v16037_v28 = vadd.f32 %v15910_v49, %v12670_v7 }
 0xa9f   :  { %6837 = vrot.lane.b32.xlu1 %v15810_v41, %s14429_s18  ;;  %v16042_v50 = vadd.f32 %v12670_v7, %v15912_v62 }
 0xaa1   :  { %6783 = vrot.lane.b32.xlu0 %v15823_v4, %s14429_s18 }
 0xaa3   :  { %6781 = vrot.lane.b32.xlu1 %v15832_v57, %s14429_s18 }
 0xaa5   :  { %6827 = vrot.lane.b32.xlu0 %v15825_v39, %s14430_s19 }
 0xaa7   :  { %6825 = vrot.lane.b32.xlu1 %v15834_v37, %s14430_s19 }
 0xaa9   :  { %6771 = vrot.lane.b32.xlu0 %v15851_v34, %s14430_s19 }
 0xaab   :  { %6769 = vrot.lane.b32.xlu1 %v15860_v3, %s14430_s19 }
 0xaad   :  { %6843 = vrot.lane.b32.xlu0 %v15825_v39, %s14429_s18 }
 0xaaf   :  { %6841 = vrot.lane.b32.xlu1 %v15834_v37, %s14429_s18 }
 0xab1   :  { %6831 = vrot.lane.b32.xlu0 %v15853_v26, %s14430_s19 }
 0xab3   :  { %6829 = vrot.lane.b32.xlu1 %v15862_v51, %s14430_s19 }
 0xab5   :  { %6775 = vrot.lane.b32.xlu0 %v6518_v6, %s14430_s19 }
 0xab7   :  { %6773 = vrot.lane.b32.xlu1 %v6513_v59, %s14430_s19 }
 0xab9   :  { %6787 = vrot.lane.b32.xlu0 %v15851_v34, %s14429_s18 }
 0xabb   :  { %6785 = vrot.lane.b32.xlu1 %v15860_v3, %s14429_s18 }
 0xabd   :  { %6847 = vrot.lane.b32.xlu0 %v15853_v26, %s14429_s18 }
 0xabf   :  { %6849 = vrot.lane.b32.xlu1 %v15790_v9, %s14431_s20 }
 0xac1   :  { %6791 = vrot.lane.b32.xlu0 %v6518_v6, %s14429_s18 }
 0xac3   :  { %6845 = vrot.lane.b32.xlu1 %v15862_v51, %s14429_s18 }
 0xac5   :  { %6851 = vrot.lane.b32.xlu0 %v15788_v44, %s14431_s20 }
 0xac7   :  { %6789 = vrot.lane.b32.xlu1 %v6513_v59, %s14429_s18 }
 0xac9   :  { %6795 = vrot.lane.b32.xlu0 %v15797_v60, %s14431_s20 }
 0xacb   :  { %6793 = vrot.lane.b32.xlu1 %v15804_v35, %s14431_s20 }
 0xacd   :  { %6855 = vrot.lane.b32.xlu0 %v15806_v42, %s14431_s20 }
 0xacf   :  { %6853 = vrot.lane.b32.xlu1 %v15810_v41, %s14431_s20 }
 0xad1   :  { %6799 = vrot.lane.b32.xlu0 %v15823_v4, %s14431_s20 }
 0xad3   :  { %6797 = vrot.lane.b32.xlu1 %v15832_v57, %s14431_s20 }
 0xad5   :  { %6859 = vrot.lane.b32.xlu0 %v15825_v39, %s14431_s20 }
 0xad7   :  { %6857 = vrot.lane.b32.xlu1 %v15834_v37, %s14431_s20 }
 0xad9   :  { %6803 = vrot.lane.b32.xlu0 %v15851_v34, %s14431_s20 }
 0xadb   :  { %6801 = vrot.lane.b32.xlu1 %v15860_v3, %s14431_s20 }
 0xadd   :  { %6863 = vrot.lane.b32.xlu0 %v15853_v26, %s14431_s20 }
 0xadf   :  { %6861 = vrot.lane.b32.xlu1 %v15862_v51, %s14431_s20 }
 0xae1   :  { %6807 = vrot.lane.b32.xlu0 %v6518_v6, %s14431_s20 }
 0xae3   :  { %6805 = vrot.lane.b32.xlu1 %v6513_v59, %s14431_s20 }
 0xae5   :  { %6873 = vrot.lane.b32.xlu0 %v15980_v22, %s14430_s19 }
 0xae7   :  { %6875 = vrot.lane.b32.xlu1 %v15984_v17, %s14430_s19 }
 0xae9   :  { %6897 = vrot.lane.b32.xlu0 %v15980_v22, %s14429_s18 }
 0xaeb   :  { %6899 = vrot.lane.b32.xlu1 %v15984_v17, %s14429_s18 }
 0xaed   :  { %6921 = vrot.lane.b32.xlu0 %v15980_v22, %s14431_s20 }
 0xaef   :  { %6923 = vrot.lane.b32.xlu1 %v15984_v17, %s14431_s20 }
 0xaf1   :  { %6903 = vrot.lane.b32.xlu0 %v15996_v8, %s14429_s18 }
 0xaf3   :  { %6879 = vrot.lane.b32.xlu1 %v15996_v8, %s14430_s19 }
 0xaf5   :  { %6927 = vrot.lane.b32.xlu0 %v15996_v8, %s14431_s20 }
 0xaf6   :  { %v6820_v29 = vpop.permute.xlu0 %6819 }
 0xaf7   :  { %6901 = vrot.lane.b32.xlu1 %v16004_v55, %s14429_s18  ;;  %v6818_v19 = vpop.permute.xlu1 %6817  ;;  %13667 = vmatpush3.xpose.msk.msra.mxu0 %vm774_vm2, %v6820_v29 }
 0xaf8   :  { %13662 = vmatpush3.xpose.msk.msra.mxu1 %vm774_vm2, %v6818_v19  ;;  %13676 = vmatprep.subr.mxu0 %v16874_v16 }
 0xaf9   :  { %6877 = vrot.lane.b32.xlu0 %v16004_v55, %s14430_s19  ;;  %13671 = vmatprep.subr.mxu1 %v16874_v16 }
 0xafa   :  { %v6764_v20 = vpop.permute.xlu0 %6763 }
 0xafb   :  { %6925 = vrot.lane.b32.xlu1 %v16004_v55, %s14431_s20  ;;  %13669 = vmatmul.mubr.msk.f32.vlgmr.msra.gmra.mrb[100].mxu0 %vm774_vm2, %v6764_v20  ;;  %v6762_v63 = vpop.permute.xlu1 %6761 }
 0xafc   :  { %13664 = vmatmul.mubr.msk.f32.vlgmr.msra.gmra.mrb[108].mxu1 %vm774_vm2, %v6762_v63  ;;  %13678 = vmatprep.mubr.msk.f32.mxu0 %vm14428_vm1, %v16874_v16 }
 0xafd   :  { %6881 = vrot.lane.b32.xlu0 %v16017_v32, %s14430_s19  ;;  %13673 = vmatprep.mubr.msk.f32.mxu1 %vm14428_vm1, %v16874_v16 }
 0xafe   :  { %v6836_v30 = vpop.permute.xlu0 %6835 }
 0xaff   :  { %6883 = vrot.lane.b32.xlu1 %v16026_v58, %s14430_s19 }
 0xb00   :  { %v6834_v1 = vpop.permute.xlu1 %6833 }
 0xb01   :  { %6905 = vrot.lane.b32.xlu0 %v16017_v32, %s14429_s18 }
 0xb03   :  { %6907 = vrot.lane.b32.xlu1 %v16026_v58, %s14429_s18  ;;  %v6780_v11 = vpop.permute.xlu0 %6779 }
 0xb05   :  { %v6778_v33 = vpop.permute.xlu1 %6777  ;;  %6887 = vrot.lane.b32.xlu0 %v16037_v28, %s14430_s19 }
 0xb07   :  { %6885 = vrot.lane.b32.xlu1 %v16042_v50, %s14430_s19  ;;  %v6824_v21 = vpop.permute.xlu0 %6823 }
 0xb08   :  { %13677 = vmatpush3.xpose.msk.msra.mxu0 %vm774_vm2, %v6824_v21 }
 0xb09   :  { %v6822_v52 = vpop.permute.xlu1 %6821  ;;  %6911 = vrot.lane.b32.xlu0 %v16037_v28, %s14429_s18  ;;  %13686 = vmatprep.subr.mxu0 %v16874_v16 }
 0xb0a   :  { %13672 = vmatpush3.xpose.msk.msra.mxu1 %vm774_vm2, %v6822_v52 }
 0xb0b   :  { %6909 = vrot.lane.b32.xlu1 %v16042_v50, %s14429_s18  ;;  %v6768_v5 = vpop.permute.xlu0 %6767  ;;  %13681 = vmatprep.subr.mxu1 %v16874_v16 }
 0xb0c   :  { %13679 = vmatmul.mubr.msk.f32.vlgmr.msra.gmra.mrb[102].mxu0 %vm774_vm2, %v6768_v5 }
 0xb0d   :  { %v6766_v25 = vpop.permute.xlu1 %6765  ;;  %13688 = vmatprep.mubr.msk.f32.mxu0 %vm14428_vm1, %v16874_v16 }
 0xb0e   :  { %13674 = vmatmul.mubr.msk.f32.vlgmr.msra.gmra.mrb[110].mxu1 %vm774_vm2, %v6766_v25 }
 0xb0f   :  { %v6840_v0 = vpop.permute.xlu0 %6839  ;;  %13683 = vmatprep.mubr.msk.f32.mxu1 %vm14428_vm1, %v16874_v16 }
 0xb11   :  { %v6838_v24 = vpop.permute.xlu1 %6837 }
 0xb13   :  { %v6784_v2 = vpop.permute.xlu0 %6783 }
 0xb15   :  { %v6782_v54 = vpop.permute.xlu1 %6781 }
 0xb17   :  { %v6828_v44 = vpop.permute.xlu0 %6827 }
 0xb18   :  { %13687 = vmatpush3.xpose.msk.msra.mxu0 %vm774_vm2, %v6828_v44 }
 0xb19   :  { %v6826_v12 = vpop.permute.xlu1 %6825  ;;  %13696 = vmatprep.subr.mxu0 %v16874_v16 }
 0xb1a   :  { %13682 = vmatpush3.xpose.msk.msra.mxu1 %vm774_vm2, %v6826_v12 }
 0xb1b   :  { %v6772_v46 = vpop.permute.xlu0 %6771  ;;  %13691 = vmatprep.subr.mxu1 %v16874_v16 }
 0xb1c   :  { %13689 = vmatmul.mubr.msk.f32.vlgmr.msra.gmra.mrb[104].mxu0 %vm774_vm2, %v6772_v46 }
 0xb1d   :  { %v6770_v9 = vpop.permute.xlu1 %6769  ;;  %13698 = vmatprep.mubr.msk.f32.mxu0 %vm14428_vm1, %v16874_v16 }
 0xb1e   :  { %13684 = vmatmul.mubr.msk.f32.vlgmr.msra.gmra.mrb[112].mxu1 %vm774_vm2, %v6770_v9 }
 0xb1f   :  { %v6844_v60 = vpop.permute.xlu0 %6843  ;;  %13693 = vmatprep.mubr.msk.f32.mxu1 %vm14428_vm1, %v16874_v16 }
 0xb21   :  { %v6842_v38 = vpop.permute.xlu1 %6841 }
 0xb23   :  { %v6832_v48 = vpop.permute.xlu0 %6831 }
 0xb24   :  { %13697 = vmatpush3.xpose.msk.msra.mxu0 %vm774_vm2, %v6832_v48 }
 0xb25   :  { %v6830_v35 = vpop.permute.xlu1 %6829  ;;  %13706 = vmatprep.subr.mxu0 %v16874_v16 }
 0xb26   :  { %13692 = vmatpush3.xpose.msk.msra.mxu1 %vm774_vm2, %v6830_v35 }
 0xb27   :  { %v6776_v42 = vpop.permute.xlu0 %6775  ;;  %13701 = vmatprep.subr.mxu1 %v16874_v16 }
 0xb28   :  { %13699 = vmatmul.mubr.msk.f32.vlgmr.msra.gmra.mrb[106].mxu0 %vm774_vm2, %v6776_v42 }
 0xb29   :  { %13707 = vmatpush3.xpose.msk.msra.mxu0 %vm774_vm2, %v6836_v30  ;;  %v6774_v13 = vpop.permute.xlu1 %6773  ;;  %13708 = vmatprep.mubr.msk.f32.mxu0 %vm14428_vm1, %v16874_v16 }
 0xb2a   :  { %13694 = vmatmul.mubr.msk.f32.vlgmr.msra.gmra.mrb[114].mxu1 %vm774_vm2, %v6774_v13  ;;  %13716 = vmatprep.subr.mxu0 %v16874_v16 }
 0xb2b   :  { %13702 = vmatpush3.xpose.msk.msra.mxu1 %vm774_vm2, %v6834_v1  ;;  %v6788_v36 = vpop.permute.xlu0 %6787  ;;  %13703 = vmatprep.mubr.msk.f32.mxu1 %vm14428_vm1, %v16874_v16 }
 0xb2c   :  { %13709 = vmatmul.mubr.msk.f32.vlgmr.msra.gmra.mrb[108].mxu0 %vm774_vm2, %v6780_v11  ;;  %13711 = vmatprep.subr.mxu1 %v16874_v16 }
 0xb2d   :  { %13717 = vmatpush3.xpose.msk.msra.mxu0 %vm774_vm2, %v6840_v0  ;;  %v6786_v41 = vpop.permute.xlu1 %6785  ;;  %13718 = vmatprep.mubr.msk.f32.mxu0 %vm14428_vm1, %v16874_v16 }
 0xb2e   :  { %13704 = vmatmul.mubr.msk.f32.vlgmr.msra.gmra.mrb[116].mxu1 %vm774_vm2, %v6778_v33  ;;  %13726 = vmatprep.subr.mxu0 %v16874_v16 }
 0xb2f   :  { %13712 = vmatpush3.xpose.msk.msra.mxu1 %vm774_vm2, %v6838_v24  ;;  %v6848_v15 = vpop.permute.xlu0 %6847  ;;  %13713 = vmatprep.mubr.msk.f32.mxu1 %vm14428_vm1, %v16874_v16 }
 0xb30   :  { %13719 = vmatmul.mubr.msk.f32.vlgmr.msra.gmra.mrb[110].mxu0 %vm774_vm2, %v6784_v2  ;;  %13721 = vmatprep.subr.mxu1 %v16874_v16 }
 0xb31   :  { %13727 = vmatpush3.xpose.msk.msra.mxu0 %vm774_vm2, %v6844_v60  ;;  %v6850_v43 = vpop.permute.xlu1 %6849  ;;  %13728 = vmatprep.mubr.msk.f32.mxu0 %vm14428_vm1, %v16874_v16 }
 0xb32   :  { %13714 = vmatmul.mubr.msk.f32.vlgmr.msra.gmra.mrb[118].mxu1 %vm774_vm2, %v6782_v54  ;;  %13736 = vmatprep.subr.mxu0 %v16874_v16 }
 0xb33   :  { %13722 = vmatpush3.xpose.msk.msra.mxu1 %vm774_vm2, %v6842_v38  ;;  %v6792_v4 = vpop.permute.xlu0 %6791  ;;  %13723 = vmatprep.mubr.msk.f32.mxu1 %vm14428_vm1, %v16874_v16 }
 0xb34   :  { %13729 = vmatmul.mubr.msk.f32.vlgmr.msra.gmra.mrb[112].mxu0 %vm774_vm2, %v6788_v36  ;;  %13731 = vmatprep.subr.mxu1 %v16874_v16 }
 0xb35   :  { %13737 = vmatpush3.xpose.msk.msra.mxu0 %vm774_vm2, %v6848_v15  ;;  %v6846_v39 = vpop.permute.xlu1 %6845  ;;  %13738 = vmatprep.mubr.msk.f32.mxu0 %vm14428_vm1, %v16874_v16 }
 0xb36   :  { %13724 = vmatmul.mubr.msk.f32.vlgmr.msra.gmra.mrb[120].mxu1 %vm774_vm2, %v6786_v41  ;;  %13746 = vmatprep.subr.mxu0 %v16874_v16 }
 0xb37   :  { %13732 = vmatpush3.xpose.msk.msra.mxu1 %vm774_vm2, %v6846_v39  ;;  %v6852_v31 = vpop.permute.xlu0 %6851  ;;  %13733 = vmatprep.mubr.msk.f32.mxu1 %vm14428_vm1, %v16874_v16 }
 0xb38   :  { %13739 = vmatmul.mubr.msk.f32.vlgmr.msra.gmra.mrb[114].mxu0 %vm774_vm2, %v6792_v4  ;;  %13741 = vmatprep.subr.mxu1 %v16874_v16 }
 0xb39   :  { %13747 = vmatpush3.xpose.msk.msra.mxu0 %vm774_vm2, %v6852_v31  ;;  %v6790_v23 = vpop.permute.xlu1 %6789  ;;  %13748 = vmatprep.mubr.msk.f32.mxu0 %vm14428_vm1, %v16874_v16 }
 0xb3a   :  { %13734 = vmatmul.mubr.msk.f32.vlgmr.msra.gmra.mrb[122].mxu1 %vm774_vm2, %v6790_v23  ;;  %13756 = vmatprep.subr.mxu0 %v16874_v16 }
 0xb3b   :  { %13742 = vmatpush3.xpose.msk.msra.mxu1 %vm774_vm2, %v6850_v43  ;;  %v6796_v57 = vpop.permute.xlu0 %6795  ;;  %13743 = vmatprep.mubr.msk.f32.mxu1 %vm14428_vm1, %v16874_v16 }
 0xb3c   :  { %13749 = vmatmul.mubr.msk.f32.vlgmr.msra.gmra.mrb[116].mxu0 %vm774_vm2, %v6796_v57  ;;  %13751 = vmatprep.subr.mxu1 %v16874_v16 }
 0xb3d   :  { %v6794_v37 = vpop.permute.xlu1 %6793  ;;  %13758 = vmatprep.mubr.msk.f32.mxu0 %vm14428_vm1, %v16874_v16 }
 0xb3e   :  { %13744 = vmatmul.mubr.msk.f32.vlgmr.msra.gmra.mrb[124].mxu1 %vm774_vm2, %v6794_v37 }
 0xb3f   :  { %v6856_v18 = vpop.permute.xlu0 %6855  ;;  %13753 = vmatprep.mubr.msk.f32.mxu1 %vm14428_vm1, %v16874_v16 }
 0xb40   :  { %13757 = vmatpush3.xpose.msk.msra.mxu0 %vm774_vm2, %v6856_v18 }
 0xb41   :  { %v6854_v40 = vpop.permute.xlu1 %6853  ;;  %13766 = vmatprep.subr.mxu0 %v16874_v16 }
 0xb42   :  { %13752 = vmatpush3.xpose.msk.msra.mxu1 %vm774_vm2, %v6854_v40 }
 0xb43   :  { %v6800_v14 = vpop.permute.xlu0 %6799  ;;  %13761 = vmatprep.subr.mxu1 %v16874_v16 }
 0xb44   :  { %13759 = vmatmul.mubr.msk.f32.vlgmr.msra.gmra.mrb[118].mxu0 %vm774_vm2, %v6800_v14 }
 0xb45   :  { %v6798_v27 = vpop.permute.xlu1 %6797  ;;  %13768 = vmatprep.mubr.msk.f32.mxu0 %vm14428_vm1, %v16874_v16 }
 0xb46   :  { %13754 = vmatmul.mubr.msk.f32.vlgmr.msra.gmra.mrb[126].mxu1 %vm774_vm2, %v6798_v27 }
 0xb47   :  { %v6860_v34 = vpop.permute.xlu0 %6859  ;;  %13763 = vmatprep.mubr.msk.f32.mxu1 %vm14428_vm1, %v16874_v16 }
 0xb48   :  { %13767 = vmatpush3.xpose.msk.msra.mxu0 %vm774_vm2, %v6860_v34 }
 0xb49   :  { %v6858_v26 = vpop.permute.xlu1 %6857  ;;  %13776 = vmatprep.subr.mxu0 %v16874_v16 }
 0xb4a   :  { %13762 = vmatpush3.xpose.msk.msra.mxu1 %vm774_vm2, %v6858_v26 }
 0xb4b   :  { %v6804_v3 = vpop.permute.xlu0 %6803  ;;  %13771 = vmatprep.subr.mxu1 %v16874_v16 }
 0xb4c   :  { %13769 = vmatmul.mubr.msk.f32.vlgmr.msra.gmra.mrb[120].mxu0 %vm774_vm2, %v6804_v3 }
 0xb4d   :  { %v6802_v51 = vpop.permute.xlu1 %6801  ;;  %13778 = vmatprep.mubr.msk.f32.mxu0 %vm14428_vm1, %v16874_v16 }
 0xb4e   :  { %13764 = vmatmul.mubr.msk.f32.vlgmr.msra.gmra.mrb[128].mxu1 %vm774_vm2, %v6802_v51 }
 0xb4f   :  { %v6864_v56 = vpop.permute.xlu0 %6863  ;;  %13773 = vmatprep.mubr.msk.f32.mxu1 %vm14428_vm1, %v16874_v16 }
 0xb50   :  { %13777 = vmatpush3.xpose.msk.msra.mxu0 %vm774_vm2, %v6864_v56 }
 0xb51   :  { %v6862_v45 = vpop.permute.xlu1 %6861  ;;  %13786 = vmatprep.subr.mxu0 %v16874_v16 }
 0xb52   :  { %13772 = vmatpush3.xpose.msk.msra.mxu1 %vm774_vm2, %v6862_v45 }
 0xb53   :  { %v6808_v6 = vpop.permute.xlu0 %6807  ;;  %13781 = vmatprep.subr.mxu1 %v16874_v16 }
 0xb54   :  { %13779 = vmatmul.mubr.msk.f32.vlgmr.msra.gmra.mrb[122].mxu0 %vm774_vm2, %v6808_v6 }
 0xb55   :  { %13787 = vmatpush3.msra.mxu0 %v15984_v17  ;;  %v6806_v59 = vpop.permute.xlu1 %6805  ;;  %13788 = vmatprep.mubr.msk.f32.mxu0 %vm14428_vm1, %v16874_v16 }
 0xb56   :  { %13774 = vmatmul.mubr.msk.f32.vlgmr.msra.gmra.mrb[130].mxu1 %vm774_vm2, %v6806_v59  ;;  %13796 = vmatprep.subr.mxu0 %v16874_v16 }
 0xb57   :  { %13782 = vmatpush3.msra.mxu1 %v15980_v22  ;;  %13783 = vmatprep.mubr.msk.f32.mxu1 %vm14428_vm1, %v16874_v16  ;;  %v16208_v31 = vpop.permute.xlu0 %6873 }
 0xb58   :  { %13791 = vmatprep.subr.mxu1 %v16874_v16 }
 0xb59   :  { %v16204_v4 = vpop.permute.xlu1 %6875 }
 0xb5a   :  { %v7089_v47 = vpop.f32.mrb[92].mxu0 }
 0xb5b   :  { %v16166_v10 = vmul.f32 0.5, %v7089_v47  ;;  %v13630_v61 = vpop.f32.mrb[93].mxu0  ;;  %v7015_v53 = vpop.f32.mrb[100].mxu1 }
 0xb5c   :  { %v16168_v49 = vmul.f32 0.5, %v7015_v53  ;;  %v13625_v62 = vpop.f32.mrb[101].mxu1  ;;  %v16212_v57 = vpop.permute.xlu0 %6897 }
 0xb5d   :  { %v9348_v7 = vsel %vm3175_vm3, %v16166_v10, -inf  ;;  %v16210_v23 = vpop.permute.xlu1 %6899 }
 0xb5e   :  { %9349 = vmax.xlane.f32.xlu0 %v9348_v7  ;;  %v9345_v22 = vsel %vm3175_vm3, %v16168_v49, -inf }
 0xb5f   :  { %v7237_v17 = vpop.f32.mrb[94].mxu0  ;;  %9346 = vmax.xlane.f32.xlu1 %v9345_v22 }
 0xb60   :  { %v16174_v29 = vmul.f32 0.5, %v7237_v17  ;;  %v13640_v19 = vpop.f32.mrb[95].mxu0  ;;  %v7163_v20 = vpop.f32.mrb[102].mxu1 }
 0xb61   :  { %v16176_v63 = vmul.f32 0.5, %v7163_v20  ;;  %v13635_v30 = vpop.f32.mrb[103].mxu1  ;;  %v16214_v37 = vpop.permute.xlu1 %6923 }
 0xb62   :  { %v9354_v1 = vsel %vm3175_vm3, %v16174_v29, -inf  ;;  %16883 = vst [vmem:[#allocation15_spill] sm:$0xff] %v16214_v37  ;;  %v16216_v40 = vpop.permute.xlu0 %6921 }
 0xb63   :  { %v9351_v11 = vsel %vm3175_vm3, %v16176_v63, -inf  ;;  %9355 = vmax.xlane.f32.xlu1 %v9354_v1  ;;  %16884 = vst [vmem:[#allocation19_spill] sm:$0xff] %v16216_v40 }
 0xb64   :  { %v7385_v33 = vpop.f32.mrb[96].mxu0  ;;  %9352 = vmax.xlane.f32.xlu0 %v9351_v11 }
 0xb65   :  { %v16182_v21 = vmul.f32 0.5, %v7385_v33  ;;  %v13650_v52 = vpop.f32.mrb[97].mxu0  ;;  %v7311_v5 = vpop.f32.mrb[104].mxu1 }
 0xb66   :  { %v16184_v25 = vmul.f32 0.5, %v7311_v5  ;;  %v13645_v0 = vpop.f32.mrb[105].mxu1  ;;  %v16224_v56 = vpop.permute.xlu1 %6879 }
 0xb67   :  { %v9360_v24 = vsel %vm3175_vm3, %v16182_v21, -inf  ;;  %v16228_v6 = vpop.permute.xlu0 %6903 }
 0xb68   :  { %9361 = vmax.xlane.f32.xlu1 %v9360_v24  ;;  %v9357_v54 = vsel %vm3175_vm3, %v16184_v25, -inf }
 0xb69   :  { %v7533_v2 = vpop.f32.mrb[98].mxu0  ;;  %9358 = vmax.xlane.f32.xlu0 %v9357_v54 }
 0xb6a   :  { %v16190_v44 = vmul.f32 0.5, %v7533_v2  ;;  %v13660_v12 = vpop.f32.mrb[99].mxu0  ;;  %v7459_v46 = vpop.f32.mrb[106].mxu1 }
 0xb6b   :  { %v16192_v9 = vmul.f32 0.5, %v7459_v46  ;;  %v13655_v60 = vpop.f32.mrb[107].mxu1  ;;  %v16230_v59 = vpop.permute.xlu1 %6901 }
 0xb6c   :  { %v9366_v38 = vsel %vm3175_vm3, %v16190_v44, -inf  ;;  %v16232_v47 = vpop.permute.xlu0 %6927 }
 0xb6d   :  { %9367 = vmax.xlane.f32.xlu1 %v9366_v38  ;;  %v9363_v48 = vsel %vm3175_vm3, %v16192_v9, -inf  ;;  %16885 = vst [vmem:[#allocation16_spill] sm:$0xff] %v16232_v47 }
 0xb6e   :  { %9364 = vmax.xlane.f32.xlu0 %v9363_v48 }
 0xb6f   :  { %v16234_v53 = vpop.permute.xlu1 %6925 }
 0xb70   :  { %16886 = vst [vmem:[#allocation18_spill] sm:$0xff] %v16234_v53  ;;  %v16238_v22 = vpop.permute.xlu0 %6877 }
 0xb73   :  { %v16246_v11 = vpop.permute.xlu1 %6883 }
 0xb74   :  { %v16248_v33 = vpop.permute.xlu0 %6881 }
 0xb77   :  { %v16250_v5 = vpop.permute.xlu1 %6907 }
 0xb78   :  { %16887 = vst [vmem:[#allocation13_spill] sm:$0xff] %v16250_v5  ;;  %v16254_v54 = vpop.permute.xlu0 %6905 }
 0xb79   :  { %16888 = vst [vmem:[#allocation12_spill] sm:$0xff] %v16254_v54 }
 0xbce   :  { %v7681_v35 = vpop.f32.mrb[100].mxu0 }
 0xbcf   :  { %v16198_v42 = vmul.f32 0.5, %v7681_v35  ;;  %v7607_v13 = vpop.f32.mrb[108].mxu1  ;;  %v13670_v36 = vpop.f32.mrb[101].mxu0 }
 0xbd0   :  { %v16200_v41 = vmul.f32 0.5, %v7607_v13  ;;  %v13665_v15 = vpop.f32.mrb[109].mxu1 }
 0xbd1   :  { %v9372_v43 = vsel %vm3175_vm3, %v16198_v42, -inf  ;;  %v16264_v15 = vpop.permute.xlu1 %6885 }
 0xbd2   :  { %9373 = vmax.xlane.f32.xlu1 %v9372_v43  ;;  %v9369_v39 = vsel %vm3175_vm3, %v16200_v41, -inf }
 0xbd3   :  { %9370 = vmax.xlane.f32.xlu0 %v9369_v39 }
 0xbdf   :  { %v7829_v18 = vpop.f32.mrb[102].mxu0 }
 0xbe0   :  { %v16218_v14 = vmul.f32 0.5, %v7829_v18  ;;  %v13680_v27 = vpop.f32.mrb[103].mxu0 }
 0xbe1   :  { %v7755_v34 = vpop.f32.mrb[110].mxu1 }
 0xbe2   :  { %v16220_v26 = vmul.f32 0.5, %v7755_v34  ;;  %v13675_v3 = vpop.f32.mrb[111].mxu1  ;;  %v9378_v51 = vsel %vm3175_vm3, %v16218_v14, -inf  ;;  %v16270_v34 = vpop.permute.xlu0 %6887 }
 0xbe3   :  { %9379 = vmax.xlane.f32.xlu1 %v9378_v51 }
 0xbe4   :  { %v9375_v45 = vsel %vm3175_vm3, %v16220_v26, -inf }
 0xbe5   :  { %9376 = vmax.xlane.f32.xlu0 %v9375_v45 }
 0xbef   :  { %v7977_v61 = vpop.f32.mrb[104].mxu0 }
 0xbf0   :  { %v16236_v62 = vmul.f32 0.5, %v7977_v61  ;;  %v13690_v7 = vpop.f32.mrb[105].mxu0 }
 0xbf1   :  { %v7903_v17 = vpop.f32.mrb[112].mxu1 }
 0xbf2   :  { %v16240_v19 = vmul.f32 0.5, %v7903_v17  ;;  %v13685_v20 = vpop.f32.mrb[113].mxu1  ;;  %v9384_v30 = vsel %vm3175_vm3, %v16236_v62, -inf }
 0xbf3   :  { %9385 = vmax.xlane.f32.xlu1 %v9384_v30 }
 0xbf4   :  { %v9381_v1 = vsel %vm3175_vm3, %v16240_v19, -inf }
 0xbf5   :  { %9382 = vmax.xlane.f32.xlu0 %v9381_v1  ;;  %v16280_v1 = vpop.permute.xlu1 %6909 }
 0xbf6   :  { %16889 = vst [vmem:[#allocation17_spill] sm:$0xff] %v16280_v1 }
 0xbfb   :  { %v8125_v52 = vpop.f32.mrb[106].mxu0 }
 0xbfc   :  { %v16252_v0 = vmul.f32 0.5, %v8125_v52  ;;  %v13700_v24 = vpop.f32.mrb[107].mxu0 }
 0xbfd   :  { %v8051_v2 = vpop.f32.mrb[114].mxu1 }
 0xbfe   :  { %v16256_v12 = vmul.f32 0.5, %v8051_v2  ;;  %v13695_v46 = vpop.f32.mrb[115].mxu1  ;;  %v9390_v60 = vsel %vm3175_vm3, %v16252_v0, -inf }
 0xbff   :  { %v8273_v38 = vpop.f32.mrb[108].mxu0  ;;  %9391 = vmax.xlane.f32.xlu1 %v9390_v60  ;;  %v16286_v60 = vpop.permute.xlu0 %6911 }
 0xc00   :  { %v16260_v48 = vmul.f32 0.5, %v8273_v38  ;;  %v13710_v35 = vpop.f32.mrb[109].mxu0  ;;  %v9387_v13 = vsel %vm3175_vm3, %v16256_v12, -inf  ;;  %16890 = vst [vmem:[#allocation14_spill] sm:$0xff] %v16286_v60 }
 0xc01   :  { %9388 = vmax.xlane.f32.xlu0 %v9387_v13  ;;  %v8199_v36 = vpop.f32.mrb[116].mxu1 }
 0xc02   :  { %v16266_v43 = vmul.f32 0.5, %v8199_v36  ;;  %v13705_v39 = vpop.f32.mrb[117].mxu1  ;;  %v9396_v18 = vsel %vm3175_vm3, %v16260_v48, -inf }
 0xc03   :  { %v8421_v27 = vpop.f32.mrb[110].mxu0  ;;  %9397 = vmax.xlane.f32.xlu1 %v9396_v18  ;;  %v9347_v39 = vpop.xlane.xlu1 %9346 }
 0xc04   :  { %v16272_v3 = vmul.f32 0.5, %v8421_v27  ;;  %v13720_v51 = vpop.f32.mrb[111].mxu0  ;;  %v9393_v45 = vsel %vm3175_vm3, %v16266_v43, -inf  ;;  %v9441_v47 = vsub.f32 %v16168_v49, %v9347_v39 }
 0xc05   :  { %9394 = vmax.xlane.f32.xlu0 %v9393_v45  ;;  %v8347_v61 = vpop.f32.mrb[118].mxu1 }
 0xc06   :  { %v16276_v7 = vmul.f32 0.5, %v8347_v61  ;;  %v13715_v17 = vpop.f32.mrb[119].mxu1  ;;  %v9402_v20 = vsel %vm3175_vm3, %v16272_v3, -inf  ;;  %v9350_v61 = vpop.xlane.xlu0 %9349  ;;  %v9473_v53 = vmul.f32 1.442695, %v9441_v47 }
 0xc07   :  { %v8569_v30 = vpop.f32.mrb[112].mxu0  ;;  %9403 = vmax.xlane.f32.xlu1 %v9402_v20 }
 0xc08   :  { %v16282_v52 = vmul.f32 0.5, %v8569_v30  ;;  %v13730_v24 = vpop.f32.mrb[113].mxu0  ;;  %v9399_v2 = vsel %vm3175_vm3, %v16276_v7, -inf }
 0xc09   :  { %9400 = vmax.xlane.f32.xlu0 %v9399_v2  ;;  %v8495_v46 = vpop.f32.mrb[120].mxu1 }
 0xc0a   :  { %v16288_v38 = vmul.f32 0.5, %v8495_v46  ;;  %v13725_v35 = vpop.f32.mrb[121].mxu1  ;;  %v9408_v13 = vsel %vm3175_vm3, %v16282_v52, -inf }
 0xc0b   :  { %v8717_v36 = vpop.f32.mrb[114].mxu0  ;;  %9409 = vmax.xlane.f32.xlu1 %v9408_v13  ;;  %v9442_v13 = vsub.f32 %v16166_v10, %v9350_v61 }
 0xc0c   :  { %v16292_v18 = vmul.f32 0.5, %v8717_v36  ;;  %v13740_v27 = vpop.f32.mrb[115].mxu0  ;;  %v9405_v51 = vsel %vm3175_vm3, %v16288_v38, -inf }
 0xc0d   :  { %9406 = vmax.xlane.f32.xlu0 %v9405_v51  ;;  %v8643_v45 = vpop.f32.mrb[122].mxu1  ;;  %v9356_v27 = vpop.xlane.xlu1 %9355 }
 0xc0e   :  { %v16296_v17 = vmul.f32 0.5, %v8643_v45  ;;  %v13735_v20 = vpop.f32.mrb[123].mxu1  ;;  %v9414_v30 = vsel %vm3175_vm3, %v16292_v18, -inf }
 0xc0f   :  { %v8865_v24 = vpop.f32.mrb[116].mxu0  ;;  %9415 = vmax.xlane.f32.xlu1 %v9414_v30  ;;  %v9353_v30 = vpop.xlane.xlu0 %9352 }
 0xc10   :  { %v16300_v2 = vmul.f32 0.5, %v8865_v24  ;;  %v13750_v46 = vpop.f32.mrb[117].mxu0  ;;  %v9411_v35 = vsel %vm3175_vm3, %v16296_v17, -inf }
 0xc11   :  { %9412 = vmax.xlane.f32.xlu0 %v9411_v35  ;;  %v8791_v36 = vpop.f32.mrb[124].mxu1  ;;  %v9475_v46 = vmul.f32 1.442695, %v9442_v13  ;;  %v9362_v61 = vpop.xlane.xlu1 %9361  ;;  %v9443_v13 = vsub.f32 %v16176_v63, %v9353_v30 }
 0xc12   :  { %v16305_v51 = vmul.f32 0.5, %v8791_v36  ;;  %v13745_v45 = vpop.f32.mrb[125].mxu1  ;;  %v9420_v20 = vsel %vm3175_vm3, %v16300_v2, -inf }
 0xc13   :  { %9421 = vmax.xlane.f32.xlu1 %v9420_v20  ;;  %14199 = vpow2.f32 %v9475_v46  ;;  %v9444_v45 = vsub.f32 %v16174_v29, %v9356_v27  ;;  %v9359_v40 = vpop.xlane.xlu0 %9358  ;;  %v9477_v27 = vmul.f32 1.442695, %v9443_v13 }
 0xc14   :  { %v9417_v24 = vsel %vm3175_vm3, %v16305_v51, -inf  ;;  %14201 = vpow2.f32 %v9473_v53 }
 0xc15   :  { %9418 = vmax.xlane.f32.xlu0 %v9417_v24  ;;  %v9479_v20 = vmul.f32 1.442695, %v9444_v45  ;;  %v9446_v24 = vsub.f32 %v16182_v21, %v9362_v61  ;;  %v9368_v29 = vpop.xlane.xlu1 %9367 }
 0xc16   :  { %v9448_v63 = vsub.f32 %v16190_v44, %v9368_v29 }
 0xc17   :  { %v9013_v10 = vpop.f32.mrb[118].mxu0  ;;  %14203 = vpow2.f32 %v9479_v20  ;;  %v9483_v53 = vmul.f32 1.442695, %v9446_v24 }
 0xc18   :  { %v16312_v35 = vmul.f32 0.5, %v9013_v10  ;;  %v13760_v36 = vpop.f32.mrb[119].mxu0  ;;  %v9365_v10 = vpop.xlane.xlu0 %9364  ;;  %14205 = vpow2.f32 %v9477_v27  ;;  %v9487_v44 = vmul.f32 1.442695, %v9448_v63 }
 0xc19   :  { %v8939_v37 = vpop.f32.mrb[126].mxu1  ;;  %14207 = vpow2.f32 %v9483_v53 }
 0xc1a   :  { %v16315_v1 = vmul.f32 0.5, %v8939_v37  ;;  %v13755_v49 = vpop.f32.mrb[127].mxu1  ;;  %v9426_v39 = vsel %vm3175_vm3, %v16312_v35, -inf  ;;  %v9445_v37 = vsub.f32 %v16184_v25, %v9359_v40  ;;  %v9447_v40 = vsub.f32 %v16192_v9, %v9365_v10 }
 0xc1b   :  { %9427 = vmax.xlane.f32.xlu1 %v9426_v39 }
 0xc1c   :  { %v9423_v47 = vsel %vm3175_vm3, %v16315_v1, -inf  ;;  %v9481_v25 = vmul.f32 1.442695, %v9445_v37  ;;  %v9485_v24 = vmul.f32 1.442695, %v9447_v40 }
 0xc1d   :  { %9424 = vmax.xlane.f32.xlu0 %v9423_v47  ;;  %v16331_v61 = vpop.eup %14199 }
 0xc1e   :  { %v16336_v47 = vpop.eup %14201  ;;  %v9540_v20 = vsel %vm3175_vm3, %v16331_v61, 0.0  ;;  %14209 = vpow2.f32 %v9481_v25 }
 0xc1f   :  { %v9161_v46 = vpop.f32.mrb[120].mxu0  ;;  %v9537_v9 = vsel %vm3175_vm3, %v16336_v47, 0.0  ;;  %14211 = vpow2.f32 %v9487_v44 }
 0xc20   :  { %v16324_v36 = vmul.f32 0.5, %v9161_v46  ;;  %v13770_v49 = vpop.f32.mrb[121].mxu0  ;;  %14213 = vpow2.f32 %v9485_v24 }
 0xc21   :  { %v9087_v30 = vpop.f32.mrb[128].mxu1  ;;  %v16348_v63 = vpop.eup %14203 }
 0xc22   :  { %v16327_v39 = vmul.f32 0.5, %v9087_v30  ;;  %v13765_v45 = vpop.f32.mrb[129].mxu1  ;;  %v9432_v21 = vsel %vm3175_vm3, %v16324_v36, -inf }
 0xc23   :  { %9433 = vmax.xlane.f32.xlu1 %v9432_v21  ;;  %v16352_v45 = vpop.eup %14205  ;;  %v9546_v21 = vsel %vm3175_vm3, %v16348_v63, 0.0 }
 0xc24   :  { %v9429_v13 = vsel %vm3175_vm3, %v16327_v39, -inf  ;;  %v16356_v25 = vpop.eup %14207  ;;  %v9543_v40 = vsel %vm3175_vm3, %v16352_v45, 0.0 }
 0xc25   :  { %9430 = vmax.xlane.f32.xlu0 %v9429_v13  ;;  %v9552_v44 = vsel %vm3175_vm3, %v16356_v25, 0.0 }
 0xc27   :  { %v9309_v29 = vpop.f32.mrb[122].mxu0  ;;  %9541 = vadd.xlane.f32.xlu1 %v9540_v20 }
 0xc28   :  { %v16340_v27 = vmul.f32 0.5, %v9309_v29  ;;  %v13780_v37 = vpop.f32.mrb[123].mxu0  ;;  %v16360_v13 = vpop.eup %14209 }
 0xc29   :  { %9538 = vadd.xlane.f32.xlu0 %v9537_v9  ;;  %v9235_v46 = vpop.f32.mrb[130].mxu1  ;;  %v16364_v20 = vpop.eup %14211  ;;  %v9549_v24 = vsel %vm3175_vm3, %v16360_v13, 0.0 }
 0xc2a   :  { %v16344_v10 = vmul.f32 0.5, %v9235_v46  ;;  %v13775_v49 = vpop.f32.mrb[131].mxu1  ;;  %v9438_v53 = vsel %vm3175_vm3, %v16340_v27, -inf  ;;  %v16368_v29 = vpop.eup %14213  ;;  %v9558_v37 = vsel %vm3175_vm3, %v16364_v20, 0.0 }
 0xc2b   :  { %9439 = vmax.xlane.f32.xlu1 %v9438_v53  ;;  %v9555_v9 = vsel %vm3175_vm3, %v16368_v29, 0.0 }
 0xc2c   :  { %v9435_v30 = vsel %vm3175_vm3, %v16344_v10, -inf }
 0xc2d   :  { %9436 = vmax.xlane.f32.xlu0 %v9435_v30 }
 0xc2f   :  { %9547 = vadd.xlane.f32.xlu1 %v9546_v21 }
 0xc31   :  { %9544 = vadd.xlane.f32.xlu0 %v9543_v40 }
 0xc33   :  { %9553 = vadd.xlane.f32.xlu1 %v9552_v44 }
 0xc35   :  { %9550 = vadd.xlane.f32.xlu0 %v9549_v24 }
 0xc37   :  { %9559 = vadd.xlane.f32.xlu1 %v9558_v37 }
 0xc39   :  { %9556 = vadd.xlane.f32.xlu0 %v9555_v9 }
 0xc5f   :  { %v9374_v46 = vpop.xlane.xlu1 %9373 }
 0xc60   :  { %v9450_v49 = vsub.f32 %v16198_v42, %v9374_v46  ;;  %v9371_v53 = vpop.xlane.xlu0 %9370 }
 0xc61   :  { %v9449_v30 = vsub.f32 %v16200_v41, %v9371_v53 }
 0xc62   :  { %v9491_v21 = vmul.f32 1.442695, %v9450_v49 }
 0xc63   :  { %v9489_v40 = vmul.f32 1.442695, %v9449_v30 }
 0xc64   :  { %14215 = vpow2.f32 %v9491_v21 }
 0xc65   :  { %14217 = vpow2.f32 %v9489_v40 }
 0xc6e   :  { %v16376_v44 = vpop.eup %14215 }
 0xc6f   :  { %v16378_v24 = vpop.eup %14217  ;;  %v9564_v37 = vsel %vm3175_vm3, %v16376_v44, 0.0 }
 0xc70   :  { %v9380_v60 = vpop.xlane.xlu1 %9379  ;;  %9565 = vadd.xlane.f32.xlu1 %v9564_v37  ;;  %v9561_v9 = vsel %vm3175_vm3, %v16378_v24, 0.0 }
 0xc71   :  { %v9452_v42 = vsub.f32 %v16218_v14, %v9380_v60  ;;  %9562 = vadd.xlane.f32.xlu0 %v9561_v9 }
 0xc72   :  { %v9377_v41 = vpop.xlane.xlu0 %9376 }
 0xc73   :  { %v9495_v46 = vmul.f32 1.442695, %v9452_v42  ;;  %v9451_v49 = vsub.f32 %v16220_v26, %v9377_v41 }
 0xc75   :  { %14219 = vpow2.f32 %v9495_v46  ;;  %v9493_v53 = vmul.f32 1.442695, %v9451_v49 }
 0xc77   :  { %14221 = vpow2.f32 %v9493_v53 }
 0xc7f   :  { %v16386_v30 = vpop.eup %14219 }
 0xc80   :  { %v9386_v21 = vpop.xlane.xlu1 %9385  ;;  %v9570_v40 = vsel %vm3175_vm3, %v16386_v30, 0.0 }
 0xc81   :  { %v16390_v37 = vpop.eup %14221  ;;  %v9454_v54 = vsub.f32 %v16236_v62, %v9386_v21  ;;  %9571 = vadd.xlane.f32.xlu1 %v9570_v40 }
 0xc82   :  { %v9383_v14 = vpop.xlane.xlu0 %9382  ;;  %v9567_v60 = vsel %vm3175_vm3, %v16390_v37, 0.0 }
 0xc83   :  { %v9499_v9 = vmul.f32 1.442695, %v9454_v54  ;;  %v9453_v26 = vsub.f32 %v16240_v19, %v9383_v14  ;;  %9568 = vadd.xlane.f32.xlu0 %v9567_v60 }
 0xc85   :  { %14223 = vpow2.f32 %v9499_v9  ;;  %v9497_v42 = vmul.f32 1.442695, %v9453_v26 }
 0xc87   :  { %14225 = vpow2.f32 %v9497_v42 }
 0xc8c   :  { %v9392_v41 = vpop.xlane.xlu1 %9391 }
 0xc8d   :  { %v9456_v46 = vsub.f32 %v16252_v0, %v9392_v41 }
 0xc8e   :  { %v9389_v49 = vpop.xlane.xlu0 %9388 }
 0xc8f   :  { %v16397_v53 = vpop.eup %14223  ;;  %v9503_v5 = vmul.f32 1.442695, %v9456_v46  ;;  %v9455_v62 = vsub.f32 %v16256_v12, %v9389_v49 }
 0xc90   :  { %v9398_v21 = vpop.xlane.xlu1 %9397  ;;  %v9576_v40 = vsel %vm3175_vm3, %v16397_v53, 0.0 }
 0xc91   :  { %v16402_v54 = vpop.eup %14225  ;;  %14227 = vpow2.f32 %v9503_v5  ;;  %v9501_v19 = vmul.f32 1.442695, %v9455_v62  ;;  %v9458_v14 = vsub.f32 %v16260_v48, %v9398_v21  ;;  %9577 = vadd.xlane.f32.xlu1 %v9576_v40 }
 0xc92   :  { %v9395_v60 = vpop.xlane.xlu0 %9394  ;;  %v9573_v0 = vsel %vm3175_vm3, %v16402_v54, 0.0 }
 0xc93   :  { %14229 = vpow2.f32 %v9501_v19  ;;  %v9507_v9 = vmul.f32 1.442695, %v9458_v14  ;;  %v9457_v26 = vsub.f32 %v16266_v43, %v9395_v60  ;;  %9574 = vadd.xlane.f32.xlu0 %v9573_v0 }
 0xc94   :  { %v9404_v12 = vpop.xlane.xlu1 %9403 }
 0xc95   :  { %14231 = vpow2.f32 %v9507_v9  ;;  %v9505_v42 = vmul.f32 1.442695, %v9457_v26  ;;  %v9460_v41 = vsub.f32 %v16272_v3, %v9404_v12 }
 0xc96   :  { %v9401_v46 = vpop.xlane.xlu0 %9400 }
 0xc97   :  { %14233 = vpow2.f32 %v9505_v42  ;;  %v9511_v5 = vmul.f32 1.442695, %v9460_v41  ;;  %v9459_v48 = vsub.f32 %v16276_v7, %v9401_v46 }
 0xc98   :  { %v9410_v49 = vpop.xlane.xlu1 %9409 }
 0xc99   :  { %14235 = vpow2.f32 %v9511_v5  ;;  %v9509_v62 = vmul.f32 1.442695, %v9459_v48  ;;  %v9462_v21 = vsub.f32 %v16282_v52, %v9410_v49 }
 0xc9a   :  { %v9407_v40 = vpop.xlane.xlu0 %9406 }
 0xc9b   :  { %v16411_v19 = vpop.eup %14227  ;;  %14237 = vpow2.f32 %v9509_v62  ;;  %v9515_v43 = vmul.f32 1.442695, %v9462_v21  ;;  %v9461_v14 = vsub.f32 %v16288_v38, %v9407_v40 }
 0xc9c   :  { %v9416_v60 = vpop.xlane.xlu1 %9415  ;;  %v9582_v3 = vsel %vm3175_vm3, %v16411_v19, 0.0 }
 0xc9d   :  { %v16416_v0 = vpop.eup %14229  ;;  %14239 = vpow2.f32 %v9515_v43  ;;  %v9513_v7 = vmul.f32 1.442695, %v9461_v14  ;;  %v9464_v9 = vsub.f32 %v16292_v18, %v9416_v60  ;;  %9583 = vadd.xlane.f32.xlu1 %v9582_v3 }
 0xc9e   :  { %v9413_v26 = vpop.xlane.xlu0 %9412  ;;  %v9579_v52 = vsel %vm3175_vm3, %v16416_v0, 0.0 }
 0xc9f   :  { %v16421_v12 = vpop.eup %14231  ;;  %14241 = vpow2.f32 %v9513_v7  ;;  %v9519_v42 = vmul.f32 1.442695, %v9464_v9  ;;  %v9463_v38 = vsub.f32 %v16296_v17, %v9413_v26  ;;  %9580 = vadd.xlane.f32.xlu0 %v9579_v52 }
 0xca0   :  { %v9422_v41 = vpop.xlane.xlu1 %9421  ;;  %v9588_v46 = vsel %vm3175_vm3, %v16421_v12, 0.0 }
 0xca1   :  { %v16426_v5 = vpop.eup %14233  ;;  %14243 = vpow2.f32 %v9519_v42  ;;  %v9517_v18 = vmul.f32 1.442695, %v9463_v38  ;;  %v9466_v48 = vsub.f32 %v16300_v2, %v9422_v41  ;;  %9589 = vadd.xlane.f32.xlu1 %v9588_v46 }
 0xca2   :  { %v9419_v49 = vpop.xlane.xlu0 %9418  ;;  %v9585_v62 = vsel %vm3175_vm3, %v16426_v5, 0.0 }
 0xca3   :  { %v16431_v21 = vpop.eup %14235  ;;  %14245 = vpow2.f32 %v9517_v18  ;;  %v9523_v17 = vmul.f32 1.442695, %v9466_v48  ;;  %v9465_v40 = vsub.f32 %v16305_v51, %v9419_v49  ;;  %9586 = vadd.xlane.f32.xlu0 %v9585_v62 }
 0xca4   :  { %v9594_v43 = vsel %vm3175_vm3, %v16431_v21, 0.0 }
 0xca5   :  { %v16436_v14 = vpop.eup %14237  ;;  %14247 = vpow2.f32 %v9523_v17  ;;  %v9521_v60 = vmul.f32 1.442695, %v9465_v40  ;;  %9595 = vadd.xlane.f32.xlu1 %v9594_v43 }
 0xca6   :  { %v9591_v2 = vsel %vm3175_vm3, %v16436_v14, 0.0 }
 0xca7   :  { %v16440_v3 = vpop.eup %14239  ;;  %14249 = vpow2.f32 %v9521_v60  ;;  %9592 = vadd.xlane.f32.xlu0 %v9591_v2 }
 0xca8   :  { %v9428_v7 = vpop.xlane.xlu1 %9427  ;;  %v9600_v51 = vsel %vm3175_vm3, %v16440_v3, 0.0 }
 0xca9   :  { %v16444_v9 = vpop.eup %14241  ;;  %v9468_v26 = vsub.f32 %v16312_v35, %v9428_v7  ;;  %9601 = vadd.xlane.f32.xlu1 %v9600_v51 }
 0xcaa   :  { %v9597_v52 = vsel %vm3175_vm3, %v16444_v9, 0.0  ;;  %v16455_v18 = vpop.xlane.xlu0 %9424 }
 0xcab   :  { %v16449_v42 = vpop.eup %14243  ;;  %v9527_v38 = vmul.f32 1.442695, %v9468_v26  ;;  %9598 = vadd.xlane.f32.xlu0 %v9597_v52 }
 0xcac   :  { %v9606_v41 = vsel %vm3175_vm3, %v16449_v42, 0.0 }
 0xcad   :  { %v16453_v46 = vpop.eup %14245  ;;  %14251 = vpow2.f32 %v9527_v38 }
 0xcae   :  { %v9603_v48 = vsel %vm3175_vm3, %v16453_v46, 0.0 }
 0xcaf   :  { %v16459_v35 = vpop.eup %14247  ;;  %9604 = vadd.xlane.f32.xlu1 %v9603_v48  ;;  %9607 = vadd.xlane.f32.xlu0 %v9606_v41 }
 0xcb0   :  { %16891 = vst [vmem:[#allocation20_spill] sm:$0xff] %v16459_v35  ;;  %v16461_v49 = vpop.xlane.xlu1 %9433  ;;  %v9612_v62 = vsel %vm3175_vm3, %v16459_v35, 0.0 }
 0xcb1   :  { %v16465_v17 = vpop.eup %14249 }
 0xcb2   :  { %v16467_v40 = vpop.xlane.xlu0 %9430  ;;  %v9609_v43 = vsel %vm3175_vm3, %v16465_v17, 0.0 }
 0xcb3   :  { %9610 = vadd.xlane.f32.xlu1 %v9609_v43  ;;  %9613 = vadd.xlane.f32.xlu0 %v9612_v62 }
 0xcb4   :  { %v9542_v60 = vpop.xlane.xlu1 %9541 }
 0xcb5   :  { %14253 = vrcp.f32 %v9542_v60 }
 0xcb6   :  { %v9539_v2 = vpop.xlane.xlu0 %9538 }
 0xcb7   :  { %v16471_v7 = vpop.eup %14251  ;;  %14255 = vrcp.f32 %v9539_v2 }
 0xcb8   :  { %v16473_v51 = vpop.xlane.xlu1 %9439  ;;  %v9618_v26 = vsel %vm3175_vm3, %v16471_v7, 0.0 }
 0xcb9   :  { %9619 = vadd.xlane.f32.xlu0 %v9618_v26 }
 0xcba   :  { %v16477_v52 = vpop.xlane.xlu0 %9436 }
 0xcbc   :  { %v9548_v38 = vpop.xlane.xlu1 %9547 }
 0xcbd   :  { %14257 = vrcp.f32 %v9548_v38 }
 0xcbe   :  { %v9545_v41 = vpop.xlane.xlu0 %9544 }
 0xcbf   :  { %v14254_v48 = vpop.eup %14253  ;;  %14259 = vrcp.f32 %v9545_v41 }
 0xcc0   :  { %v9554_v62 = vpop.xlane.xlu1 %9553  ;;  %v9666_v43 = vmul.f32 %v14254_v48, %v16331_v61 }
 0xcc1   :  { %14261 = vrcp.f32 %v9554_v62  ;;  %v14256_v60 = vpop.eup %14255 }
 0xcc2   :  { %v9551_v35 = vpop.xlane.xlu0 %9550  ;;  %v9665_v2 = vmul.f32 %v14256_v60, %v16336_v47  ;;  %13789 = vmatmul.mubr.msk.f32.vlgmr.msra.gmra.mrb[124].mxu0 %vm3175_vm3, %v9666_v43 }
 0xcc3   :  { %14263 = vrcp.f32 %v9551_v35  ;;  %13797 = vmatpush3.msra.mxu0 %v15996_v8  ;;  %13798 = vmatprep.mubr.msk.f32.mxu0 %vm14428_vm1, %v16874_v16 }
 0xcc4   :  { %6929 = vrot.lane.b32.xlu1 %v16017_v32, %s14431_s20  ;;  %v9560_v26 = vpop.xlane.xlu1 %9559  ;;  %13784 = vmatmul.mubr.msk.f32.vlgmr.msra.gmra.mrb[132].mxu1 %vm3175_vm3, %v9665_v2 }
 0xcc5   :  { %14265 = vrcp.f32 %v9560_v26  ;;  %13792 = vmatpush3.msra.mxu1 %v16004_v55  ;;  %13806 = vmatprep.subr.mxu0 %v16874_v16 }
 0xcc6   :  { %v9557_v61 = vpop.xlane.xlu0 %9556  ;;  %13793 = vmatprep.mubr.msk.f32.mxu1 %vm14428_vm1, %v16874_v16  ;;  %13801 = vmatprep.subr.mxu1 %v16874_v16 }
 0xcc7   :  { %14267 = vrcp.f32 %v9557_v61  ;;  %v14258_v8 = vpop.eup %14257 }
 0xcc8   :  { %v9668_v47 = vmul.f32 %v14258_v8, %v16348_v63 }
 0xcc9   :  { %v14260_v35 = vpop.eup %14259 }
 0xcca   :  { %v9667_v41 = vmul.f32 %v14260_v35, %v16352_v45  ;;  %13799 = vmatmul.mubr.msk.f32.vlgmr.msra.gmra.mrb[126].mxu0 %vm3175_vm3, %v9668_v47 }
 0xccb   :  { %v14262_v38 = vpop.eup %14261  ;;  %13807 = vmatpush3.msra.mxu0 %v16026_v58  ;;  %13808 = vmatprep.mubr.msk.f32.mxu0 %vm14428_vm1, %v16874_v16 }
 0xccc   :  { %v9670_v55 = vmul.f32 %v14262_v38, %v16356_v25  ;;  %13794 = vmatmul.mubr.msk.f32.vlgmr.msra.gmra.mrb[134].mxu1 %vm3175_vm3, %v9667_v41  ;;  %13816 = vmatprep.subr.mxu0 %v16874_v16 }
 0xccd   :  { %v14264_v48 = vpop.eup %14263  ;;  %13802 = vmatpush3.msra.mxu1 %v16017_v32  ;;  %13803 = vmatprep.mubr.msk.f32.mxu1 %vm14428_vm1, %v16874_v16  ;;  %v9467_v32 = vsub.f32 %v16315_v1, %v16455_v18  ;;  %v9469_v1 = vsub.f32 %v16327_v39, %v16467_v40  ;;  %v9472_v39 = vsub.f32 %v16340_v27, %v16473_v51 }
 0xcce   :  { %v9669_v63 = vmul.f32 %v14264_v48, %v16360_v13  ;;  %13809 = vmatmul.mubr.msk.f32.vlgmr.msra.gmra.mrb[128].mxu0 %vm3175_vm3, %v9670_v55  ;;  %13811 = vmatprep.subr.mxu1 %v16874_v16 }
 0xccf   :  { %v14266_v45 = vpop.eup %14265  ;;  %13817 = vmatpush3.msra.mxu0 %v16037_v28  ;;  %6931 = vrot.lane.b32.xlu0 %v16026_v58, %s14431_s20  ;;  %v9525_v58 = vmul.f32 1.442695, %v9467_v32  ;;  %v9535_v40 = vmul.f32 1.442695, %v9472_v39 }
 0xcd0   :  { %v9672_v25 = vmul.f32 %v14266_v45, %v16364_v20  ;;  %13804 = vmatmul.mubr.msk.f32.vlgmr.msra.gmra.mrb[136].mxu1 %vm3175_vm3, %v9669_v63  ;;  %13818 = vmatprep.mubr.msk.f32.mxu0 %vm14428_vm1, %v16874_v16  ;;  %v9529_v20 = vmul.f32 1.442695, %v9469_v1 }
 0xcd1   :  { %v14268_v62 = vpop.eup %14267  ;;  %13812 = vmatpush3.msra.mxu1 %v16042_v50  ;;  %13826 = vmatprep.subr.mxu0 %v16874_v16  ;;  %14269 = vpow2.f32 %v9525_v58 }
 0xcd2   :  { %v9671_v13 = vmul.f32 %v14268_v62, %v16368_v29  ;;  %13813 = vmatprep.mubr.msk.f32.mxu1 %vm14428_vm1, %v16874_v16  ;;  %13819 = vmatmul.mubr.msk.f32.vlgmr.msra.gmra.mrb[130].mxu0 %vm3175_vm3, %v9672_v25  ;;  %v9471_v29 = vsub.f32 %v16344_v10, %v16477_v52  ;;  %14271 = vpow2.f32 %v9529_v20 }
 0xcd3   :  { %13821 = vmatprep.subr.mxu1 %v16874_v16  ;;  %13827 = vmatpush3.msra.mxu0 %v16204_v4  ;;  %v9470_v4 = vsub.f32 %v16324_v36, %v16461_v49 }
 0xcd4   :  { %13814 = vmatmul.mubr.msk.f32.vlgmr.msra.gmra.mrb[138].mxu1 %vm3175_vm3, %v9671_v13  ;;  %13828 = vmatprep.mubr.msk.f32.mxu0 %vm14428_vm1, %v16874_v16 }
 0xcd5   :  { %13822 = vmatpush3.msra.mxu1 %v16208_v31  ;;  %13836 = vmatprep.subr.mxu0 %v16874_v16  ;;  %v9531_v18 = vmul.f32 1.442695, %v9470_v4  ;;  %v9533_v31 = vmul.f32 1.442695, %v9471_v29 }
 0xcd6   :  { %13823 = vmatprep.mubr.msk.f32.mxu1 %vm14428_vm1, %v16874_v16  ;;  %13831 = vmatprep.subr.mxu1 %v16874_v16 }
 0xcd7   :  { %14273 = vpow2.f32 %v9531_v18 }
 0xcd8   :  { %14275 = vpow2.f32 %v9533_v31  ;;  %v16892_v31 = vld [vmem:[#allocation13_spill] sm:$0xff] }
 0xcd9   :  { %14277 = vpow2.f32 %v9535_v40  ;;  %v16893_v40 = vld [vmem:[#allocation12_spill] sm:$0xff] }
 0xcdb   :  { %v16541_v43 = vpop.eup %14269 }
 0xcdc   :  { %v9615_v36 = vsel %vm3175_vm3, %v16541_v43, 0.0  ;;  %v16545_v49 = vpop.eup %14271 }
 0xcdd   :  { %v9621_v10 = vsel %vm3175_vm3, %v16545_v49, 0.0 }
 0xce1   :  { %v16547_v60 = vpop.eup %14273 }
 0xce2   :  { %v16551_v27 = vpop.eup %14275  ;;  %v9624_v51 = vsel %vm3175_vm3, %v16547_v60, 0.0 }
 0xce3   :  { %v16555_v52 = vpop.eup %14277  ;;  %v9627_v2 = vsel %vm3175_vm3, %v16551_v27, 0.0 }
 0xce4   :  { %v9630_v26 = vsel %vm3175_vm3, %v16555_v52, 0.0 }
 0xce8   :  { %9616 = vadd.xlane.f32.xlu1 %v9615_v36 }
 0xcec   :  { %9622 = vadd.xlane.f32.xlu1 %v9621_v10  ;;  %v16894_v10 = vld [vmem:[#allocation14_spill] sm:$0xff] }
 0xcee   :  { %9625 = vadd.xlane.f32.xlu0 %v9624_v51 }
 0xcf0   :  { %9628 = vadd.xlane.f32.xlu1 %v9627_v2  ;;  %v16895_v2 = vld [vmem:[#allocation17_spill] sm:$0xff] }
 0xcf2   :  { %9631 = vadd.xlane.f32.xlu0 %v9630_v26 }
 0xcfd   :  { %v9566_v61 = vpop.xlane.xlu1 %9565 }
 0xcfe   :  { %14279 = vrcp.f32 %v9566_v61  ;;  %v9563_v8 = vpop.xlane.xlu0 %9562 }
 0xcff   :  { %14281 = vrcp.f32 %v9563_v8 }
 0xd01   :  { %6933 = vrot.lane.b32.xlu1 %v16042_v50, %s14431_s20 }
 0xd08   :  { %v14280_v47 = vpop.eup %14279  ;;  %6935 = vrot.lane.b32.xlu0 %v16037_v28, %s14431_s20 }
 0xd09   :  { %v14282_v35 = vpop.eup %14281  ;;  %v9674_v38 = vmul.f32 %v14280_v47, %v16376_v44  ;;  %v16896_v47 = vld [vmem:[#allocation19_spill] sm:$0xff] }
 0xd0a   :  { %v9673_v41 = vmul.f32 %v14282_v35, %v16378_v24 }
 0xd0b   :  { %13829 = vmatmul.mubr.msk.f32.vlgmr.msra.gmra.mrb[132].mxu0 %vm3175_vm3, %v9674_v38 }
 0xd0c   :  { %13837 = vmatpush3.msra.mxu0 %v16224_v56  ;;  %13824 = vmatmul.mubr.msk.f32.vlgmr.msra.gmra.mrb[140].mxu1 %vm3175_vm3, %v9673_v41  ;;  %v16897_v41 = vld [vmem:[#allocation15_spill] sm:$0xff] }
 0xd0d   :  { %13832 = vmatpush3.msra.mxu1 %v16238_v22  ;;  %13838 = vmatprep.mubr.msk.f32.mxu0 %vm14428_vm1, %v16874_v16 }
 0xd0e   :  { %v9572_v50 = vpop.xlane.xlu1 %9571  ;;  %13846 = vmatprep.subr.mxu0 %v16874_v16  ;;  %13833 = vmatprep.mubr.msk.f32.mxu1 %vm14428_vm1, %v16874_v16 }
 0xd0f   :  { %14283 = vrcp.f32 %v9572_v50  ;;  %13841 = vmatprep.subr.mxu1 %v16874_v16 }
 0xd10   :  { %v9569_v28 = vpop.xlane.xlu0 %9568 }
 0xd11   :  { %14285 = vrcp.f32 %v9569_v28 }
 0xd19   :  { %v14284_v44 = vpop.eup %14283 }
 0xd1a   :  { %v9676_v56 = vmul.f32 %v14284_v44, %v16386_v30 }
 0xd1b   :  { %v14286_v24 = vpop.eup %14285 }
 0xd1c   :  { %v9675_v22 = vmul.f32 %v14286_v24, %v16390_v37  ;;  %13839 = vmatmul.mubr.msk.f32.vlgmr.msra.gmra.mrb[134].mxu0 %vm3175_vm3, %v9676_v56 }
 0xd1d   :  { %13847 = vmatpush3.msra.mxu0 %v16246_v11  ;;  %13848 = vmatprep.mubr.msk.f32.mxu0 %vm14428_vm1, %v16874_v16 }
 0xd1e   :  { %13834 = vmatmul.mubr.msk.f32.vlgmr.msra.gmra.mrb[142].mxu1 %vm3175_vm3, %v9675_v22  ;;  %v9578_v55 = vpop.xlane.xlu1 %9577  ;;  %13856 = vmatprep.subr.mxu0 %v16874_v16 }
 0xd1f   :  { %13842 = vmatpush3.msra.mxu1 %v16248_v33  ;;  %14287 = vrcp.f32 %v9578_v55  ;;  %13843 = vmatprep.mubr.msk.f32.mxu1 %vm14428_vm1, %v16874_v16 }
 0xd20   :  { %v9575_v30 = vpop.xlane.xlu0 %9574  ;;  %13851 = vmatprep.subr.mxu1 %v16874_v16 }
 0xd21   :  { %14289 = vrcp.f32 %v9575_v30 }
 0xd29   :  { %v14288_v37 = vpop.eup %14287 }
 0xd2a   :  { %v9678_v11 = vmul.f32 %v14288_v37, %v16397_v53  ;;  %v9584_v48 = vpop.xlane.xlu1 %9583 }
 0xd2b   :  { %v14290_v63 = vpop.eup %14289  ;;  %14291 = vrcp.f32 %v9584_v48 }
 0xd2c   :  { %v9677_v45 = vmul.f32 %v14290_v63, %v16402_v54  ;;  %v9581_v25 = vpop.xlane.xlu0 %9580  ;;  %13849 = vmatmul.mubr.msk.f32.vlgmr.msra.gmra.mrb[136].mxu0 %vm3175_vm3, %v9678_v11 }
 0xd2d   :  { %14293 = vrcp.f32 %v9581_v25  ;;  %13857 = vmatpush3.msra.mxu0 %v16270_v34  ;;  %13858 = vmatprep.mubr.msk.f32.mxu0 %vm14428_vm1, %v16874_v16 }
 0xd2e   :  { %13844 = vmatmul.mubr.msk.f32.vlgmr.msra.gmra.mrb[144].mxu1 %vm3175_vm3, %v9677_v45  ;;  %v9590_v33 = vpop.xlane.xlu1 %9589  ;;  %13866 = vmatprep.subr.mxu0 %v16874_v16 }
 0xd2f   :  { %13852 = vmatpush3.msra.mxu1 %v16264_v15  ;;  %14295 = vrcp.f32 %v9590_v33  ;;  %13853 = vmatprep.mubr.msk.f32.mxu1 %vm14428_vm1, %v16874_v16 }
 0xd30   :  { %v9587_v53 = vpop.xlane.xlu0 %9586  ;;  %13861 = vmatprep.subr.mxu1 %v16874_v16 }
 0xd31   :  { %14297 = vrcp.f32 %v9587_v53 }
 0xd32   :  { %v9596_v54 = vpop.xlane.xlu1 %9595 }
 0xd33   :  { %14299 = vrcp.f32 %v9596_v54 }
 0xd34   :  { %v9593_v34 = vpop.xlane.xlu0 %9592 }
 0xd35   :  { %v14292_v62 = vpop.eup %14291  ;;  %14301 = vrcp.f32 %v9593_v34 }
 0xd36   :  { %v9680_v32 = vmul.f32 %v14292_v62, %v16411_v19  ;;  %v9602_v13 = vpop.xlane.xlu1 %9601 }
 0xd37   :  { %v14294_v58 = vpop.eup %14293  ;;  %14303 = vrcp.f32 %v9602_v13 }
 0xd38   :  { %v9679_v15 = vmul.f32 %v14294_v58, %v16416_v0  ;;  %v9599_v1 = vpop.xlane.xlu0 %9598  ;;  %13859 = vmatmul.mubr.msk.f32.vlgmr.msra.gmra.mrb[138].mxu0 %vm3175_vm3, %v9680_v32 }
 0xd39   :  { %v14296_v4 = vpop.eup %14295  ;;  %14305 = vrcp.f32 %v9599_v1  ;;  %13867 = vmatpush3.msra.mxu0 %v16210_v23  ;;  %13868 = vmatprep.mubr.msk.f32.mxu0 %vm14428_vm1, %v16874_v16 }
 0xd3a   :  { %v9682_v20 = vmul.f32 %v14296_v4, %v16421_v12  ;;  %13854 = vmatmul.mubr.msk.f32.vlgmr.msra.gmra.mrb[146].mxu1 %vm3175_vm3, %v9679_v15  ;;  %13876 = vmatprep.subr.mxu0 %v16874_v16 }
 0xd3b   :  { %v14298_v19 = vpop.eup %14297  ;;  %13862 = vmatpush3.msra.mxu1 %v16212_v57  ;;  %13863 = vmatprep.mubr.msk.f32.mxu1 %vm14428_vm1, %v16874_v16 }
 0xd3c   :  { %v9681_v0 = vmul.f32 %v14298_v19, %v16426_v5  ;;  %v9605_v29 = vpop.xlane.xlu1 %9604  ;;  %v9608_v18 = vpop.xlane.xlu0 %9607  ;;  %13869 = vmatmul.mubr.msk.f32.vlgmr.msra.gmra.mrb[140].mxu0 %vm3175_vm3, %v9682_v20  ;;  %13871 = vmatprep.subr.mxu1 %v16874_v16 }
 0xd3d   :  { %v14300_v23 = vpop.eup %14299  ;;  %14307 = vrcp.f32 %v9605_v29  ;;  %13877 = vmatpush3.msra.mxu0 %v16228_v6  ;;  %13878 = vmatprep.mubr.msk.f32.mxu0 %vm14428_vm1, %v16874_v16 }
 0xd3e   :  { %v9684_v57 = vmul.f32 %v14300_v23, %v16431_v21  ;;  %14309 = vrcp.f32 %v9608_v18  ;;  %13864 = vmatmul.mubr.msk.f32.vlgmr.msra.gmra.mrb[148].mxu1 %vm3175_vm3, %v9681_v0  ;;  %13886 = vmatprep.subr.mxu0 %v16874_v16 }
 0xd3f   :  { %v14302_v12 = vpop.eup %14301  ;;  %13872 = vmatpush3.msra.mxu1 %v16230_v59  ;;  %13873 = vmatprep.mubr.msk.f32.mxu1 %vm14428_vm1, %v16874_v16 }
 0xd40   :  { %v9683_v5 = vmul.f32 %v14302_v12, %v16436_v14  ;;  %v9611_v39 = vpop.xlane.xlu1 %9610  ;;  %v9614_v6 = vpop.xlane.xlu0 %9613  ;;  %13879 = vmatmul.mubr.msk.f32.vlgmr.msra.gmra.mrb[142].mxu0 %vm3175_vm3, %v9684_v57  ;;  %13881 = vmatprep.subr.mxu1 %v16874_v16 }
 0xd41   :  { %v14304_v21 = vpop.eup %14303  ;;  %14311 = vrcp.f32 %v9611_v39  ;;  %13887 = vmatpush3.msra.mxu0 %v16892_v31  ;;  %13888 = vmatprep.mubr.msk.f32.mxu0 %vm14428_vm1, %v16874_v16 }
 0xd42   :  { %v9686_v59 = vmul.f32 %v14304_v21, %v16440_v3  ;;  %14313 = vrcp.f32 %v9614_v6  ;;  %13874 = vmatmul.mubr.msk.f32.vlgmr.msra.gmra.mrb[150].mxu1 %vm3175_vm3, %v9683_v5  ;;  %13896 = vmatprep.subr.mxu0 %v16874_v16 }
 0xd43   :  { %v14306_v14 = vpop.eup %14305  ;;  %13882 = vmatpush3.msra.mxu1 %v16893_v40  ;;  %13883 = vmatprep.mubr.msk.f32.mxu1 %vm14428_vm1, %v16874_v16 }
 0xd44   :  { %v9685_v36 = vmul.f32 %v14306_v14, %v16444_v9  ;;  %13889 = vmatmul.mubr.msk.f32.vlgmr.msra.gmra.mrb[144].mxu0 %vm3175_vm3, %v9686_v59  ;;  %13891 = vmatprep.subr.mxu1 %v16874_v16  ;;  %v6930_v24 = vpop.permute.xlu1 %6929 }
 0xd45   :  { %13897 = vmatpush3.msra.mxu0 %v16894_v10  ;;  %13898 = vmatprep.mubr.msk.f32.mxu0 %vm14428_vm1, %v16874_v16 }
 0xd46   :  { %13884 = vmatmul.mubr.msk.f32.vlgmr.msra.gmra.mrb[152].mxu1 %vm3175_vm3, %v9685_v36  ;;  %v9620_v3 = vpop.xlane.xlu0 %9619  ;;  %13906 = vmatprep.subr.mxu0 %v16874_v16 }
 0xd47   :  { %v14308_v51 = vpop.eup %14307  ;;  %13892 = vmatpush3.msra.mxu1 %v16895_v2  ;;  %14315 = vrcp.f32 %v9620_v3  ;;  %13893 = vmatprep.mubr.msk.f32.mxu1 %vm14428_vm1, %v16874_v16  ;;  %v12154_v3 = vld [vmem:[#allocation7 + $0x10] sm:$0xff] }
 0xd48   :  { %v14310_v9 = vpop.eup %14309  ;;  %v9687_v26 = vmul.f32 %v14308_v51, %v16453_v46  ;;  %13901 = vmatprep.subr.mxu1 %v16874_v16  ;;  %v16898_v46 = vld [vmem:[#allocation20_spill] sm:$0xff]  ;;  %v12155_v51 = vld [vmem:[#allocation7 + $0x18] sm:$0xff] }
 0xd49   :  { %v9688_v61 = vmul.f32 %v14310_v9, %v16449_v42  ;;  %v16899_v42 = vld [vmem:[#allocation18_spill] sm:$0xff]  ;;  %v14023_v2 = vpack.c.bf16 %v12155_v51, %v12154_v3 }
 0xd4a   :  { %13894 = vmatmul.mubr.msk.f32.vlgmr.msra.gmra.mrb[154].mxu1 %vm3175_vm3, %v9687_v26  ;;  %v6932_v56 = vpop.permute.xlu0 %6931 }
 0xd4b   :  { %v14312_v8 = vpop.eup %14311  ;;  %13899 = vmatmul.mubr.msk.f32.vlgmr.msra.gmra.mrb[146].mxu0 %vm3175_vm3, %v9688_v61  ;;  %13902 = vmatpush3.msra.mxu1 %v16896_v47 }
 0xd4c   :  { %v14314_v35 = vpop.eup %14313  ;;  %v9689_v38 = vmul.f32 %v14312_v8, %v16465_v17  ;;  %13907 = vmatpush3.msra.mxu0 %v16897_v41  ;;  %13903 = vmatprep.mubr.msk.f32.mxu1 %vm14428_vm1, %v16874_v16  ;;  %v16900_v17 = vld [vmem:[#allocation16_spill] sm:$0xff] }
 0xd4d   :  { %v9690_v50 = vmul.f32 %v14314_v35, %v16898_v46  ;;  %13908 = vmatprep.mubr.msk.f32.mxu0 %vm14428_vm1, %v16874_v16  ;;  %13911 = vmatprep.subr.mxu1 %v16874_v16 }
 0xd4e   :  { %13916 = vmatprep.subr.mxu0 %v16874_v16  ;;  %13904 = vmatmul.mubr.msk.f32.vlgmr.msra.gmra.mrb[156].mxu1 %vm3175_vm3, %v9689_v38 }
 0xd4f   :  { %13909 = vmatmul.mubr.msk.f32.vlgmr.msra.gmra.mrb[148].mxu0 %vm3175_vm3, %v9690_v50  ;;  %13912 = vmatpush3.msra.mxu1 %v16899_v42 }
 0xd50   :  { %13917 = vmatpush3.msra.mxu0 %v16900_v17  ;;  %13918 = vmatprep.mubr.msk.f32.mxu0 %vm14428_vm1, %v16874_v16 }
 0xd51   :  { %v14316_v28 = vpop.eup %14315  ;;  %13926 = vmatprep.subr.mxu0 %v16874_v16  ;;  %13913 = vmatprep.mubr.msk.f32.mxu1 %vm14428_vm1, %v16874_v16 }
 0xd52   :  { %v9692_v44 = vmul.f32 %v14316_v28, %v16471_v7  ;;  %13921 = vmatprep.subr.mxu1 %v16874_v16 }
 0xd54   :  { %13919 = vmatmul.mubr.msk.f32.vlgmr.msra.gmra.mrb[150].mxu0 %vm3175_vm3, %v9692_v44 }
 0xd55   :  { %13927 = vmatpush3.msra.mxu0 %v6932_v56  ;;  %13928 = vmatprep.mubr.msk.f32.mxu0 %vm14428_vm1, %v16874_v16 }
 0xd56   :  { %13936 = vmatprep.subr.mxu0 %v16874_v16 }
 0xd75   :  { %v9617_v22 = vpop.xlane.xlu1 %9616 }
 0xd76   :  { %14317 = vrcp.f32 %v9617_v22 }
 0xd79   :  { %v9623_v55 = vpop.xlane.xlu1 %9622 }
 0xd7a   :  { %14319 = vrcp.f32 %v9623_v55 }
 0xd7b   :  { %v9626_v30 = vpop.xlane.xlu0 %9625 }
 0xd7c   :  { %14321 = vrcp.f32 %v9626_v30 }
 0xd7d   :  { %v9629_v37 = vpop.xlane.xlu1 %9628 }
 0xd7e   :  { %14323 = vrcp.f32 %v9629_v37 }
 0xd7f   :  { %v9632_v11 = vpop.xlane.xlu0 %9631 }
 0xd80   :  { %v14318_v7 = vpop.eup %14317  ;;  %14325 = vrcp.f32 %v9632_v11 }
 0xd81   :  { %v9691_v48 = vmul.f32 %v14318_v7, %v16541_v43  ;;  %v6934_v33 = vpop.permute.xlu1 %6933 }
 0xd83   :  { %13914 = vmatmul.mubr.msk.f32.vlgmr.msra.gmra.mrb[158].mxu1 %vm3175_vm3, %v9691_v48  ;;  %v6936_v34 = vpop.permute.xlu0 %6935 }
 0xd84   :  { %v14320_v63 = vpop.eup %14319  ;;  %13922 = vmatpush3.msra.mxu1 %v6930_v24  ;;  %13923 = vmatprep.mubr.msk.f32.mxu1 %vm14428_vm1, %v16874_v16 }
 0xd85   :  { %v9693_v45 = vmul.f32 %v14320_v63, %v16545_v49  ;;  %13931 = vmatprep.subr.mxu1 %v16874_v16 }
 0xd86   :  { %v14322_v25 = vpop.eup %14321 }
 0xd87   :  { %13924 = vmatmul.mubr.msk.f32.vlgmr.msra.gmra.mrb[160].mxu1 %vm3175_vm3, %v9693_v45  ;;  %v9694_v54 = vmul.f32 %v14322_v25, %v16547_v60 }
 0xd88   :  { %v14324_v53 = vpop.eup %14323  ;;  %13932 = vmatpush3.msra.mxu1 %v6934_v33  ;;  %13933 = vmatprep.mubr.msk.f32.mxu1 %vm14428_vm1, %v16874_v16 }
 0xd89   :  { %v9695_v43 = vmul.f32 %v14324_v53, %v16551_v27  ;;  %13929 = vmatmul.mubr.msk.f32.vlgmr.msra.gmra.mrb[152].mxu0 %vm3175_vm3, %v9694_v54  ;;  %14024 = vmatprep.subr.bf16.mxu1 %v14023_v2 }
 0xd8a   :  { %v14326_v62 = vpop.eup %14325  ;;  %13937 = vmatpush3.msra.mxu0 %v6936_v34  ;;  %13938 = vmatprep.mubr.msk.f32.mxu0 %vm14428_vm1, %v16874_v16 }
 0xd8b   :  { %13934 = vmatmul.mubr.msk.f32.vlgmr.msra.gmra.mrb[162].mxu1 %vm3175_vm3, %v9695_v43  ;;  %v9696_v49 = vmul.f32 %v14326_v62, %v16555_v52 }
 0xd8c   :  { %14026 = vmatpush3.bf16.msra.mxu1 %v14023_v2 }
 0xd8d   :  { %13939 = vmatmul.mubr.msk.f32.vlgmr.msra.gmra.mrb[154].mxu0 %vm3175_vm3, %v9696_v49 }
 0xd95   :  { %v16695_v60 = vpop.f32.mrb[124].mxu0 }
 0xd96   :  { %v13790_v32 = vpop.f32.mrb[125].mxu0 }
 0xd97   :  { %v16697_v13 = vpop.f32.mrb[132].mxu1 }
 0xd98   :  { %v13785_v27 = vpop.f32.mrb[133].mxu1 }
 0xd9d   :  { %v16699_v58 = vpop.f32.mrb[126].mxu0 }
 0xd9e   :  { %v13800_v15 = vpop.f32.mrb[127].mxu0 }
 0xd9f   :  { %v16701_v1 = vpop.f32.mrb[134].mxu1 }
 0xda0   :  { %v13795_v4 = vpop.f32.mrb[135].mxu1 }
 0xda1   :  { %v16703_v20 = vpop.f32.mrb[128].mxu0 }
 0xda2   :  { %v13810_v52 = vpop.f32.mrb[129].mxu0 }
 0xda3   :  { %v16705_v19 = vpop.f32.mrb[136].mxu1 }
 0xda4   :  { %v13805_v16 = vpop.f32.mrb[137].mxu1 }
 0xda5   :  { %v16707_v0 = vpop.f32.mrb[130].mxu0 }
 0xda6   :  { %v13820_v29 = vpop.f32.mrb[131].mxu0 }
 0xda7   :  { %v16709_v18 = vpop.f32.mrb[138].mxu1 }
 0xda8   :  { %v13815_v23 = vpop.f32.mrb[139].mxu1 }
 0xdde   :  { %v10423_v57 = vpop.f32.mrb[132].mxu0 }
 0xddf   :  { %v13830_v12 = vpop.f32.mrb[133].mxu0  ;;  %12043 = vrot.lane.b32.xlu0 %v10423_v57, %s14432_s16  ;;  %v10350_v5 = vpop.f32.mrb[140].mxu1 }
 0xde0   :  { %12041 = vrot.lane.b32.xlu1 %v10350_v5, %s14432_s16  ;;  %v13825_v39 = vpop.f32.mrb[141].mxu1  ;;  %v12298_v12 = vld [vmem:[%s16861_s13 + $0x8] sm:$0xff]  ;;  %v12297_v5 = vld [vmem:[%s16861_s13] sm:$0xff] }
 0xdef   :  { %v10569_v6 = vpop.f32.mrb[134].mxu0 }
 0xdf0   :  { %v13840_v21 = vpop.f32.mrb[135].mxu0  ;;  %12047 = vrot.lane.b32.xlu0 %v10569_v6, %s14432_s16 }
 0xdf1   :  { %v10496_v31 = vpop.f32.mrb[142].mxu1 }
 0xdf2   :  { %12045 = vrot.lane.b32.xlu1 %v10496_v31, %s14432_s16  ;;  %v13835_v59 = vpop.f32.mrb[143].mxu1 }
 0xdff   :  { %v10715_v14 = vpop.f32.mrb[136].mxu0 }
 0xe00   :  { %v13850_v40 = vpop.f32.mrb[137].mxu0  ;;  %12051 = vrot.lane.b32.xlu0 %v10715_v14, %s14432_s16 }
 0xe01   :  { %v10642_v36 = vpop.f32.mrb[144].mxu1 }
 0xe02   :  { %12049 = vrot.lane.b32.xlu1 %v10642_v36, %s14432_s16  ;;  %v13845_v10 = vpop.f32.mrb[145].mxu1 }
 0xe0b   :  { %v10861_v9 = vpop.f32.mrb[138].mxu0 }
 0xe0c   :  { %v13860_v26 = vpop.f32.mrb[139].mxu0 }
 0xe0d   :  { %v10788_v61 = vpop.f32.mrb[146].mxu1 }
 0xe0e   :  { %v13855_v8 = vpop.f32.mrb[147].mxu1 }
 0xe0f   :  { %v11007_v47 = vpop.f32.mrb[140].mxu0 }
 0xe10   :  { %v13870_v35 = vpop.f32.mrb[141].mxu0  ;;  %12075 = vrot.lane.b32.xlu0 %v11007_v47, %s14424_s26 }
 0xe11   :  { %v10934_v38 = vpop.f32.mrb[148].mxu1 }
 0xe12   :  { %12073 = vrot.lane.b32.xlu1 %v10934_v38, %s14424_s26  ;;  %v13865_v41 = vpop.f32.mrb[149].mxu1 }
 0xe13   :  { %v11153_v46 = vpop.f32.mrb[142].mxu0 }
 0xe14   :  { %v13880_v50 = vpop.f32.mrb[143].mxu0  ;;  %12079 = vrot.lane.b32.xlu0 %v11153_v46, %s14424_s26 }
 0xe15   :  { %v11080_v42 = vpop.f32.mrb[150].mxu1 }
 0xe16   :  { %12077 = vrot.lane.b32.xlu1 %v11080_v42, %s14424_s26  ;;  %v13875_v17 = vpop.f32.mrb[151].mxu1 }
 0xe17   :  { %v11299_v28 = vpop.f32.mrb[144].mxu0 }
 0xe18   :  { %v13890_v44 = vpop.f32.mrb[145].mxu0 }
 0xe19   :  { %v11226_v56 = vpop.f32.mrb[152].mxu1 }
 0xe1a   :  { %v13885_v24 = vpop.f32.mrb[153].mxu1 }
 0xe1d   :  { %v11372_v22 = vpop.f32.mrb[154].mxu1 }
 0xe1e   :  { %v11445_v55 = vpop.f32.mrb[146].mxu0  ;;  %v13895_v30 = vpop.f32.mrb[155].mxu1 }
 0xe1f   :  { %v13900_v37 = vpop.f32.mrb[147].mxu0 }
 0xe21   :  { %v11518_v7 = vpop.f32.mrb[156].mxu1 }
 0xe22   :  { %v11591_v11 = vpop.f32.mrb[148].mxu0  ;;  %12105 = vrot.lane.b32.xlu1 %v11518_v7, %s14433_s21  ;;  %v13905_v48 = vpop.f32.mrb[157].mxu1 }
 0xe23   :  { %12107 = vrot.lane.b32.xlu0 %v11591_v11, %s14433_s21  ;;  %v13910_v63 = vpop.f32.mrb[149].mxu0 }
 0xe26   :  { %12081 = vrot.lane.b32.xlu1 %v11226_v56, %s14424_s26 }
 0xe27   :  { %12083 = vrot.lane.b32.xlu0 %v11299_v28, %s14424_s26  ;;  %v11737_v45 = vpop.f32.mrb[150].mxu0 }
 0xe28   :  { %v13920_v25 = vpop.f32.mrb[151].mxu0 }
 0xe2b   :  { %12111 = vrot.lane.b32.xlu0 %v11737_v45, %s14433_s21 }
 0xe2f   :  { %12055 = vrot.lane.b32.xlu0 %v10861_v9, %s14432_s16 }
 0xe51   :  { %v12044_v34 = vpop.permute.xlu0 %12043 }
 0xe52   :  { %v12042_v15 = vpop.permute.xlu1 %12041  ;;  %v12130_v3 = vsel %vm774_vm2, %v16695_v60, %v12044_v34 }
 0xe53   :  { %v12129_v10 = vsel %vm774_vm2, %v16697_v13, %v12042_v15 }
 0xe56   :  { %v11664_v33 = vpop.f32.mrb[158].mxu1 }
 0xe57   :  { %12109 = vrot.lane.b32.xlu1 %v11664_v33, %s14433_s21  ;;  %v13915_v53 = vpop.f32.mrb[159].mxu1 }
 0xe5a   :  { %v11810_v54 = vpop.f32.mrb[160].mxu1 }
 0xe5b   :  { %12053 = vrot.lane.b32.xlu1 %v10788_v61, %s14432_s16  ;;  %v13925_v43 = vpop.f32.mrb[161].mxu1 }
 0xe5c   :  { %v11883_v62 = vpop.f32.mrb[152].mxu0 }
 0xe5d   :  { %12115 = vrot.lane.b32.xlu0 %v11883_v62, %s14433_s21  ;;  %v13930_v49 = vpop.f32.mrb[153].mxu0 }
 0xe5e   :  { %v11956_v32 = vpop.f32.mrb[162].mxu1 }
 0xe5f   :  { %12113 = vrot.lane.b32.xlu1 %v11810_v54, %s14433_s21  ;;  %v13935_v27 = vpop.f32.mrb[163].mxu1 }
 0xe60   :  { %v12029_v4 = vpop.f32.mrb[154].mxu0 }
 0xe61   :  { %12087 = vrot.lane.b32.xlu0 %v11445_v55, %s14424_s26  ;;  %v13940_v52 = vpop.f32.mrb[155].mxu0 }
 0xe62   :  { %v12048_v16 = vpop.permute.xlu0 %12047 }
 0xe63   :  { %v12132_v29 = vsel %vm774_vm2, %v16699_v58, %v12048_v16  ;;  %12085 = vrot.lane.b32.xlu1 %v11372_v22, %s14424_s26  ;;  %v12300_v58 = vld [vmem:[%s16861_s13 + $0x18] sm:$0xff] }
 0xe64   :  { %v12046_v23 = vpop.permute.xlu1 %12045 }
 0xe65   :  { %v12131_v57 = vsel %vm774_vm2, %v16701_v1, %v12046_v23  ;;  %12119 = vrot.lane.b32.xlu0 %v12029_v4, %s14433_s21  ;;  %v12299_v1 = vld [vmem:[%s16861_s13 + $0x10] sm:$0xff] }
 0xe67   :  { %12117 = vrot.lane.b32.xlu1 %v11956_v32, %s14433_s21 }
 0xe69   :  { %12308 = vperm.xlu0 %14065, %v12298_v12  }
 0xe6b   :  { %12303 = vperm.xlu1 %14066, %v12297_v5  }
 0xe6d   :  { %12318 = vperm.xlu0 %14065, %v12300_v58  }
 0xe6f   :  { %12313 = vperm.xlu1 %14066, %v12299_v1  }
 0xe72   :  { %v12052_v39 = vpop.permute.xlu0 %12051 }
 0xe73   :  { %v12134_v6 = vsel %vm774_vm2, %v16703_v20, %v12052_v39 }
 0xe74   :  { %v12050_v21 = vpop.permute.xlu1 %12049 }
 0xe75   :  { %v12133_v31 = vsel %vm774_vm2, %v16705_v19, %v12050_v21  ;;  %v12295_v21 = vld [vmem:[%s16860_s12 + $0x10] sm:$0xff] }
 0xe82   :  { %v12076_v14 = vpop.permute.xlu0 %12075 }
 0xe83   :  { %v12138_v9 = vsel %vm3175_vm3, %v12130_v3, %v12076_v14 }
 0xe84   :  { %v12074_v59 = vpop.permute.xlu1 %12073 }
 0xe85   :  { %v12137_v51 = vsel %vm3175_vm3, %v12129_v10, %v12074_v59 }
 0xe86   :  { %v12080_v36 = vpop.permute.xlu0 %12079 }
 0xe87   :  { %v12140_v35 = vsel %vm3175_vm3, %v12132_v29, %v12080_v36 }
 0xe88   :  { %v12078_v40 = vpop.permute.xlu1 %12077 }
 0xe89   :  { %v12139_v47 = vsel %vm3175_vm3, %v12131_v57, %v12078_v40 }
 0xe94   :  { %v12106_v2 = vpop.permute.xlu1 %12105 }
 0xe95   :  { %v12108_v20 = vpop.permute.xlu0 %12107  ;;  %v12145_v26 = vsel %vm5976_vm4, %v12137_v51, %v12106_v2 }
 0xe96   :  { %v12146_v19 = vsel %vm5976_vm4, %v12138_v9, %v12108_v20  ;;  %13945 = vmatprep.mubr.msk.f32.mxu1 %vm97_vm0, %v12145_v26 }
 0xe97   :  { %13946 = vmatmul.mubr.msk.f32.vlgmr.msra.gmra.mrb[164].mxu1 %vm97_vm0, %v12146_v19 }
 0xe98   :  { %v12082_v8 = vpop.permute.xlu1 %12081 }
 0xe99   :  { %v12084_v61 = vpop.permute.xlu0 %12083  ;;  %v12141_v17 = vsel %vm3175_vm3, %v12133_v31, %v12082_v8  ;;  %v12296_v31 = vld [vmem:[%s16860_s12 + $0x18] sm:$0xff] }
 0xe9a   :  { %v12142_v44 = vsel %vm3175_vm3, %v12134_v6, %v12084_v61  ;;  %v12294_v6 = vld [vmem:[%s16860_s12 + $0x8] sm:$0xff] }
 0xe9d   :  { %v12112_v13 = vpop.permute.xlu0 %12111 }
 0xe9e   :  { %v12148_v41 = vsel %vm5976_vm4, %v12140_v35, %v12112_v13 }
 0xea1   :  { %v12056_v46 = vpop.permute.xlu0 %12055 }
 0xea2   :  { %v12136_v7 = vsel %vm774_vm2, %v16707_v0, %v12056_v46  ;;  %v12776_v0 = vld [vmem:[%s16859_s11 + $0x1] ss:$0 sm:$0xff] }
 0xec9   :  { %v12110_v60 = vpop.permute.xlu1 %12109 }
 0xeca   :  { %v12147_v38 = vsel %vm5976_vm4, %v12139_v47, %v12110_v60 }
 0xecb   :  { %13948 = vmatprep.mubr.msk.f32.mxu1 %vm97_vm0, %v12147_v38  ;;  %v12455_v38 = vlaneseq }
 0xecc   :  { %13949 = vmatmul.mubr.msk.f32.gmra.mrb[166].mxu1 %vm97_vm0, %v12148_v41 }
 0xecd   :  { %v12054_v50 = vpop.permute.xlu1 %12053 }
 0xece   :  { %v12135_v30 = vsel %vm774_vm2, %v16709_v18, %v12054_v50  ;;  %v12293_v18 = vld [vmem:[%s16860_s12] sm:$0xff]  ;;  %v12456_v50 = vshrl.u32 %v12455_v38, 7  ;;  %s14434_s12 = smov [#allocation8]  }
 0xecf   :  { %v12116_v42 = vpop.permute.xlu0 %12115  ;;  %13973 = vmatprep.mubr.msk.f32.mxu0 %vm97_vm0, %v12293_v18  ;;  %s12493_s29 = sshll.u32 %s14434_s12, 4  ;;  %s12494_s29 = int_to_ptr.vmem [resolvable:$true] %s12493_s29 }
 0xed0   :  { %v12150_v24 = vsel %vm5976_vm4, %v12142_v44, %v12116_v42  ;;  %v12458_v44 = vadd.s32 16, %v12456_v50  ;;  %s14393_s15 = scalar_lea.vmem %s12494_s29, 16  ;;  %s14397_s17 = scalar_lea.vmem %s12494_s29, 32 }
 0xed1   :  { %v12114_v28 = vpop.permute.xlu1 %12113  ;;  %p14394_p10 = scmp.ne.s32.totalorder %s12494_s29, %s14393_s15  ;;  %p14398_p11 = scmp.lt.s32.totalorder %s12494_s29, %s12494_s29 }
 0xed2   :  { %v12149_v56 = vsel %vm5976_vm4, %v12141_v17, %v12114_v28  ;;  %v12457_v28 = vadd.s32 8, %v12456_v50  ;;  %p14399_p12 = scmp.lt.s32.totalorder %s14397_s17, %s14393_s15 }
 0xed3   :  { %13951 = vmatprep.mubr.msk.f32.mxu1 %vm97_vm0, %v12149_v56  ;;  %v12088_v22 = vpop.permute.xlu0 %12087  ;;  %v12459_v56 = vadd.s32 24, %v12456_v50 }
 0xed4   :  { %13952 = vmatmul.mubr.msk.f32.gmra.mrb[168].mxu1 %vm97_vm0, %v12150_v24  ;;  %v12144_v63 = vsel %vm3175_vm3, %v12136_v7, %v12088_v22  ;;  %p14400_p13 = por %p14399_p12, %p14398_p11 }
 0xed5   :  { %v12086_v55 = vpop.permute.xlu1 %12085  ;;  %v12463_v7 = vcvt.s32.f32 %v12459_v56 }
 0xed6   :  { %v12143_v11 = vsel %vm3175_vm3, %v12135_v30, %v12086_v55  ;;  %v12460_v55 = vcvt.s32.f32 %v12456_v50  ;;  %v12461_v30 = vcvt.s32.f32 %v12457_v28  ;;  %p14401_p0 = pnand %p14400_p13, %p14394_p10 }
 0xed7   :  { %v12120_v37 = vpop.permute.xlu0 %12119 }
 0xed8   :  { %v12152_v25 = vsel %vm5976_vm4, %v12144_v63, %v12120_v37  ;;  %v12462_v37 = vcvt.s32.f32 %v12458_v44 }
 0xed9   :  { %v12118_v48 = vpop.permute.xlu1 %12117 }
 0xeda   :  { %v12151_v45 = vsel %vm5976_vm4, %v12143_v11, %v12118_v48 }
 0xedb   :  { %13954 = vmatprep.mubr.msk.f32.mxu1 %vm97_vm0, %v12151_v45 }
 0xedc   :  { %13955 = vmatmul.mubr.msk.f32.gmra.mrb[170].mxu1 %vm97_vm0, %v12152_v25 }
 0xee8   :  { %v12309_v59 = vpop.permute.xlu0 %12308 }
 0xeea   :  { %v12304_v14 = vpop.permute.xlu1 %12303 }
 0xeec   :  { %v12319_v2 = vpop.permute.xlu0 %12318 }
 0xeee   :  { %v12314_v26 = vpop.permute.xlu1 %12313 }
 0xf6a   :  { %v13947_v33 = vpop.f32.mrb[164].mxu1 }
 0xf6b   :  { %v12260_v53 = vadd.f32 %v13947_v33, %v12776_v0  ;;  %v12254_v54 = vpop.f32.mrb[165].mxu1 }
 0xf6c   :  { %v12255_v43 = vadd.f32 %v12776_v0, %v12254_v54 }
 0xf6e   :  { %v14027_v62 = vpack.c.bf16 %v12260_v53, %v12255_v43 }
 0xf70   :  { %14029 = vmatprep.subr.msk.bf16.mxu0 %vm16796_vm6, %v14027_v62 }
 0xf71   :  { %14032 = vmatpush3.bf16.xpose.msk.msra.mxu0 %vm16796_vm6, %v14027_v62 }
 0xf9f   :  { %v13950_v49 = vpop.f32.mrb[166].mxu1 }
 0xfa0   :  { %v12270_v32 = vadd.f32 %v13950_v49, %v12776_v0  ;;  %v12264_v27 = vpop.f32.mrb[167].mxu1 }
 0xfa1   :  { %v12265_v15 = vadd.f32 %v12776_v0, %v12264_v27 }
 0xfa3   :  { %v14033_v4 = vpack.c.bf16 %v12270_v32, %v12265_v15 }
 0xfa5   :  { %14035 = vmatprep.subr.msk.bf16.mxu0 %vm16796_vm6, %v14033_v4 }
 0xfa6   :  { %14038 = vmatpush3.bf16.xpose.msk.msra.mxu0 %vm16796_vm6, %v14033_v4 }
 0xfa7   :  { %v13953_v52 = vpop.f32.mrb[168].mxu1 }
 0xfa8   :  { %v12280_v16 = vadd.f32 %v13953_v52, %v12776_v0  ;;  %v12274_v29 = vpop.f32.mrb[169].mxu1 }
 0xfa9   :  { %v12275_v23 = vadd.f32 %v12776_v0, %v12274_v29 }
 0xfab   :  { %v14039_v57 = vpack.c.bf16 %v12280_v16, %v12275_v23 }
 0xfad   :  { %14041 = vmatprep.subr.msk.bf16.mxu0 %vm16796_vm6, %v14039_v57 }
 0xfae   :  { %14044 = vmatpush3.bf16.xpose.msk.msra.mxu0 %vm16796_vm6, %v14039_v57 }
 0xfaf   :  { %v13956_v12 = vpop.f32.mrb[170].mxu1 }
 0xfb0   :  { %v12290_v5 = vadd.f32 %v13956_v12, %v12776_v0  ;;  %v12284_v58 = vpop.f32.mrb[171].mxu1 }
 0xfb1   :  { %v12285_v1 = vadd.f32 %v12776_v0, %v12284_v58 }
 0xfb3   :  { %v14045_v39 = vpack.c.bf16 %v12290_v5, %v12285_v1 }
 0xfb5   :  { %14047 = vmatprep.subr.msk.bf16.mxu0 %vm16796_vm6, %v14045_v39 }
 0xfb6   :  { %14050 = vmatpush3.bf16.xpose.msk.msra.mxu0 %vm16796_vm6, %v14045_v39 }
 0xfbd   :  { %13974 = vmatmul.mubr.msk.f32.vlgmr.msra.gmra.mrb[156].mxu0 %vm97_vm0, %v12294_v6 }
 0xfbe   :  { %13976 = vmatprep.mubr.msk.f32.mxu0 %vm97_vm0, %v12295_v21 }
 0xfc1   :  { %13977 = vmatmul.mubr.msk.f32.gmra.mrb[158].mxu0 %vm97_vm0, %v12296_v31 }
0x1090   :  { %v13975_v40 = vpop.f32.mrb[156].mxu0 }
0x1091   :  { %v12429_v36 = vadd.f32 %v13975_v40, %v12309_v59  ;;  %v12423_v10 = vpop.f32.mrb[157].mxu0 }
0x1092   :  { %v12424_v3 = vadd.f32 %v12423_v10, %v12304_v14 }
0x1093   :  { %v12443_v51 = vsel %vm6131_vm5, %v12429_v36, -inf }
0x1094   :  { %v12442_v9 = vsel %vm6131_vm5, %v12424_v3, -inf  ;;  %v13978_v20 = vpop.f32.mrb[158].mxu0 }
0x1095   :  { %v12446_v19 = vmax.f32 %v12442_v9, %v12443_v51  ;;  %v12439_v61 = vadd.f32 %v13978_v20, %v12319_v2  ;;  %v12433_v8 = vpop.f32.mrb[159].mxu0 }
0x1096   :  { %v12434_v13 = vadd.f32 %v12433_v8, %v12314_v26 }
0x1097   :  { %v12445_v47 = vsel %vm6131_vm5, %v12439_v61, -inf }
0x1098   :  { %v12444_v60 = vsel %vm6131_vm5, %v12434_v13, -inf }
0x1099   :  { %v12447_v35 = vmax.f32 %v12444_v60, %v12445_v47 }
0x109b   :  { %v12448_v41 = vmax.f32 %v12446_v19, %v12447_v35 }
0x109d   :  { %v12449_v46 = vrot.slane %v12448_v41, 4 }
0x109f   :  { %v12450_v42 = vmax.f32 %v12448_v41, %v12449_v46 }
0x10a1   :  { %v12451_v17 = vrot.slane %v12450_v42, 2 }
0x10a3   :  { %v12452_v24 = vmax.f32 %v12450_v42, %v12451_v17 }
0x10a5   :  { %v12453_v22 = vrot.slane %v12452_v24, 1 }
0x10a7   :  { %v12454_v11 = vmax.f32 %v12452_v24, %v12453_v22 }
0x10a9   :  { %vm12464_vm7 = vcmp.eq.f32.partialorder %v12424_v3, %v12454_v11  ;;  %vm12465_vm8 = vcmp.eq.f32.partialorder %v12429_v36, %v12454_v11  ;;  %vm12466_vm9 = vcmp.eq.f32.partialorder %v12434_v13, %v12454_v11  ;;  %vm12467_vm10 = vcmp.eq.f32.partialorder %v12439_v61, %v12454_v11 }
0x10aa   :  { %v12468_v48 = vsel %vm12464_vm7, %v12460_v55, 32.0  ;;  %v12469_v63 = vsel %vm12465_vm8, %v12461_v30, 32.0  ;;  %v12470_v45 = vsel %vm12466_vm9, %v12462_v37, 32.0  ;;  %v12471_v25 = vsel %vm12467_vm10, %v12463_v7, 32.0 }
0x10ab   :  { %v12472_v18 = vsel %vm6131_vm5, %v12468_v48, inf  ;;  %v12473_v0 = vsel %vm6131_vm5, %v12469_v63, inf  ;;  %v12474_v33 = vsel %vm6131_vm5, %v12470_v45, inf  ;;  %v12475_v53 = vsel %vm6131_vm5, %v12471_v25, inf }
0x10ac   :  { %v12476_v54 = vmin.f32 %v12472_v18, %v12473_v0  ;;  %v12477_v43 = vmin.f32 %v12474_v33, %v12475_v53 }
0x10ae   :  { %v12478_v34 = vmin.f32 %v12476_v54, %v12477_v43 }
0x10b0   :  { %v12479_v62 = vrot.slane %v12478_v34, 4 }
0x10b2   :  { %v12480_v49 = vmin.f32 %v12478_v34, %v12479_v62 }
0x10b4   :  { %v12481_v32 = vrot.slane %v12480_v49, 2 }
0x10b6   :  { %v12482_v27 = vmin.f32 %v12480_v49, %v12481_v32 }
0x10b8   :  { %v12483_v15 = vrot.slane %v12482_v27, 1 }
0x10ba   :  { %v12484_v4 = vmin.f32 %v12482_v27, %v12483_v15 }
0x10bc   :  { %12486 = vst.msk [vmem:[#allocation8] sm:$0x1] %vm12485_vm11, %v12484_v4 }
0x10bd   :  { %14404 = shalt.err (!%p14401_p0)
}
0x10be   :  { %s14405_s2 = scalar_lea.hbm %s16862_s14, 16 }
0x10bf   :  { %p14406_p1 = scmp.ne.s32.totalorder %s16862_s14, %s14405_s2  ;;  %p14409_p2 = scmp.lt.u32.totalorder %s14405_s2, %s16862_s14 }
0x10c1   :  { %p14411_p3 = pnand %p14409_p2, %p14406_p1 }
0x10c3   :  { %14414 = shalt.err (!%p14411_p3)
}
0x10c4   :  { %12496 = dma.vmem_to_hbm [thread:$0]  %s12494_s29, 16, %s16862_s14, [#allocation4]  }
0x10c5   :  { %14419 = dma.done.wait [#allocation4], 16  }
0x10c6   :  { %14420 = vsyncadd [#allocation4], 4294967280 }
0x10c7   :  { %12500 = vsyncpa [#allocation3], 1 }
0x10c8   :  { %12501 = vsyncpa [#allocation6], 1 }
0x10c9   :  { %12502 = vsyncpa [#allocation4], 1 }

</bundles_post_ra>
